<compile_context>
chip_gen: v6e
topology: v6e:2x2x1
jax: 0.10.0
libtpu: 0.0.40
codegen_flags: <defaults>
</compile_context>

<pallas_src>
import jax
import jax.numpy as jnp
from jax.experimental import pallas as pl
from jax.experimental.pallas import tpu as pltpu


def _round_up(x: int, m: int) -> int:
    return (x + m - 1) // m * m


def _wpq_batch_kernel(t1_ref, t2_ref, aw_ref, out_ref, acc_ref):
    """Grid = (batch tiles, D-reduction tiles).

    t1_ref, t2_ref : (TB, TD) pq-gram count tiles
    aw_ref         : (1, TD)  softplus(weights) tile (precomputed in wrapper)
    out_ref        : (TB, 1)  per-row distances (written at last k only)
    acc_ref        : (TB, TD) f32 VMEM accumulator (elementwise partials)
    """
    k = pl.program_id(1)

    @pl.when(k == 0)
    def _init():
        acc_ref[...] = jnp.zeros_like(acc_ref)

    t1 = t1_ref[...].astype(jnp.float32)
    t2 = t2_ref[...].astype(jnp.float32)
    aw = aw_ref[...].astype(jnp.float32)          # (1, TD): broadcast over rows

    # t1 + t2 - 2*min(t1, t2) == |t1 - t2|   (pure VPU work per step)
    acc_ref[...] += jnp.abs(t1 - t2) * aw

    @pl.when(k == pl.num_programs(1) - 1)
    def _finalize():
        # one cross-lane (XLU) reduce per batch tile, then a tiny store.
        out_ref[...] = jnp.sum(acc_ref[...], axis=-1, keepdims=True)


def weighted_pqgram_distance_batch_pallas(weights, batch1, batch2):
    """(B,) weighted pq-gram distances between row-paired (B, D) batches."""
    assert batch1.shape == batch2.shape and batch1.ndim == 2
    b, d = batch1.shape
    assert weights.shape == (d,)

    # softplus hoisted out of the kernel: EUP transcendentals run once per
    # call (weights are shared by every pair), not once per pair/tile.
    aw = jax.nn.softplus(weights.astype(jnp.float32))

    # --- tile selection -------------------------------------------------------
    d_pad = _round_up(d, 128)
    td = 128
    for cand in range(min(d_pad, 2048), 127, -128):   # largest 128-multiple divisor
        if d_pad % cand == 0:
            td = cand
            break
    tb = 128 if b > 128 else _round_up(b, 8)
    b_pad = _round_up(b, tb)

    # zero padding: padded rows/cols contribute |0 - 0| * aw == 0.
    t1 = jnp.pad(batch1, ((0, b_pad - b), (0, d_pad - d)))
    t2 = jnp.pad(batch2, ((0, b_pad - b), (0, d_pad - d)))
    aw2 = jnp.pad(aw, (0, d_pad - d)).reshape(1, d_pad)

    grid = (b_pad // tb, d_pad // td)
    itemsize = jnp.dtype(batch1.dtype).itemsize
    cost = pl.CostEstimate(
        flops=3 * b_pad * d_pad,
        transcendentals=0,
        bytes_accessed=2 * b_pad * d_pad * itemsize + d_pad * 4 + b_pad * 4,
    )

    out = pl.pallas_call(
        _wpq_batch_kernel,
        out_shape=jax.ShapeDtypeStruct((b_pad, 1), jnp.float32),
        grid_spec=pltpu.PrefetchScalarGridSpec(
            num_scalar_prefetch=0,
            grid=grid,
            in_specs=[
                pl.BlockSpec((tb, td), lambda i, k: (i, k)),
                pl.BlockSpec((tb, td), lambda i, k: (i, k)),
                pl.BlockSpec((1, td), lambda i, k: (0, k)),
            ],
            out_specs=pl.BlockSpec((tb, 1), lambda i, k: (i, 0)),
            scratch_shapes=[pltpu.VMEM((tb, td), jnp.float32)],
        ),
        compiler_params=pltpu.CompilerParams(
            dimension_semantics=("parallel", "arbitrary")),
        cost_estimate=cost,
    )(t1, t2, aw2)

    return out[:b, 0]


def weighted_pqgram_distance_pallas(weights, tensor1, tensor2):
    """Scalar distance between two 1-D pq-gram profiles (module.forward)."""
    dists = weighted_pqgram_distance_batch_pallas(
        weights, tensor1[None, :], tensor2[None, :])
    return dists[0]


class WeightedPqgramDistance:
    """Mirror of the torch module: weights initialized to ones(dimension)."""

    def __init__(self, dimension, positive_pairs=None, negative_pairs=None):
        self.weights = jnp.ones((dimension,), dtype=jnp.float32)  # nn.Parameter(torch.ones(dimension))
        self.positive_pairs = positive_pairs
        self.negative_pairs = negative_pairs

    def forward(self, tensor1, tensor2):
        return weighted_pqgram_distance_pallas(self.weights, tensor1, tensor2)

    def forward_batch(self, batch1, batch2):
        # mirrors weighted_pqgram_distance_batch (the LMNN pair-loop hot path)
        return weighted_pqgram_distance_batch_pallas(self.weights, batch1, batch2)

    # TODO(synk): setPairs / create_pairs_lmnn are host-side random pair
    #             sampling + argsort/label bookkeeping; only their inner
    #             distance calls map to the batched kernel (forward_batch).
    # TODO(synk): training the weights would need a custom_vjp
    #             (d/dweights = |t1 - t2| * sigmoid(weights)); forward-only here.


if __name__ == "__main__":
    key = jax.random.PRNGKey(0)
    dimension = 2500          # not a multiple of 128 -> exercises padding + 2 reduction steps
    k1, k2, k3, k4, k5 = jax.random.split(key, 5)

    def reference(wts, a, c):
        diff = a + c - 2.0 * jnp.minimum(a, c)
        return (diff * jax.nn.softplus(wts)).sum(axis=1)

    # ---- batched path (the hot path used by create_pairs_lmnn) ---------------
    b_small = 5               # single 8-row batch tile
    b_large = 150             # two 128-row batch tiles (parallel axis on v7x)
    w = jax.random.uniform(k1, (dimension,), jnp.float32, -1.0, 1.0)
    x1 = jax.random.uniform(k2, (b_large, dimension), jnp.float32, 0.0, 5.0)
    x2 = jax.random.uniform(k3, (b_large, dimension), jnp.float32, 0.0, 5.0)

    batch_fn = jax.jit(weighted_pqgram_distance_batch_pallas)

    got_large = jax.block_until_ready(batch_fn(w, x1, x2))
    ref_large = reference(w, x1, x2)
    assert jnp.allclose(got_large, ref_large, rtol=1e-4, atol=1e-3), (got_large, ref_large)

    got_small = jax.block_until_ready(batch_fn(w, x1[:b_small], x2[:b_small]))
    ref_small = reference(w, x1[:b_small], x2[:b_small])
    assert jnp.allclose(got_small, ref_small, rtol=1e-4, atol=1e-3), (got_small, ref_small)

    # ---- single-pair module.forward ------------------------------------------
    module = WeightedPqgramDistance(dimension, positive_pairs=[], negative_pairs=[])
    t1 = jax.random.uniform(k4, (dimension,), jnp.float32, 0.0, 5.0)
    t2 = jax.random.uniform(k5, (dimension,), jnp.float32, 0.0, 5.0)
    dist = jax.block_until_ready(module.forward(t1, t2))
    ref = reference(module.weights, t1[None, :], t2[None, :])[0]
    assert jnp.allclose(dist, ref, rtol=1e-4, atol=1e-3), (dist, ref)

    print("KERNEL_OK")
</pallas_src>

<mosaic_0001>
module attributes {stable_mosaic.version = 11 : i64} {
  func.func @_wpq_batch_kernel(%arg0: i32, %arg1: i32, %arg2: memref<128x1280xf32, #tpu.memory_space<vmem>>, %arg3: memref<128x1280xf32, #tpu.memory_space<vmem>>, %arg4: memref<1x1280xf32, #tpu.memory_space<vmem>>, %arg5: memref<128x1xf32, #tpu.memory_space<vmem>>, %arg6: memref<128x1280xf32, #tpu.memory_space<vmem>>) attributes {dimension_semantics = [#tpu.dimension_semantics<parallel>, #tpu.dimension_semantics<arbitrary>], iteration_bounds = array<i64: 2, 2>, scalar_prefetch = 0 : i64, scratch_operands = 1 : i64, tpu.core_type = #tpu.core_type<tc>, window_params = [{transform_indices = @transform_0, window_bounds = array<i64: 128, 1280>}, {transform_indices = @transform_1, window_bounds = array<i64: 128, 1280>}, {transform_indices = @transform_2, window_bounds = array<i64: 1, 1280>}, {transform_indices = @transform_3, window_bounds = array<i64: 128, 1>}]} {
    %c0_i32 = arith.constant 0 : i32
    %0 = arith.cmpi eq, %arg1, %c0_i32 : i32
    %1 = arith.extui %0 : i1 to i32
    %c0_i32_0 = arith.constant 0 : i32
    %2 = arith.cmpi ne, %1, %c0_i32_0 : i32
    scf.if %2 {
      %cst = arith.constant 0.000000e+00 : f32
      %16 = vector.broadcast %cst : f32 to vector<128x1280xf32>
      %c0_11 = arith.constant 0 : index
      %c0_12 = arith.constant 0 : index
      %17 = vector.load %arg6[%c0_11, %c0_12] : memref<128x1280xf32, #tpu.memory_space<vmem>>, vector<128x1280xf32>
      tpu.vector_store %arg6[%c0_11, %c0_12], %16 {strides = array<i32>} : memref<128x1280xf32, #tpu.memory_space<vmem>>, vector<128x1280xf32>,
    } else {
    }
    %c0 = arith.constant 0 : index
    %c0_1 = arith.constant 0 : index
    %3 = vector.load %arg2[%c0, %c0_1] : memref<128x1280xf32, #tpu.memory_space<vmem>>, vector<128x1280xf32>
    %c0_2 = arith.constant 0 : index
    %c0_3 = arith.constant 0 : index
    %4 = vector.load %arg3[%c0_2, %c0_3] : memref<128x1280xf32, #tpu.memory_space<vmem>>, vector<128x1280xf32>
    %c0_4 = arith.constant 0 : index
    %c0_5 = arith.constant 0 : index
    %5 = vector.load %arg4[%c0_4, %c0_5] : memref<1x1280xf32, #tpu.memory_space<vmem>>, vector<1x1280xf32>
    %c0_6 = arith.constant 0 : index
    %c0_7 = arith.constant 0 : index
    %6 = vector.load %arg6[%c0_6, %c0_7] : memref<128x1280xf32, #tpu.memory_space<vmem>>, vector<128x1280xf32>
    %7 = arith.subf %3, %4 : vector<128x1280xf32>
    %8 = math.absf %7 : vector<128x1280xf32>
    %9 = vector.broadcast %5 : vector<1x1280xf32> to vector<128x1280xf32>
    %10 = arith.mulf %8, %9 : vector<128x1280xf32>
    %11 = arith.addf %6, %10 : vector<128x1280xf32>
    %c0_8 = arith.constant 0 : index
    %c0_9 = arith.constant 0 : index
    %12 = vector.load %arg6[%c0_8, %c0_9] : memref<128x1280xf32, #tpu.memory_space<vmem>>, vector<128x1280xf32>
    tpu.vector_store %arg6[%c0_8, %c0_9], %11 {strides = array<i32>} : memref<128x1280xf32, #tpu.memory_space<vmem>>, vector<128x1280xf32>,
    %c1_i32 = arith.constant 1 : i32
    %13 = arith.cmpi eq, %arg1, %c1_i32 : i32
    %14 = arith.extui %13 : i1 to i32
    %c0_i32_10 = arith.constant 0 : i32
    %15 = arith.cmpi ne, %14, %c0_i32_10 : i32
    scf.if %15 {
      %c0_11 = arith.constant 0 : index
      %c0_12 = arith.constant 0 : index
      %16 = vector.load %arg6[%c0_11, %c0_12] : memref<128x1280xf32, #tpu.memory_space<vmem>>, vector<128x1280xf32>
      %cst = arith.constant dense<0.000000e+00> : vector<128xf32>
      %17 = vector.multi_reduction <add>, %16, %cst [1] : vector<128x1280xf32> to vector<128xf32>
      %18 = vector.shape_cast %17 : vector<128xf32> to vector<128x1xf32>
      %c0_13 = arith.constant 0 : index
      %c0_14 = arith.constant 0 : index
      %19 = vector.load %arg5[%c0_13, %c0_14] : memref<128x1xf32, #tpu.memory_space<vmem>>, vector<128x1xf32>
      tpu.vector_store %arg5[%c0_13, %c0_14], %18 {strides = array<i32>} : memref<128x1xf32, #tpu.memory_space<vmem>>, vector<128x1xf32>,
    } else {
    }
    return
  }
  func.func @transform_0(%arg0: i32, %arg1: i32) -> (i32, i32) {
    %c0_i32 = arith.constant 0 : i32
    return %arg0, %arg1 : i32, i32
  }
  func.func @transform_1(%arg0: i32, %arg1: i32) -> (i32, i32) {
    %c0_i32 = arith.constant 0 : i32
    return %arg0, %arg1 : i32, i32
  }
  func.func @transform_2(%arg0: i32, %arg1: i32) -> (i32, i32) {
    %c0_i32 = arith.constant 0 : i32
    %c0_i32_0 = arith.constant 0 : i32
    return %c0_i32, %arg1 : i32, i32
  }
  func.func @transform_3(%arg0: i32, %arg1: i32) -> (i32, i32) {
    %c0_i32 = arith.constant 0 : i32
    %c0_i32_0 = arith.constant 0 : i32
    return %arg0, %c0_i32 : i32, i32
  }
}

</mosaic_0001>

<bundles_post_ra>
// kernel: weighted_pqgram_distance_batch_pallas.1
= control target key start
LH: loop header
LB: loop body
LE: loop exit
PB: predicated region body
PF: predicated region fallthrough
CT: control target
= control target key end

     0   :  { %s3031_s12 = smov 0   ;;  %s3033_s13 = smov 0   ;;  %s4517_s0 = inlined_call_operand.vmem [shape: f32[256,2560], index: 0, kind: input, shape index: {}]   ;;  %s4518_s1 = inlined_call_operand.vmem [shape: f32[256,2560], index: 1, kind: input, shape index: {}]   ;;  %s4519_s2 = inlined_call_operand.vmem [shape: f32[1,2560], index: 2, kind: input, shape index: {}]   ;;  %s4520_s3 = inlined_call_operand.vmem [shape: f32[256,1], index: 3, kind: output, shape index: {}]  }
   0x1   :  { %s3035_s14 = smov 0   ;;  %s3037_s15 = smov 0  }
   0x2   :  { %s3039_s16 = smov 0   ;;  %s3041_s17 = smov 0  }
   0x3   :  { %s3043_s18 = smov 0  }
   0x4 LB: > { %s22_s19 = sadd.s32 1, %s3000_s16  ;;  %s25_s20 = sadd.s32 1, %s3004_s17  ;;  %s3008_s18 = sphi %s3043_s18, %s13_s18   ;;  %s3004_s17 = sphi %s3041_s17, %s4527_s17   ;;  %s3000_s16 = sphi %s3039_s16, %s4526_s16   ;;  %s2996_s15 = sphi %s3037_s15, %s4525_s15   ;;  %s2992_s14 = sphi %s3035_s14, %s4524_s14   ;;  %s2988_s13 = sphi %s3033_s13, %s4523_s13   ;;  %s2984_s12 = sphi %s3031_s12, %s4522_s12  }
   0x5   : > { %p23_p0 = scmp.ge.s32.totalorder %s22_s19, 2  ;;  %p41_p1 = scmp.ne.s32.totalorder %s2988_s13, %s2984_s12 }
   0x6   : > { %p42_p2 = scmp.eq.s32.totalorder %s3008_s18, 0  ;;  %s34_s25 = sadd.s32 1, %s2988_s13 }
   0x7   : > { %s4529_s19 = smov (%p23_p0, %s22_s19), 0  ;;  %s4531_s20 = smov (!%p23_p0, %s25_s20), %s3004_s17 }
   0x8   : > { %p3074_p3 = por %p42_p2, %p41_p1  ;;  %p27_p4 = scmp.ge.s32.totalorder %s4531_s20, 2 }
   0x9   : > { %s30_s22 = ssub.s32 %s3000_s16, %s4529_s19  ;;  %p2878_p6 = scmp.ge.s32.totalorder %s3008_s18, 4 }
   0xa   : > { %s4533_s20 = smov (%p27_p4, %s4531_s20), 0 }
   0xb   : > { %s29_s23 = ssub.s32 %s3004_s17, %s4533_s20  ;;  %147 = sbr.rel (%p2878_p6) target bundleno = 194 (0xc2), region = 16 }
   0xc   : > { %s31_s24 = sor.u32 %s30_s22, %s29_s23 }
   0xd   : > { %p32_p5 = scmp.eq.s32.totalorder %s31_s24, 0 }
   0xf   : > { %s3086_s26 = scalar_select %p32_p5, %s2988_s13, %s34_s25  }
  0x10   : > { %150 = sbr.rel (!%p3074_p3) target bundleno = 105 (0x69), region = 20  ;;  %s152_s27 = sand.u32 (%p3074_p3), 1, %s2988_s13  }
  0x11   : > { %s156_s28 = smul.u32 (%p3074_p3), 10, %s3000_s16 }
  0x12   : > { %s2892_s29 = smul.u32 (%p3074_p3), 1280, %s152_s27 }
  0x13   : > { %s2893_s30 = smul.u32 (%p3074_p3), 320, %s3004_s17 }
  0x14   : > { %s3102_s9 = scalar_lea.vmem (%p3074_p3), [#allocation3], %s2892_s29 }
  0x15   : > { %s158_s4 = sadd.s32 %s2893_s30, %s156_s28 }
  0x16   : > { %s2881_s5 = sshll.u32 %s158_s4, 3 }
  0x17   : > { %s3097_s8 = scalar_lea.vmem %s4517_s0, %s2881_s5 }
  0x18   : > { %v173_v0 = vld [vmem:[%s3097_s8] sm:$0xff]  ;;  %v175_v1 = vld [vmem:[%s3097_s8 + $0x8] sm:$0xff]  ;;  %v177_v2 = vld [vmem:[%s3097_s8 + $0x10] sm:$0xff] }
  0x19   : > { %174 = vst [vmem:[%s3102_s9] sm:$0xff] %v173_v0  ;;  %176 = vst [vmem:[%s3102_s9 + $0x8] sm:$0xff] %v175_v1  ;;  %v179_v3 = vld [vmem:[%s3097_s8 + $0x18] sm:$0xff]  ;;  %v181_v4 = vld [vmem:[%s3097_s8 + $0x20] sm:$0xff] }
  0x1a   : > { %178 = vst [vmem:[%s3102_s9 + $0x10] sm:$0xff] %v177_v2  ;;  %v183_v5 = vld [vmem:[%s3097_s8 + $0x28] sm:$0xff]  ;;  %180 = vst [vmem:[%s3102_s9 + $0x18] sm:$0xff] %v179_v3  ;;  %v185_v6 = vld [vmem:[%s3097_s8 + $0x30] sm:$0xff] }
  0x1b   : > { %182 = vst [vmem:[%s3102_s9 + $0x20] sm:$0xff] %v181_v4  ;;  %184 = vst [vmem:[%s3102_s9 + $0x28] sm:$0xff] %v183_v5  ;;  %v187_v7 = vld [vmem:[%s3097_s8 + $0x38] sm:$0xff]  ;;  %v189_v8 = vld [vmem:[%s3097_s8 + $0x40] sm:$0xff] }
  0x1c   : > { %186 = vst [vmem:[%s3102_s9 + $0x30] sm:$0xff] %v185_v6  ;;  %188 = vst [vmem:[%s3102_s9 + $0x38] sm:$0xff] %v187_v7  ;;  %v191_v9 = vld [vmem:[%s3097_s8 + $0x48] sm:$0xff]  ;;  %v193_v10 = vld [vmem:[%s3097_s8 + $0xa0] sm:$0xff] }
  0x1d   : > { %190 = vst [vmem:[%s3102_s9 + $0x40] sm:$0xff] %v189_v8  ;;  %v195_v11 = vld [vmem:[%s3097_s8 + $0xa8] sm:$0xff]  ;;  %192 = vst [vmem:[%s3102_s9 + $0x48] sm:$0xff] %v191_v9  ;;  %v197_v12 = vld [vmem:[%s3097_s8 + $0xb0] sm:$0xff] }
  0x1e   : > { %194 = vst [vmem:[%s3102_s9 + $0x50] sm:$0xff] %v193_v10  ;;  %196 = vst [vmem:[%s3102_s9 + $0x58] sm:$0xff] %v195_v11  ;;  %v199_v13 = vld [vmem:[%s3097_s8 + $0xb8] sm:$0xff]  ;;  %v201_v14 = vld [vmem:[%s3097_s8 + $0xc0] sm:$0xff] }
  0x1f   : > { %198 = vst [vmem:[%s3102_s9 + $0x60] sm:$0xff] %v197_v12  ;;  %200 = vst [vmem:[%s3102_s9 + $0x68] sm:$0xff] %v199_v13  ;;  %v203_v15 = vld [vmem:[%s3097_s8 + $0xc8] sm:$0xff]  ;;  %v205_v16 = vld [vmem:[%s3097_s8 + $0xd0] sm:$0xff] }
  0x20   : > { %202 = vst [vmem:[%s3102_s9 + $0x70] sm:$0xff] %v201_v14  ;;  %v207_v17 = vld [vmem:[%s3097_s8 + $0xd8] sm:$0xff]  ;;  %204 = vst [vmem:[%s3102_s9 + $0x78] sm:$0xff] %v203_v15  ;;  %v209_v18 = vld [vmem:[%s3097_s8 + $0xe0] sm:$0xff] }
  0x21   : > { %206 = vst [vmem:[%s3102_s9 + $0x80] sm:$0xff] %v205_v16  ;;  %208 = vst [vmem:[%s3102_s9 + $0x88] sm:$0xff] %v207_v17  ;;  %v211_v19 = vld [vmem:[%s3097_s8 + $0xe8] sm:$0xff]  ;;  %v213_v20 = vld [vmem:[%s3097_s8 + $0x140] sm:$0xff] }
  0x22   : > { %210 = vst [vmem:[%s3102_s9 + $0x90] sm:$0xff] %v209_v18  ;;  %212 = vst [vmem:[%s3102_s9 + $0x98] sm:$0xff] %v211_v19  ;;  %v215_v21 = vld [vmem:[%s3097_s8 + $0x148] sm:$0xff]  ;;  %v217_v22 = vld [vmem:[%s3097_s8 + $0x150] sm:$0xff] }
  0x23   : > { %214 = vst [vmem:[%s3102_s9 + $0xa0] sm:$0xff] %v213_v20  ;;  %v219_v23 = vld [vmem:[%s3097_s8 + $0x158] sm:$0xff]  ;;  %216 = vst [vmem:[%s3102_s9 + $0xa8] sm:$0xff] %v215_v21  ;;  %v221_v24 = vld [vmem:[%s3097_s8 + $0x160] sm:$0xff] }
  0x24   : > { %218 = vst [vmem:[%s3102_s9 + $0xb0] sm:$0xff] %v217_v22  ;;  %220 = vst [vmem:[%s3102_s9 + $0xb8] sm:$0xff] %v219_v23  ;;  %v223_v25 = vld [vmem:[%s3097_s8 + $0x168] sm:$0xff]  ;;  %v225_v26 = vld [vmem:[%s3097_s8 + $0x170] sm:$0xff] }
  0x25   : > { %222 = vst [vmem:[%s3102_s9 + $0xc0] sm:$0xff] %v221_v24  ;;  %224 = vst [vmem:[%s3102_s9 + $0xc8] sm:$0xff] %v223_v25  ;;  %v227_v27 = vld [vmem:[%s3097_s8 + $0x178] sm:$0xff]  ;;  %v229_v28 = vld [vmem:[%s3097_s8 + $0x180] sm:$0xff] }
  0x26   : > { %226 = vst [vmem:[%s3102_s9 + $0xd0] sm:$0xff] %v225_v26  ;;  %v231_v29 = vld [vmem:[%s3097_s8 + $0x188] sm:$0xff]  ;;  %228 = vst [vmem:[%s3102_s9 + $0xd8] sm:$0xff] %v227_v27  ;;  %v233_v30 = vld [vmem:[%s3097_s8 + $0x1e0] sm:$0xff] }
  0x27   : > { %230 = vst [vmem:[%s3102_s9 + $0xe0] sm:$0xff] %v229_v28  ;;  %232 = vst [vmem:[%s3102_s9 + $0xe8] sm:$0xff] %v231_v29  ;;  %v235_v31 = vld [vmem:[%s3097_s8 + $0x1e8] sm:$0xff]  ;;  %v237_v32 = vld [vmem:[%s3097_s8 + $0x1f0] sm:$0xff] }
  0x28   : > { %234 = vst [vmem:[%s3102_s9 + $0xf0] sm:$0xff] %v233_v30  ;;  %236 = vst [vmem:[%s3102_s9 + $0xf8] sm:$0xff] %v235_v31  ;;  %v239_v33 = vld [vmem:[%s3097_s8 + $0x1f8] sm:$0xff]  ;;  %v241_v34 = vld [vmem:[%s3097_s8 + $0x200] sm:$0xff] }
  0x29   : > { %238 = vst [vmem:[%s3102_s9 + $0x100] sm:$0xff] %v237_v32  ;;  %v243_v35 = vld [vmem:[%s3097_s8 + $0x208] sm:$0xff]  ;;  %240 = vst [vmem:[%s3102_s9 + $0x108] sm:$0xff] %v239_v33  ;;  %v245_v36 = vld [vmem:[%s3097_s8 + $0x210] sm:$0xff] }
  0x2a   : > { %242 = vst [vmem:[%s3102_s9 + $0x110] sm:$0xff] %v241_v34  ;;  %244 = vst [vmem:[%s3102_s9 + $0x118] sm:$0xff] %v243_v35  ;;  %v247_v37 = vld [vmem:[%s3097_s8 + $0x218] sm:$0xff]  ;;  %v249_v38 = vld [vmem:[%s3097_s8 + $0x220] sm:$0xff] }
  0x2b   : > { %246 = vst [vmem:[%s3102_s9 + $0x120] sm:$0xff] %v245_v36  ;;  %248 = vst [vmem:[%s3102_s9 + $0x128] sm:$0xff] %v247_v37  ;;  %v251_v39 = vld [vmem:[%s3097_s8 + $0x228] sm:$0xff]  ;;  %v253_v40 = vld [vmem:[%s3097_s8 + $0x280] sm:$0xff] }
  0x2c   : > { %250 = vst [vmem:[%s3102_s9 + $0x130] sm:$0xff] %v249_v38  ;;  %v255_v41 = vld [vmem:[%s3097_s8 + $0x288] sm:$0xff]  ;;  %252 = vst [vmem:[%s3102_s9 + $0x138] sm:$0xff] %v251_v39  ;;  %v257_v42 = vld [vmem:[%s3097_s8 + $0x290] sm:$0xff] }
  0x2d   : > { %254 = vst [vmem:[%s3102_s9 + $0x140] sm:$0xff] %v253_v40  ;;  %256 = vst [vmem:[%s3102_s9 + $0x148] sm:$0xff] %v255_v41  ;;  %v259_v43 = vld [vmem:[%s3097_s8 + $0x298] sm:$0xff]  ;;  %v261_v44 = vld [vmem:[%s3097_s8 + $0x2a0] sm:$0xff] }
  0x2e   : > { %258 = vst [vmem:[%s3102_s9 + $0x150] sm:$0xff] %v257_v42  ;;  %260 = vst [vmem:[%s3102_s9 + $0x158] sm:$0xff] %v259_v43  ;;  %v263_v45 = vld [vmem:[%s3097_s8 + $0x2a8] sm:$0xff]  ;;  %v265_v46 = vld [vmem:[%s3097_s8 + $0x2b0] sm:$0xff] }
  0x2f   : > { %262 = vst [vmem:[%s3102_s9 + $0x160] sm:$0xff] %v261_v44  ;;  %v267_v47 = vld [vmem:[%s3097_s8 + $0x2b8] sm:$0xff]  ;;  %264 = vst [vmem:[%s3102_s9 + $0x168] sm:$0xff] %v263_v45  ;;  %v269_v48 = vld [vmem:[%s3097_s8 + $0x2c0] sm:$0xff] }
  0x30   : > { %266 = vst [vmem:[%s3102_s9 + $0x170] sm:$0xff] %v265_v46  ;;  %268 = vst [vmem:[%s3102_s9 + $0x178] sm:$0xff] %v267_v47  ;;  %v271_v49 = vld [vmem:[%s3097_s8 + $0x2c8] sm:$0xff]  ;;  %v273_v50 = vld [vmem:[%s3097_s8 + $0x320] sm:$0xff] }
  0x31   : > { %270 = vst [vmem:[%s3102_s9 + $0x180] sm:$0xff] %v269_v48  ;;  %272 = vst [vmem:[%s3102_s9 + $0x188] sm:$0xff] %v271_v49  ;;  %v275_v51 = vld [vmem:[%s3097_s8 + $0x328] sm:$0xff]  ;;  %v277_v52 = vld [vmem:[%s3097_s8 + $0x330] sm:$0xff] }
  0x32   : > { %274 = vst [vmem:[%s3102_s9 + $0x190] sm:$0xff] %v273_v50  ;;  %v279_v53 = vld [vmem:[%s3097_s8 + $0x338] sm:$0xff]  ;;  %276 = vst [vmem:[%s3102_s9 + $0x198] sm:$0xff] %v275_v51  ;;  %v281_v54 = vld [vmem:[%s3097_s8 + $0x340] sm:$0xff] }
  0x33   : > { %278 = vst [vmem:[%s3102_s9 + $0x1a0] sm:$0xff] %v277_v52  ;;  %280 = vst [vmem:[%s3102_s9 + $0x1a8] sm:$0xff] %v279_v53  ;;  %v283_v55 = vld [vmem:[%s3097_s8 + $0x348] sm:$0xff]  ;;  %v285_v56 = vld [vmem:[%s3097_s8 + $0x350] sm:$0xff] }
  0x34   : > { %282 = vst [vmem:[%s3102_s9 + $0x1b0] sm:$0xff] %v281_v54  ;;  %284 = vst [vmem:[%s3102_s9 + $0x1b8] sm:$0xff] %v283_v55  ;;  %v287_v57 = vld [vmem:[%s3097_s8 + $0x358] sm:$0xff]  ;;  %v289_v58 = vld [vmem:[%s3097_s8 + $0x360] sm:$0xff] }
  0x35   : > { %286 = vst [vmem:[%s3102_s9 + $0x1c0] sm:$0xff] %v285_v56  ;;  %v291_v59 = vld [vmem:[%s3097_s8 + $0x368] sm:$0xff]  ;;  %288 = vst [vmem:[%s3102_s9 + $0x1c8] sm:$0xff] %v287_v57  ;;  %v293_v60 = vld [vmem:[%s3097_s8 + $0x3c0] sm:$0xff] }
  0x36   : > { %290 = vst [vmem:[%s3102_s9 + $0x1d0] sm:$0xff] %v289_v58  ;;  %292 = vst [vmem:[%s3102_s9 + $0x1d8] sm:$0xff] %v291_v59  ;;  %v295_v61 = vld [vmem:[%s3097_s8 + $0x3c8] sm:$0xff]  ;;  %v297_v62 = vld [vmem:[%s3097_s8 + $0x3d0] sm:$0xff] }
  0x37   : > { %294 = vst [vmem:[%s3102_s9 + $0x1e0] sm:$0xff] %v293_v60  ;;  %296 = vst [vmem:[%s3102_s9 + $0x1e8] sm:$0xff] %v295_v61  ;;  %v299_v63 = vld [vmem:[%s3097_s8 + $0x3d8] sm:$0xff]  ;;  %v301_v0 = vld [vmem:[%s3097_s8 + $0x3e0] sm:$0xff] }
  0x38   : > { %298 = vst [vmem:[%s3102_s9 + $0x1f0] sm:$0xff] %v297_v62  ;;  %v303_v1 = vld [vmem:[%s3097_s8 + $0x3e8] sm:$0xff]  ;;  %300 = vst [vmem:[%s3102_s9 + $0x1f8] sm:$0xff] %v299_v63  ;;  %v305_v2 = vld [vmem:[%s3097_s8 + $0x3f0] sm:$0xff] }
  0x39   : > { %302 = vst [vmem:[%s3102_s9 + $0x200] sm:$0xff] %v301_v0  ;;  %304 = vst [vmem:[%s3102_s9 + $0x208] sm:$0xff] %v303_v1  ;;  %v307_v3 = vld [vmem:[%s3097_s8 + $0x3f8] sm:$0xff]  ;;  %v309_v4 = vld [vmem:[%s3097_s8 + $0x400] sm:$0xff] }
  0x3a   : > { %306 = vst [vmem:[%s3102_s9 + $0x210] sm:$0xff] %v305_v2  ;;  %308 = vst [vmem:[%s3102_s9 + $0x218] sm:$0xff] %v307_v3  ;;  %v311_v5 = vld [vmem:[%s3097_s8 + $0x408] sm:$0xff]  ;;  %v313_v6 = vld [vmem:[%s3097_s8 + $0x460] sm:$0xff] }
  0x3b   : > { %310 = vst [vmem:[%s3102_s9 + $0x220] sm:$0xff] %v309_v4  ;;  %v315_v7 = vld [vmem:[%s3097_s8 + $0x468] sm:$0xff]  ;;  %312 = vst [vmem:[%s3102_s9 + $0x228] sm:$0xff] %v311_v5  ;;  %v317_v8 = vld [vmem:[%s3097_s8 + $0x470] sm:$0xff] }
  0x3c   : > { %314 = vst [vmem:[%s3102_s9 + $0x230] sm:$0xff] %v313_v6  ;;  %316 = vst [vmem:[%s3102_s9 + $0x238] sm:$0xff] %v315_v7  ;;  %v319_v9 = vld [vmem:[%s3097_s8 + $0x478] sm:$0xff]  ;;  %v321_v10 = vld [vmem:[%s3097_s8 + $0x480] sm:$0xff] }
  0x3d   : > { %318 = vst [vmem:[%s3102_s9 + $0x240] sm:$0xff] %v317_v8  ;;  %320 = vst [vmem:[%s3102_s9 + $0x248] sm:$0xff] %v319_v9  ;;  %v323_v11 = vld [vmem:[%s3097_s8 + $0x488] sm:$0xff]  ;;  %v325_v12 = vld [vmem:[%s3097_s8 + $0x490] sm:$0xff] }
  0x3e   : > { %322 = vst [vmem:[%s3102_s9 + $0x250] sm:$0xff] %v321_v10  ;;  %v327_v13 = vld [vmem:[%s3097_s8 + $0x498] sm:$0xff]  ;;  %324 = vst [vmem:[%s3102_s9 + $0x258] sm:$0xff] %v323_v11  ;;  %v329_v14 = vld [vmem:[%s3097_s8 + $0x4a0] sm:$0xff] }
  0x3f   : > { %326 = vst [vmem:[%s3102_s9 + $0x260] sm:$0xff] %v325_v12  ;;  %328 = vst [vmem:[%s3102_s9 + $0x268] sm:$0xff] %v327_v13  ;;  %v331_v15 = vld [vmem:[%s3097_s8 + $0x4a8] sm:$0xff]  ;;  %v333_v16 = vld [vmem:[%s3097_s8 + $0x500] sm:$0xff] }
  0x40   : > { %330 = vst [vmem:[%s3102_s9 + $0x270] sm:$0xff] %v329_v14  ;;  %332 = vst [vmem:[%s3102_s9 + $0x278] sm:$0xff] %v331_v15  ;;  %v335_v17 = vld [vmem:[%s3097_s8 + $0x508] sm:$0xff]  ;;  %v337_v18 = vld [vmem:[%s3097_s8 + $0x510] sm:$0xff] }
  0x41   : > { %334 = vst [vmem:[%s3102_s9 + $0x280] sm:$0xff] %v333_v16  ;;  %v339_v19 = vld [vmem:[%s3097_s8 + $0x518] sm:$0xff]  ;;  %336 = vst [vmem:[%s3102_s9 + $0x288] sm:$0xff] %v335_v17  ;;  %v341_v20 = vld [vmem:[%s3097_s8 + $0x520] sm:$0xff] }
  0x42   : > { %338 = vst [vmem:[%s3102_s9 + $0x290] sm:$0xff] %v337_v18  ;;  %340 = vst [vmem:[%s3102_s9 + $0x298] sm:$0xff] %v339_v19  ;;  %v343_v21 = vld [vmem:[%s3097_s8 + $0x528] sm:$0xff]  ;;  %v345_v22 = vld [vmem:[%s3097_s8 + $0x530] sm:$0xff] }
  0x43   : > { %342 = vst [vmem:[%s3102_s9 + $0x2a0] sm:$0xff] %v341_v20  ;;  %344 = vst [vmem:[%s3102_s9 + $0x2a8] sm:$0xff] %v343_v21  ;;  %v347_v23 = vld [vmem:[%s3097_s8 + $0x538] sm:$0xff]  ;;  %v349_v24 = vld [vmem:[%s3097_s8 + $0x540] sm:$0xff] }
  0x44   : > { %346 = vst [vmem:[%s3102_s9 + $0x2b0] sm:$0xff] %v345_v22  ;;  %v351_v25 = vld [vmem:[%s3097_s8 + $0x548] sm:$0xff]  ;;  %348 = vst [vmem:[%s3102_s9 + $0x2b8] sm:$0xff] %v347_v23  ;;  %v353_v26 = vld [vmem:[%s3097_s8 + $0x5a0] sm:$0xff] }
  0x45   : > { %350 = vst [vmem:[%s3102_s9 + $0x2c0] sm:$0xff] %v349_v24  ;;  %352 = vst [vmem:[%s3102_s9 + $0x2c8] sm:$0xff] %v351_v25  ;;  %v355_v27 = vld [vmem:[%s3097_s8 + $0x5a8] sm:$0xff]  ;;  %v357_v28 = vld [vmem:[%s3097_s8 + $0x5b0] sm:$0xff] }
  0x46   : > { %354 = vst [vmem:[%s3102_s9 + $0x2d0] sm:$0xff] %v353_v26  ;;  %356 = vst [vmem:[%s3102_s9 + $0x2d8] sm:$0xff] %v355_v27  ;;  %v359_v29 = vld [vmem:[%s3097_s8 + $0x5b8] sm:$0xff]  ;;  %v361_v30 = vld [vmem:[%s3097_s8 + $0x5c0] sm:$0xff] }
  0x47   : > { %358 = vst [vmem:[%s3102_s9 + $0x2e0] sm:$0xff] %v357_v28  ;;  %v363_v31 = vld [vmem:[%s3097_s8 + $0x5c8] sm:$0xff]  ;;  %360 = vst [vmem:[%s3102_s9 + $0x2e8] sm:$0xff] %v359_v29  ;;  %v365_v32 = vld [vmem:[%s3097_s8 + $0x5d0] sm:$0xff] }
  0x48   : > { %362 = vst [vmem:[%s3102_s9 + $0x2f0] sm:$0xff] %v361_v30  ;;  %364 = vst [vmem:[%s3102_s9 + $0x2f8] sm:$0xff] %v363_v31  ;;  %v367_v33 = vld [vmem:[%s3097_s8 + $0x5d8] sm:$0xff]  ;;  %v369_v34 = vld [vmem:[%s3097_s8 + $0x5e0] sm:$0xff] }
  0x49   : > { %366 = vst [vmem:[%s3102_s9 + $0x300] sm:$0xff] %v365_v32  ;;  %368 = vst [vmem:[%s3102_s9 + $0x308] sm:$0xff] %v367_v33  ;;  %v371_v35 = vld [vmem:[%s3097_s8 + $0x5e8] sm:$0xff]  ;;  %v373_v36 = vld [vmem:[%s3097_s8 + $0x640] sm:$0xff] }
  0x4a   : > { %370 = vst [vmem:[%s3102_s9 + $0x310] sm:$0xff] %v369_v34  ;;  %v375_v37 = vld [vmem:[%s3097_s8 + $0x648] sm:$0xff]  ;;  %372 = vst [vmem:[%s3102_s9 + $0x318] sm:$0xff] %v371_v35  ;;  %v377_v38 = vld [vmem:[%s3097_s8 + $0x650] sm:$0xff] }
  0x4b   : > { %374 = vst [vmem:[%s3102_s9 + $0x320] sm:$0xff] %v373_v36  ;;  %376 = vst [vmem:[%s3102_s9 + $0x328] sm:$0xff] %v375_v37  ;;  %v379_v39 = vld [vmem:[%s3097_s8 + $0x658] sm:$0xff]  ;;  %v381_v40 = vld [vmem:[%s3097_s8 + $0x660] sm:$0xff] }
  0x4c   : > { %378 = vst [vmem:[%s3102_s9 + $0x330] sm:$0xff] %v377_v38  ;;  %380 = vst [vmem:[%s3102_s9 + $0x338] sm:$0xff] %v379_v39  ;;  %v383_v41 = vld [vmem:[%s3097_s8 + $0x668] sm:$0xff]  ;;  %v385_v42 = vld [vmem:[%s3097_s8 + $0x670] sm:$0xff] }
  0x4d   : > { %382 = vst [vmem:[%s3102_s9 + $0x340] sm:$0xff] %v381_v40  ;;  %v387_v43 = vld [vmem:[%s3097_s8 + $0x678] sm:$0xff]  ;;  %384 = vst [vmem:[%s3102_s9 + $0x348] sm:$0xff] %v383_v41  ;;  %v389_v44 = vld [vmem:[%s3097_s8 + $0x680] sm:$0xff] }
  0x4e   : > { %386 = vst [vmem:[%s3102_s9 + $0x350] sm:$0xff] %v385_v42  ;;  %388 = vst [vmem:[%s3102_s9 + $0x358] sm:$0xff] %v387_v43  ;;  %v391_v45 = vld [vmem:[%s3097_s8 + $0x688] sm:$0xff]  ;;  %v393_v46 = vld [vmem:[%s3097_s8 + $0x6e0] sm:$0xff] }
  0x4f   : > { %390 = vst [vmem:[%s3102_s9 + $0x360] sm:$0xff] %v389_v44  ;;  %392 = vst [vmem:[%s3102_s9 + $0x368] sm:$0xff] %v391_v45  ;;  %v395_v47 = vld [vmem:[%s3097_s8 + $0x6e8] sm:$0xff]  ;;  %v397_v48 = vld [vmem:[%s3097_s8 + $0x6f0] sm:$0xff] }
  0x50   : > { %394 = vst [vmem:[%s3102_s9 + $0x370] sm:$0xff] %v393_v46  ;;  %v399_v49 = vld [vmem:[%s3097_s8 + $0x6f8] sm:$0xff]  ;;  %396 = vst [vmem:[%s3102_s9 + $0x378] sm:$0xff] %v395_v47  ;;  %v401_v50 = vld [vmem:[%s3097_s8 + $0x700] sm:$0xff] }
  0x51   : > { %398 = vst [vmem:[%s3102_s9 + $0x380] sm:$0xff] %v397_v48  ;;  %400 = vst [vmem:[%s3102_s9 + $0x388] sm:$0xff] %v399_v49  ;;  %v403_v51 = vld [vmem:[%s3097_s8 + $0x708] sm:$0xff]  ;;  %v405_v52 = vld [vmem:[%s3097_s8 + $0x710] sm:$0xff] }
  0x52   : > { %402 = vst [vmem:[%s3102_s9 + $0x390] sm:$0xff] %v401_v50  ;;  %404 = vst [vmem:[%s3102_s9 + $0x398] sm:$0xff] %v403_v51  ;;  %v407_v53 = vld [vmem:[%s3097_s8 + $0x718] sm:$0xff]  ;;  %v409_v54 = vld [vmem:[%s3097_s8 + $0x720] sm:$0xff] }
  0x53   : > { %406 = vst [vmem:[%s3102_s9 + $0x3a0] sm:$0xff] %v405_v52  ;;  %v411_v55 = vld [vmem:[%s3097_s8 + $0x728] sm:$0xff]  ;;  %408 = vst [vmem:[%s3102_s9 + $0x3a8] sm:$0xff] %v407_v53  ;;  %v413_v56 = vld [vmem:[%s3097_s8 + $0x780] sm:$0xff] }
  0x54   : > { %410 = vst [vmem:[%s3102_s9 + $0x3b0] sm:$0xff] %v409_v54  ;;  %412 = vst [vmem:[%s3102_s9 + $0x3b8] sm:$0xff] %v411_v55  ;;  %v415_v57 = vld [vmem:[%s3097_s8 + $0x788] sm:$0xff]  ;;  %v417_v58 = vld [vmem:[%s3097_s8 + $0x790] sm:$0xff] }
  0x55   : > { %414 = vst [vmem:[%s3102_s9 + $0x3c0] sm:$0xff] %v413_v56  ;;  %416 = vst [vmem:[%s3102_s9 + $0x3c8] sm:$0xff] %v415_v57  ;;  %v419_v59 = vld [vmem:[%s3097_s8 + $0x798] sm:$0xff]  ;;  %v421_v60 = vld [vmem:[%s3097_s8 + $0x7a0] sm:$0xff] }
  0x56   : > { %418 = vst [vmem:[%s3102_s9 + $0x3d0] sm:$0xff] %v417_v58  ;;  %v423_v61 = vld [vmem:[%s3097_s8 + $0x7a8] sm:$0xff]  ;;  %420 = vst [vmem:[%s3102_s9 + $0x3d8] sm:$0xff] %v419_v59  ;;  %v425_v62 = vld [vmem:[%s3097_s8 + $0x7b0] sm:$0xff] }
  0x57   : > { %422 = vst [vmem:[%s3102_s9 + $0x3e0] sm:$0xff] %v421_v60  ;;  %424 = vst [vmem:[%s3102_s9 + $0x3e8] sm:$0xff] %v423_v61  ;;  %v427_v63 = vld [vmem:[%s3097_s8 + $0x7b8] sm:$0xff]  ;;  %v429_v0 = vld [vmem:[%s3097_s8 + $0x7c0] sm:$0xff] }
  0x58   : > { %426 = vst [vmem:[%s3102_s9 + $0x3f0] sm:$0xff] %v425_v62  ;;  %428 = vst [vmem:[%s3102_s9 + $0x3f8] sm:$0xff] %v427_v63  ;;  %v431_v1 = vld [vmem:[%s3097_s8 + $0x7c8] sm:$0xff]  ;;  %v433_v2 = vld [vmem:[%s3097_s8 + $0x820] sm:$0xff] }
  0x59   : > { %430 = vst [vmem:[%s3102_s9 + $0x400] sm:$0xff] %v429_v0  ;;  %v435_v3 = vld [vmem:[%s3097_s8 + $0x828] sm:$0xff]  ;;  %432 = vst [vmem:[%s3102_s9 + $0x408] sm:$0xff] %v431_v1  ;;  %v437_v4 = vld [vmem:[%s3097_s8 + $0x830] sm:$0xff] }
  0x5a   : > { %434 = vst [vmem:[%s3102_s9 + $0x410] sm:$0xff] %v433_v2  ;;  %436 = vst [vmem:[%s3102_s9 + $0x418] sm:$0xff] %v435_v3  ;;  %v439_v5 = vld [vmem:[%s3097_s8 + $0x838] sm:$0xff]  ;;  %v441_v6 = vld [vmem:[%s3097_s8 + $0x840] sm:$0xff] }
  0x5b   : > { %438 = vst [vmem:[%s3102_s9 + $0x420] sm:$0xff] %v437_v4  ;;  %440 = vst [vmem:[%s3102_s9 + $0x428] sm:$0xff] %v439_v5  ;;  %v443_v7 = vld [vmem:[%s3097_s8 + $0x848] sm:$0xff]  ;;  %v445_v8 = vld [vmem:[%s3097_s8 + $0x850] sm:$0xff] }
  0x5c   : > { %442 = vst [vmem:[%s3102_s9 + $0x430] sm:$0xff] %v441_v6  ;;  %v447_v9 = vld [vmem:[%s3097_s8 + $0x858] sm:$0xff]  ;;  %444 = vst [vmem:[%s3102_s9 + $0x438] sm:$0xff] %v443_v7  ;;  %v449_v10 = vld [vmem:[%s3097_s8 + $0x860] sm:$0xff] }
  0x5d   : > { %446 = vst [vmem:[%s3102_s9 + $0x440] sm:$0xff] %v445_v8  ;;  %448 = vst [vmem:[%s3102_s9 + $0x448] sm:$0xff] %v447_v9  ;;  %v451_v11 = vld [vmem:[%s3097_s8 + $0x868] sm:$0xff]  ;;  %v453_v12 = vld [vmem:[%s3097_s8 + $0x8c0] sm:$0xff] }
  0x5e   : > { %450 = vst [vmem:[%s3102_s9 + $0x450] sm:$0xff] %v449_v10  ;;  %452 = vst [vmem:[%s3102_s9 + $0x458] sm:$0xff] %v451_v11  ;;  %v455_v13 = vld [vmem:[%s3097_s8 + $0x8c8] sm:$0xff]  ;;  %v457_v14 = vld [vmem:[%s3097_s8 + $0x8d0] sm:$0xff] }
  0x5f   : > { %454 = vst [vmem:[%s3102_s9 + $0x460] sm:$0xff] %v453_v12  ;;  %v459_v15 = vld [vmem:[%s3097_s8 + $0x8d8] sm:$0xff]  ;;  %456 = vst [vmem:[%s3102_s9 + $0x468] sm:$0xff] %v455_v13  ;;  %v461_v16 = vld [vmem:[%s3097_s8 + $0x8e0] sm:$0xff] }
  0x60   : > { %458 = vst [vmem:[%s3102_s9 + $0x470] sm:$0xff] %v457_v14  ;;  %460 = vst [vmem:[%s3102_s9 + $0x478] sm:$0xff] %v459_v15  ;;  %v463_v17 = vld [vmem:[%s3097_s8 + $0x8e8] sm:$0xff]  ;;  %v465_v18 = vld [vmem:[%s3097_s8 + $0x8f0] sm:$0xff] }
  0x61   : > { %462 = vst [vmem:[%s3102_s9 + $0x480] sm:$0xff] %v461_v16  ;;  %464 = vst [vmem:[%s3102_s9 + $0x488] sm:$0xff] %v463_v17  ;;  %v467_v19 = vld [vmem:[%s3097_s8 + $0x8f8] sm:$0xff]  ;;  %v469_v20 = vld [vmem:[%s3097_s8 + $0x900] sm:$0xff] }
  0x62   : > { %466 = vst [vmem:[%s3102_s9 + $0x490] sm:$0xff] %v465_v18  ;;  %v471_v21 = vld [vmem:[%s3097_s8 + $0x908] sm:$0xff]  ;;  %468 = vst [vmem:[%s3102_s9 + $0x498] sm:$0xff] %v467_v19  ;;  %v473_v22 = vld [vmem:[%s3097_s8 + $0x960] sm:$0xff] }
  0x63   : > { %470 = vst [vmem:[%s3102_s9 + $0x4a0] sm:$0xff] %v469_v20  ;;  %472 = vst [vmem:[%s3102_s9 + $0x4a8] sm:$0xff] %v471_v21  ;;  %v475_v23 = vld [vmem:[%s3097_s8 + $0x968] sm:$0xff]  ;;  %v477_v24 = vld [vmem:[%s3097_s8 + $0x970] sm:$0xff] }
  0x64   : > { %474 = vst [vmem:[%s3102_s9 + $0x4b0] sm:$0xff] %v473_v22  ;;  %476 = vst [vmem:[%s3102_s9 + $0x4b8] sm:$0xff] %v475_v23  ;;  %v479_v25 = vld [vmem:[%s3097_s8 + $0x978] sm:$0xff]  ;;  %v481_v26 = vld [vmem:[%s3097_s8 + $0x980] sm:$0xff] }
  0x65   : > { %478 = vst [vmem:[%s3102_s9 + $0x4c0] sm:$0xff] %v477_v24  ;;  %v483_v27 = vld [vmem:[%s3097_s8 + $0x988] sm:$0xff]  ;;  %480 = vst [vmem:[%s3102_s9 + $0x4c8] sm:$0xff] %v479_v25  ;;  %v485_v28 = vld [vmem:[%s3097_s8 + $0x990] sm:$0xff] }
  0x66   : > { %482 = vst [vmem:[%s3102_s9 + $0x4d0] sm:$0xff] %v481_v26  ;;  %484 = vst [vmem:[%s3102_s9 + $0x4d8] sm:$0xff] %v483_v27  ;;  %v487_v29 = vld [vmem:[%s3097_s8 + $0x998] sm:$0xff]  ;;  %v489_v30 = vld [vmem:[%s3097_s8 + $0x9a0] sm:$0xff] }
  0x67   : > { %486 = vst [vmem:[%s3102_s9 + $0x4e0] sm:$0xff] %v485_v28  ;;  %488 = vst [vmem:[%s3102_s9 + $0x4e8] sm:$0xff] %v487_v29  ;;  %v491_v31 = vld [vmem:[%s3097_s8 + $0x9a8] sm:$0xff] }
  0x68   : > { %490 = vst [vmem:[%s3102_s9 + $0x4f0] sm:$0xff] %v489_v30  ;;  %492 = vst [vmem:[%s3102_s9 + $0x4f8] sm:$0xff] %v491_v31 }
  0x69 PF: > { %498 = sbr.rel (!%p3074_p3) target bundleno = 194 (0xc2), region = 43  ;;  %s500_s10 = sand.u32 (%p3074_p3), 1, %s2988_s13  }
  0x6a   : > { %s504_s11 = smul.u32 (%p3074_p3), 10, %s3000_s16 }
  0x6b   : > { %s2894_s22 = smul.u32 (%p3074_p3), 1280, %s500_s10 }
  0x6c   : > { %s2895_s23 = smul.u32 (%p3074_p3), 320, %s3004_s17 }
  0x6d   : > { %s3434_s21 = scalar_lea.vmem (%p3074_p3), [#allocation4], %s2894_s22 }
  0x6e   : > { %s506_s24 = sadd.s32 %s2895_s23, %s504_s11 }
  0x6f   : > { %s2884_s25 = sshll.u32 %s506_s24, 3 }
  0x70   : > { %s3429_s29 = scalar_lea.vmem %s4518_s1, %s2884_s25 }
  0x71   : > { %v521_v32 = vld [vmem:[%s3429_s29] sm:$0xff]  ;;  %v523_v33 = vld [vmem:[%s3429_s29 + $0x8] sm:$0xff]  ;;  %v525_v34 = vld [vmem:[%s3429_s29 + $0x10] sm:$0xff] }
  0x72   : > { %522 = vst [vmem:[%s3434_s21] sm:$0xff] %v521_v32  ;;  %524 = vst [vmem:[%s3434_s21 + $0x8] sm:$0xff] %v523_v33  ;;  %v527_v35 = vld [vmem:[%s3429_s29 + $0x18] sm:$0xff]  ;;  %v529_v36 = vld [vmem:[%s3429_s29 + $0x20] sm:$0xff] }
  0x73   : > { %526 = vst [vmem:[%s3434_s21 + $0x10] sm:$0xff] %v525_v34  ;;  %v531_v37 = vld [vmem:[%s3429_s29 + $0x28] sm:$0xff]  ;;  %528 = vst [vmem:[%s3434_s21 + $0x18] sm:$0xff] %v527_v35  ;;  %v533_v38 = vld [vmem:[%s3429_s29 + $0x30] sm:$0xff] }
  0x74   : > { %530 = vst [vmem:[%s3434_s21 + $0x20] sm:$0xff] %v529_v36  ;;  %532 = vst [vmem:[%s3434_s21 + $0x28] sm:$0xff] %v531_v37  ;;  %v535_v39 = vld [vmem:[%s3429_s29 + $0x38] sm:$0xff]  ;;  %v537_v40 = vld [vmem:[%s3429_s29 + $0x40] sm:$0xff] }
  0x75   : > { %534 = vst [vmem:[%s3434_s21 + $0x30] sm:$0xff] %v533_v38  ;;  %536 = vst [vmem:[%s3434_s21 + $0x38] sm:$0xff] %v535_v39  ;;  %v539_v41 = vld [vmem:[%s3429_s29 + $0x48] sm:$0xff]  ;;  %v541_v42 = vld [vmem:[%s3429_s29 + $0xa0] sm:$0xff] }
  0x76   : > { %538 = vst [vmem:[%s3434_s21 + $0x40] sm:$0xff] %v537_v40  ;;  %v543_v43 = vld [vmem:[%s3429_s29 + $0xa8] sm:$0xff]  ;;  %540 = vst [vmem:[%s3434_s21 + $0x48] sm:$0xff] %v539_v41  ;;  %v545_v44 = vld [vmem:[%s3429_s29 + $0xb0] sm:$0xff] }
  0x77   : > { %542 = vst [vmem:[%s3434_s21 + $0x50] sm:$0xff] %v541_v42  ;;  %544 = vst [vmem:[%s3434_s21 + $0x58] sm:$0xff] %v543_v43  ;;  %v547_v45 = vld [vmem:[%s3429_s29 + $0xb8] sm:$0xff]  ;;  %v549_v46 = vld [vmem:[%s3429_s29 + $0xc0] sm:$0xff] }
  0x78   : > { %546 = vst [vmem:[%s3434_s21 + $0x60] sm:$0xff] %v545_v44  ;;  %548 = vst [vmem:[%s3434_s21 + $0x68] sm:$0xff] %v547_v45  ;;  %v551_v47 = vld [vmem:[%s3429_s29 + $0xc8] sm:$0xff]  ;;  %v553_v48 = vld [vmem:[%s3429_s29 + $0xd0] sm:$0xff] }
  0x79   : > { %550 = vst [vmem:[%s3434_s21 + $0x70] sm:$0xff] %v549_v46  ;;  %v555_v49 = vld [vmem:[%s3429_s29 + $0xd8] sm:$0xff]  ;;  %552 = vst [vmem:[%s3434_s21 + $0x78] sm:$0xff] %v551_v47  ;;  %v557_v50 = vld [vmem:[%s3429_s29 + $0xe0] sm:$0xff] }
  0x7a   : > { %554 = vst [vmem:[%s3434_s21 + $0x80] sm:$0xff] %v553_v48  ;;  %556 = vst [vmem:[%s3434_s21 + $0x88] sm:$0xff] %v555_v49  ;;  %v559_v51 = vld [vmem:[%s3429_s29 + $0xe8] sm:$0xff]  ;;  %v561_v52 = vld [vmem:[%s3429_s29 + $0x140] sm:$0xff] }
  0x7b   : > { %558 = vst [vmem:[%s3434_s21 + $0x90] sm:$0xff] %v557_v50  ;;  %560 = vst [vmem:[%s3434_s21 + $0x98] sm:$0xff] %v559_v51  ;;  %v563_v53 = vld [vmem:[%s3429_s29 + $0x148] sm:$0xff]  ;;  %v565_v54 = vld [vmem:[%s3429_s29 + $0x150] sm:$0xff] }
  0x7c   : > { %562 = vst [vmem:[%s3434_s21 + $0xa0] sm:$0xff] %v561_v52  ;;  %v567_v55 = vld [vmem:[%s3429_s29 + $0x158] sm:$0xff]  ;;  %564 = vst [vmem:[%s3434_s21 + $0xa8] sm:$0xff] %v563_v53  ;;  %v569_v56 = vld [vmem:[%s3429_s29 + $0x160] sm:$0xff] }
  0x7d   : > { %566 = vst [vmem:[%s3434_s21 + $0xb0] sm:$0xff] %v565_v54  ;;  %568 = vst [vmem:[%s3434_s21 + $0xb8] sm:$0xff] %v567_v55  ;;  %v571_v57 = vld [vmem:[%s3429_s29 + $0x168] sm:$0xff]  ;;  %v573_v58 = vld [vmem:[%s3429_s29 + $0x170] sm:$0xff] }
  0x7e   : > { %570 = vst [vmem:[%s3434_s21 + $0xc0] sm:$0xff] %v569_v56  ;;  %572 = vst [vmem:[%s3434_s21 + $0xc8] sm:$0xff] %v571_v57  ;;  %v575_v59 = vld [vmem:[%s3429_s29 + $0x178] sm:$0xff]  ;;  %v577_v60 = vld [vmem:[%s3429_s29 + $0x180] sm:$0xff] }
  0x7f   : > { %574 = vst [vmem:[%s3434_s21 + $0xd0] sm:$0xff] %v573_v58  ;;  %v579_v61 = vld [vmem:[%s3429_s29 + $0x188] sm:$0xff]  ;;  %576 = vst [vmem:[%s3434_s21 + $0xd8] sm:$0xff] %v575_v59  ;;  %v581_v62 = vld [vmem:[%s3429_s29 + $0x1e0] sm:$0xff] }
  0x80   : > { %578 = vst [vmem:[%s3434_s21 + $0xe0] sm:$0xff] %v577_v60  ;;  %580 = vst [vmem:[%s3434_s21 + $0xe8] sm:$0xff] %v579_v61  ;;  %v583_v63 = vld [vmem:[%s3429_s29 + $0x1e8] sm:$0xff]  ;;  %v585_v0 = vld [vmem:[%s3429_s29 + $0x1f0] sm:$0xff] }
  0x81   : > { %582 = vst [vmem:[%s3434_s21 + $0xf0] sm:$0xff] %v581_v62  ;;  %584 = vst [vmem:[%s3434_s21 + $0xf8] sm:$0xff] %v583_v63  ;;  %v587_v1 = vld [vmem:[%s3429_s29 + $0x1f8] sm:$0xff]  ;;  %v589_v2 = vld [vmem:[%s3429_s29 + $0x200] sm:$0xff] }
  0x82   : > { %586 = vst [vmem:[%s3434_s21 + $0x100] sm:$0xff] %v585_v0  ;;  %v591_v3 = vld [vmem:[%s3429_s29 + $0x208] sm:$0xff]  ;;  %588 = vst [vmem:[%s3434_s21 + $0x108] sm:$0xff] %v587_v1  ;;  %v593_v4 = vld [vmem:[%s3429_s29 + $0x210] sm:$0xff] }
  0x83   : > { %590 = vst [vmem:[%s3434_s21 + $0x110] sm:$0xff] %v589_v2  ;;  %592 = vst [vmem:[%s3434_s21 + $0x118] sm:$0xff] %v591_v3  ;;  %v595_v5 = vld [vmem:[%s3429_s29 + $0x218] sm:$0xff]  ;;  %v597_v6 = vld [vmem:[%s3429_s29 + $0x220] sm:$0xff] }
  0x84   : > { %594 = vst [vmem:[%s3434_s21 + $0x120] sm:$0xff] %v593_v4  ;;  %596 = vst [vmem:[%s3434_s21 + $0x128] sm:$0xff] %v595_v5  ;;  %v599_v7 = vld [vmem:[%s3429_s29 + $0x228] sm:$0xff]  ;;  %v601_v8 = vld [vmem:[%s3429_s29 + $0x280] sm:$0xff] }
  0x85   : > { %598 = vst [vmem:[%s3434_s21 + $0x130] sm:$0xff] %v597_v6  ;;  %v603_v9 = vld [vmem:[%s3429_s29 + $0x288] sm:$0xff]  ;;  %600 = vst [vmem:[%s3434_s21 + $0x138] sm:$0xff] %v599_v7  ;;  %v605_v10 = vld [vmem:[%s3429_s29 + $0x290] sm:$0xff] }
  0x86   : > { %602 = vst [vmem:[%s3434_s21 + $0x140] sm:$0xff] %v601_v8  ;;  %604 = vst [vmem:[%s3434_s21 + $0x148] sm:$0xff] %v603_v9  ;;  %v607_v11 = vld [vmem:[%s3429_s29 + $0x298] sm:$0xff]  ;;  %v609_v12 = vld [vmem:[%s3429_s29 + $0x2a0] sm:$0xff] }
  0x87   : > { %606 = vst [vmem:[%s3434_s21 + $0x150] sm:$0xff] %v605_v10  ;;  %608 = vst [vmem:[%s3434_s21 + $0x158] sm:$0xff] %v607_v11  ;;  %v611_v13 = vld [vmem:[%s3429_s29 + $0x2a8] sm:$0xff]  ;;  %v613_v14 = vld [vmem:[%s3429_s29 + $0x2b0] sm:$0xff] }
  0x88   : > { %610 = vst [vmem:[%s3434_s21 + $0x160] sm:$0xff] %v609_v12  ;;  %v615_v15 = vld [vmem:[%s3429_s29 + $0x2b8] sm:$0xff]  ;;  %612 = vst [vmem:[%s3434_s21 + $0x168] sm:$0xff] %v611_v13  ;;  %v617_v16 = vld [vmem:[%s3429_s29 + $0x2c0] sm:$0xff] }
  0x89   : > { %614 = vst [vmem:[%s3434_s21 + $0x170] sm:$0xff] %v613_v14  ;;  %616 = vst [vmem:[%s3434_s21 + $0x178] sm:$0xff] %v615_v15  ;;  %v619_v17 = vld [vmem:[%s3429_s29 + $0x2c8] sm:$0xff]  ;;  %v621_v18 = vld [vmem:[%s3429_s29 + $0x320] sm:$0xff] }
  0x8a   : > { %618 = vst [vmem:[%s3434_s21 + $0x180] sm:$0xff] %v617_v16  ;;  %620 = vst [vmem:[%s3434_s21 + $0x188] sm:$0xff] %v619_v17  ;;  %v623_v19 = vld [vmem:[%s3429_s29 + $0x328] sm:$0xff]  ;;  %v625_v20 = vld [vmem:[%s3429_s29 + $0x330] sm:$0xff] }
  0x8b   : > { %622 = vst [vmem:[%s3434_s21 + $0x190] sm:$0xff] %v621_v18  ;;  %v627_v21 = vld [vmem:[%s3429_s29 + $0x338] sm:$0xff]  ;;  %624 = vst [vmem:[%s3434_s21 + $0x198] sm:$0xff] %v623_v19  ;;  %v629_v22 = vld [vmem:[%s3429_s29 + $0x340] sm:$0xff] }
  0x8c   : > { %626 = vst [vmem:[%s3434_s21 + $0x1a0] sm:$0xff] %v625_v20  ;;  %628 = vst [vmem:[%s3434_s21 + $0x1a8] sm:$0xff] %v627_v21  ;;  %v631_v23 = vld [vmem:[%s3429_s29 + $0x348] sm:$0xff]  ;;  %v633_v24 = vld [vmem:[%s3429_s29 + $0x350] sm:$0xff] }
  0x8d   : > { %630 = vst [vmem:[%s3434_s21 + $0x1b0] sm:$0xff] %v629_v22  ;;  %632 = vst [vmem:[%s3434_s21 + $0x1b8] sm:$0xff] %v631_v23  ;;  %v635_v25 = vld [vmem:[%s3429_s29 + $0x358] sm:$0xff]  ;;  %v637_v26 = vld [vmem:[%s3429_s29 + $0x360] sm:$0xff] }
  0x8e   : > { %634 = vst [vmem:[%s3434_s21 + $0x1c0] sm:$0xff] %v633_v24  ;;  %v639_v27 = vld [vmem:[%s3429_s29 + $0x368] sm:$0xff]  ;;  %636 = vst [vmem:[%s3434_s21 + $0x1c8] sm:$0xff] %v635_v25  ;;  %v641_v28 = vld [vmem:[%s3429_s29 + $0x3c0] sm:$0xff] }
  0x8f   : > { %638 = vst [vmem:[%s3434_s21 + $0x1d0] sm:$0xff] %v637_v26  ;;  %640 = vst [vmem:[%s3434_s21 + $0x1d8] sm:$0xff] %v639_v27  ;;  %v643_v29 = vld [vmem:[%s3429_s29 + $0x3c8] sm:$0xff]  ;;  %v645_v30 = vld [vmem:[%s3429_s29 + $0x3d0] sm:$0xff] }
  0x90   : > { %642 = vst [vmem:[%s3434_s21 + $0x1e0] sm:$0xff] %v641_v28  ;;  %644 = vst [vmem:[%s3434_s21 + $0x1e8] sm:$0xff] %v643_v29  ;;  %v647_v31 = vld [vmem:[%s3429_s29 + $0x3d8] sm:$0xff]  ;;  %v649_v32 = vld [vmem:[%s3429_s29 + $0x3e0] sm:$0xff] }
  0x91   : > { %646 = vst [vmem:[%s3434_s21 + $0x1f0] sm:$0xff] %v645_v30  ;;  %v651_v33 = vld [vmem:[%s3429_s29 + $0x3e8] sm:$0xff]  ;;  %648 = vst [vmem:[%s3434_s21 + $0x1f8] sm:$0xff] %v647_v31  ;;  %v653_v34 = vld [vmem:[%s3429_s29 + $0x3f0] sm:$0xff] }
  0x92   : > { %650 = vst [vmem:[%s3434_s21 + $0x200] sm:$0xff] %v649_v32  ;;  %652 = vst [vmem:[%s3434_s21 + $0x208] sm:$0xff] %v651_v33  ;;  %v655_v35 = vld [vmem:[%s3429_s29 + $0x3f8] sm:$0xff]  ;;  %v657_v36 = vld [vmem:[%s3429_s29 + $0x400] sm:$0xff] }
  0x93   : > { %654 = vst [vmem:[%s3434_s21 + $0x210] sm:$0xff] %v653_v34  ;;  %656 = vst [vmem:[%s3434_s21 + $0x218] sm:$0xff] %v655_v35  ;;  %v659_v37 = vld [vmem:[%s3429_s29 + $0x408] sm:$0xff]  ;;  %v661_v38 = vld [vmem:[%s3429_s29 + $0x460] sm:$0xff] }
  0x94   : > { %658 = vst [vmem:[%s3434_s21 + $0x220] sm:$0xff] %v657_v36  ;;  %v663_v39 = vld [vmem:[%s3429_s29 + $0x468] sm:$0xff]  ;;  %660 = vst [vmem:[%s3434_s21 + $0x228] sm:$0xff] %v659_v37  ;;  %v665_v40 = vld [vmem:[%s3429_s29 + $0x470] sm:$0xff] }
  0x95   : > { %662 = vst [vmem:[%s3434_s21 + $0x230] sm:$0xff] %v661_v38  ;;  %664 = vst [vmem:[%s3434_s21 + $0x238] sm:$0xff] %v663_v39  ;;  %v667_v41 = vld [vmem:[%s3429_s29 + $0x478] sm:$0xff]  ;;  %v669_v42 = vld [vmem:[%s3429_s29 + $0x480] sm:$0xff] }
  0x96   : > { %666 = vst [vmem:[%s3434_s21 + $0x240] sm:$0xff] %v665_v40  ;;  %668 = vst [vmem:[%s3434_s21 + $0x248] sm:$0xff] %v667_v41  ;;  %v671_v43 = vld [vmem:[%s3429_s29 + $0x488] sm:$0xff]  ;;  %v673_v44 = vld [vmem:[%s3429_s29 + $0x490] sm:$0xff] }
  0x97   : > { %670 = vst [vmem:[%s3434_s21 + $0x250] sm:$0xff] %v669_v42  ;;  %v675_v45 = vld [vmem:[%s3429_s29 + $0x498] sm:$0xff]  ;;  %672 = vst [vmem:[%s3434_s21 + $0x258] sm:$0xff] %v671_v43  ;;  %v677_v46 = vld [vmem:[%s3429_s29 + $0x4a0] sm:$0xff] }
  0x98   : > { %674 = vst [vmem:[%s3434_s21 + $0x260] sm:$0xff] %v673_v44  ;;  %676 = vst [vmem:[%s3434_s21 + $0x268] sm:$0xff] %v675_v45  ;;  %v679_v47 = vld [vmem:[%s3429_s29 + $0x4a8] sm:$0xff]  ;;  %v681_v48 = vld [vmem:[%s3429_s29 + $0x500] sm:$0xff] }
  0x99   : > { %678 = vst [vmem:[%s3434_s21 + $0x270] sm:$0xff] %v677_v46  ;;  %680 = vst [vmem:[%s3434_s21 + $0x278] sm:$0xff] %v679_v47  ;;  %v683_v49 = vld [vmem:[%s3429_s29 + $0x508] sm:$0xff]  ;;  %v685_v50 = vld [vmem:[%s3429_s29 + $0x510] sm:$0xff] }
  0x9a   : > { %682 = vst [vmem:[%s3434_s21 + $0x280] sm:$0xff] %v681_v48  ;;  %v687_v51 = vld [vmem:[%s3429_s29 + $0x518] sm:$0xff]  ;;  %684 = vst [vmem:[%s3434_s21 + $0x288] sm:$0xff] %v683_v49  ;;  %v689_v52 = vld [vmem:[%s3429_s29 + $0x520] sm:$0xff] }
  0x9b   : > { %686 = vst [vmem:[%s3434_s21 + $0x290] sm:$0xff] %v685_v50  ;;  %688 = vst [vmem:[%s3434_s21 + $0x298] sm:$0xff] %v687_v51  ;;  %v691_v53 = vld [vmem:[%s3429_s29 + $0x528] sm:$0xff]  ;;  %v693_v54 = vld [vmem:[%s3429_s29 + $0x530] sm:$0xff] }
  0x9c   : > { %690 = vst [vmem:[%s3434_s21 + $0x2a0] sm:$0xff] %v689_v52  ;;  %692 = vst [vmem:[%s3434_s21 + $0x2a8] sm:$0xff] %v691_v53  ;;  %v695_v55 = vld [vmem:[%s3429_s29 + $0x538] sm:$0xff]  ;;  %v697_v56 = vld [vmem:[%s3429_s29 + $0x540] sm:$0xff] }
  0x9d   : > { %694 = vst [vmem:[%s3434_s21 + $0x2b0] sm:$0xff] %v693_v54  ;;  %v699_v57 = vld [vmem:[%s3429_s29 + $0x548] sm:$0xff]  ;;  %696 = vst [vmem:[%s3434_s21 + $0x2b8] sm:$0xff] %v695_v55  ;;  %v701_v58 = vld [vmem:[%s3429_s29 + $0x5a0] sm:$0xff] }
  0x9e   : > { %698 = vst [vmem:[%s3434_s21 + $0x2c0] sm:$0xff] %v697_v56  ;;  %700 = vst [vmem:[%s3434_s21 + $0x2c8] sm:$0xff] %v699_v57  ;;  %v703_v59 = vld [vmem:[%s3429_s29 + $0x5a8] sm:$0xff]  ;;  %v705_v60 = vld [vmem:[%s3429_s29 + $0x5b0] sm:$0xff] }
  0x9f   : > { %702 = vst [vmem:[%s3434_s21 + $0x2d0] sm:$0xff] %v701_v58  ;;  %704 = vst [vmem:[%s3434_s21 + $0x2d8] sm:$0xff] %v703_v59  ;;  %v707_v61 = vld [vmem:[%s3429_s29 + $0x5b8] sm:$0xff]  ;;  %v709_v62 = vld [vmem:[%s3429_s29 + $0x5c0] sm:$0xff] }
  0xa0   : > { %706 = vst [vmem:[%s3434_s21 + $0x2e0] sm:$0xff] %v705_v60  ;;  %v711_v63 = vld [vmem:[%s3429_s29 + $0x5c8] sm:$0xff]  ;;  %708 = vst [vmem:[%s3434_s21 + $0x2e8] sm:$0xff] %v707_v61  ;;  %v713_v0 = vld [vmem:[%s3429_s29 + $0x5d0] sm:$0xff] }
  0xa1   : > { %710 = vst [vmem:[%s3434_s21 + $0x2f0] sm:$0xff] %v709_v62  ;;  %712 = vst [vmem:[%s3434_s21 + $0x2f8] sm:$0xff] %v711_v63  ;;  %v715_v1 = vld [vmem:[%s3429_s29 + $0x5d8] sm:$0xff]  ;;  %v717_v2 = vld [vmem:[%s3429_s29 + $0x5e0] sm:$0xff] }
  0xa2   : > { %714 = vst [vmem:[%s3434_s21 + $0x300] sm:$0xff] %v713_v0  ;;  %716 = vst [vmem:[%s3434_s21 + $0x308] sm:$0xff] %v715_v1  ;;  %v719_v3 = vld [vmem:[%s3429_s29 + $0x5e8] sm:$0xff]  ;;  %v721_v4 = vld [vmem:[%s3429_s29 + $0x640] sm:$0xff] }
  0xa3   : > { %718 = vst [vmem:[%s3434_s21 + $0x310] sm:$0xff] %v717_v2  ;;  %v723_v5 = vld [vmem:[%s3429_s29 + $0x648] sm:$0xff]  ;;  %720 = vst [vmem:[%s3434_s21 + $0x318] sm:$0xff] %v719_v3  ;;  %v725_v6 = vld [vmem:[%s3429_s29 + $0x650] sm:$0xff] }
  0xa4   : > { %722 = vst [vmem:[%s3434_s21 + $0x320] sm:$0xff] %v721_v4  ;;  %724 = vst [vmem:[%s3434_s21 + $0x328] sm:$0xff] %v723_v5  ;;  %v727_v7 = vld [vmem:[%s3429_s29 + $0x658] sm:$0xff]  ;;  %v729_v8 = vld [vmem:[%s3429_s29 + $0x660] sm:$0xff] }
  0xa5   : > { %726 = vst [vmem:[%s3434_s21 + $0x330] sm:$0xff] %v725_v6  ;;  %728 = vst [vmem:[%s3434_s21 + $0x338] sm:$0xff] %v727_v7  ;;  %v731_v9 = vld [vmem:[%s3429_s29 + $0x668] sm:$0xff]  ;;  %v733_v10 = vld [vmem:[%s3429_s29 + $0x670] sm:$0xff] }
  0xa6   : > { %730 = vst [vmem:[%s3434_s21 + $0x340] sm:$0xff] %v729_v8  ;;  %v735_v11 = vld [vmem:[%s3429_s29 + $0x678] sm:$0xff]  ;;  %732 = vst [vmem:[%s3434_s21 + $0x348] sm:$0xff] %v731_v9  ;;  %v737_v12 = vld [vmem:[%s3429_s29 + $0x680] sm:$0xff] }
  0xa7   : > { %734 = vst [vmem:[%s3434_s21 + $0x350] sm:$0xff] %v733_v10  ;;  %736 = vst [vmem:[%s3434_s21 + $0x358] sm:$0xff] %v735_v11  ;;  %v739_v13 = vld [vmem:[%s3429_s29 + $0x688] sm:$0xff]  ;;  %v741_v14 = vld [vmem:[%s3429_s29 + $0x6e0] sm:$0xff] }
  0xa8   : > { %738 = vst [vmem:[%s3434_s21 + $0x360] sm:$0xff] %v737_v12  ;;  %740 = vst [vmem:[%s3434_s21 + $0x368] sm:$0xff] %v739_v13  ;;  %v743_v15 = vld [vmem:[%s3429_s29 + $0x6e8] sm:$0xff]  ;;  %v745_v16 = vld [vmem:[%s3429_s29 + $0x6f0] sm:$0xff] }
  0xa9   : > { %742 = vst [vmem:[%s3434_s21 + $0x370] sm:$0xff] %v741_v14  ;;  %v747_v17 = vld [vmem:[%s3429_s29 + $0x6f8] sm:$0xff]  ;;  %744 = vst [vmem:[%s3434_s21 + $0x378] sm:$0xff] %v743_v15  ;;  %v749_v18 = vld [vmem:[%s3429_s29 + $0x700] sm:$0xff] }
  0xaa   : > { %746 = vst [vmem:[%s3434_s21 + $0x380] sm:$0xff] %v745_v16  ;;  %748 = vst [vmem:[%s3434_s21 + $0x388] sm:$0xff] %v747_v17  ;;  %v751_v19 = vld [vmem:[%s3429_s29 + $0x708] sm:$0xff]  ;;  %v753_v20 = vld [vmem:[%s3429_s29 + $0x710] sm:$0xff] }
  0xab   : > { %750 = vst [vmem:[%s3434_s21 + $0x390] sm:$0xff] %v749_v18  ;;  %752 = vst [vmem:[%s3434_s21 + $0x398] sm:$0xff] %v751_v19  ;;  %v755_v21 = vld [vmem:[%s3429_s29 + $0x718] sm:$0xff]  ;;  %v757_v22 = vld [vmem:[%s3429_s29 + $0x720] sm:$0xff] }
  0xac   : > { %754 = vst [vmem:[%s3434_s21 + $0x3a0] sm:$0xff] %v753_v20  ;;  %v759_v23 = vld [vmem:[%s3429_s29 + $0x728] sm:$0xff]  ;;  %756 = vst [vmem:[%s3434_s21 + $0x3a8] sm:$0xff] %v755_v21  ;;  %v761_v24 = vld [vmem:[%s3429_s29 + $0x780] sm:$0xff] }
  0xad   : > { %758 = vst [vmem:[%s3434_s21 + $0x3b0] sm:$0xff] %v757_v22  ;;  %760 = vst [vmem:[%s3434_s21 + $0x3b8] sm:$0xff] %v759_v23  ;;  %v763_v25 = vld [vmem:[%s3429_s29 + $0x788] sm:$0xff]  ;;  %v765_v26 = vld [vmem:[%s3429_s29 + $0x790] sm:$0xff] }
  0xae   : > { %762 = vst [vmem:[%s3434_s21 + $0x3c0] sm:$0xff] %v761_v24  ;;  %764 = vst [vmem:[%s3434_s21 + $0x3c8] sm:$0xff] %v763_v25  ;;  %v767_v27 = vld [vmem:[%s3429_s29 + $0x798] sm:$0xff]  ;;  %v769_v28 = vld [vmem:[%s3429_s29 + $0x7a0] sm:$0xff] }
  0xaf   : > { %766 = vst [vmem:[%s3434_s21 + $0x3d0] sm:$0xff] %v765_v26  ;;  %v771_v29 = vld [vmem:[%s3429_s29 + $0x7a8] sm:$0xff]  ;;  %768 = vst [vmem:[%s3434_s21 + $0x3d8] sm:$0xff] %v767_v27  ;;  %v773_v30 = vld [vmem:[%s3429_s29 + $0x7b0] sm:$0xff] }
  0xb0   : > { %770 = vst [vmem:[%s3434_s21 + $0x3e0] sm:$0xff] %v769_v28  ;;  %772 = vst [vmem:[%s3434_s21 + $0x3e8] sm:$0xff] %v771_v29  ;;  %v775_v31 = vld [vmem:[%s3429_s29 + $0x7b8] sm:$0xff]  ;;  %v777_v32 = vld [vmem:[%s3429_s29 + $0x7c0] sm:$0xff] }
  0xb1   : > { %774 = vst [vmem:[%s3434_s21 + $0x3f0] sm:$0xff] %v773_v30  ;;  %776 = vst [vmem:[%s3434_s21 + $0x3f8] sm:$0xff] %v775_v31  ;;  %v779_v33 = vld [vmem:[%s3429_s29 + $0x7c8] sm:$0xff]  ;;  %v781_v34 = vld [vmem:[%s3429_s29 + $0x820] sm:$0xff] }
  0xb2   : > { %778 = vst [vmem:[%s3434_s21 + $0x400] sm:$0xff] %v777_v32  ;;  %v783_v35 = vld [vmem:[%s3429_s29 + $0x828] sm:$0xff]  ;;  %780 = vst [vmem:[%s3434_s21 + $0x408] sm:$0xff] %v779_v33  ;;  %v785_v36 = vld [vmem:[%s3429_s29 + $0x830] sm:$0xff] }
  0xb3   : > { %782 = vst [vmem:[%s3434_s21 + $0x410] sm:$0xff] %v781_v34  ;;  %784 = vst [vmem:[%s3434_s21 + $0x418] sm:$0xff] %v783_v35  ;;  %v787_v37 = vld [vmem:[%s3429_s29 + $0x838] sm:$0xff]  ;;  %v789_v38 = vld [vmem:[%s3429_s29 + $0x840] sm:$0xff] }
  0xb4   : > { %786 = vst [vmem:[%s3434_s21 + $0x420] sm:$0xff] %v785_v36  ;;  %788 = vst [vmem:[%s3434_s21 + $0x428] sm:$0xff] %v787_v37  ;;  %v791_v39 = vld [vmem:[%s3429_s29 + $0x848] sm:$0xff]  ;;  %v793_v40 = vld [vmem:[%s3429_s29 + $0x850] sm:$0xff] }
  0xb5   : > { %790 = vst [vmem:[%s3434_s21 + $0x430] sm:$0xff] %v789_v38  ;;  %v795_v41 = vld [vmem:[%s3429_s29 + $0x858] sm:$0xff]  ;;  %792 = vst [vmem:[%s3434_s21 + $0x438] sm:$0xff] %v791_v39  ;;  %v797_v42 = vld [vmem:[%s3429_s29 + $0x860] sm:$0xff] }
  0xb6   : > { %794 = vst [vmem:[%s3434_s21 + $0x440] sm:$0xff] %v793_v40  ;;  %796 = vst [vmem:[%s3434_s21 + $0x448] sm:$0xff] %v795_v41  ;;  %v799_v43 = vld [vmem:[%s3429_s29 + $0x868] sm:$0xff]  ;;  %v801_v44 = vld [vmem:[%s3429_s29 + $0x8c0] sm:$0xff] }
  0xb7   : > { %798 = vst [vmem:[%s3434_s21 + $0x450] sm:$0xff] %v797_v42  ;;  %800 = vst [vmem:[%s3434_s21 + $0x458] sm:$0xff] %v799_v43  ;;  %v803_v45 = vld [vmem:[%s3429_s29 + $0x8c8] sm:$0xff]  ;;  %v805_v46 = vld [vmem:[%s3429_s29 + $0x8d0] sm:$0xff] }
  0xb8   : > { %802 = vst [vmem:[%s3434_s21 + $0x460] sm:$0xff] %v801_v44  ;;  %v807_v47 = vld [vmem:[%s3429_s29 + $0x8d8] sm:$0xff]  ;;  %804 = vst [vmem:[%s3434_s21 + $0x468] sm:$0xff] %v803_v45  ;;  %v809_v48 = vld [vmem:[%s3429_s29 + $0x8e0] sm:$0xff] }
  0xb9   : > { %806 = vst [vmem:[%s3434_s21 + $0x470] sm:$0xff] %v805_v46  ;;  %808 = vst [vmem:[%s3434_s21 + $0x478] sm:$0xff] %v807_v47  ;;  %v811_v49 = vld [vmem:[%s3429_s29 + $0x8e8] sm:$0xff]  ;;  %v813_v50 = vld [vmem:[%s3429_s29 + $0x8f0] sm:$0xff] }
  0xba   : > { %810 = vst [vmem:[%s3434_s21 + $0x480] sm:$0xff] %v809_v48  ;;  %812 = vst [vmem:[%s3434_s21 + $0x488] sm:$0xff] %v811_v49  ;;  %v815_v51 = vld [vmem:[%s3429_s29 + $0x8f8] sm:$0xff]  ;;  %v817_v52 = vld [vmem:[%s3429_s29 + $0x900] sm:$0xff] }
  0xbb   : > { %814 = vst [vmem:[%s3434_s21 + $0x490] sm:$0xff] %v813_v50  ;;  %v819_v53 = vld [vmem:[%s3429_s29 + $0x908] sm:$0xff]  ;;  %816 = vst [vmem:[%s3434_s21 + $0x498] sm:$0xff] %v815_v51  ;;  %v821_v54 = vld [vmem:[%s3429_s29 + $0x960] sm:$0xff] }
  0xbc   : > { %818 = vst [vmem:[%s3434_s21 + $0x4a0] sm:$0xff] %v817_v52  ;;  %820 = vst [vmem:[%s3434_s21 + $0x4a8] sm:$0xff] %v819_v53  ;;  %v823_v55 = vld [vmem:[%s3429_s29 + $0x968] sm:$0xff]  ;;  %v825_v56 = vld [vmem:[%s3429_s29 + $0x970] sm:$0xff] }
  0xbd   : > { %822 = vst [vmem:[%s3434_s21 + $0x4b0] sm:$0xff] %v821_v54  ;;  %824 = vst [vmem:[%s3434_s21 + $0x4b8] sm:$0xff] %v823_v55  ;;  %v827_v57 = vld [vmem:[%s3429_s29 + $0x978] sm:$0xff]  ;;  %v829_v58 = vld [vmem:[%s3429_s29 + $0x980] sm:$0xff] }
  0xbe   : > { %826 = vst [vmem:[%s3434_s21 + $0x4c0] sm:$0xff] %v825_v56  ;;  %v831_v59 = vld [vmem:[%s3429_s29 + $0x988] sm:$0xff]  ;;  %828 = vst [vmem:[%s3434_s21 + $0x4c8] sm:$0xff] %v827_v57  ;;  %v833_v60 = vld [vmem:[%s3429_s29 + $0x990] sm:$0xff] }
  0xbf   : > { %830 = vst [vmem:[%s3434_s21 + $0x4d0] sm:$0xff] %v829_v58  ;;  %832 = vst [vmem:[%s3434_s21 + $0x4d8] sm:$0xff] %v831_v59  ;;  %v835_v61 = vld [vmem:[%s3429_s29 + $0x998] sm:$0xff]  ;;  %v837_v62 = vld [vmem:[%s3429_s29 + $0x9a0] sm:$0xff] }
  0xc0   : > { %834 = vst [vmem:[%s3434_s21 + $0x4e0] sm:$0xff] %v833_v60  ;;  %836 = vst [vmem:[%s3434_s21 + $0x4e8] sm:$0xff] %v835_v61  ;;  %v839_v63 = vld [vmem:[%s3429_s29 + $0x9a8] sm:$0xff] }
  0xc1   : > { %838 = vst [vmem:[%s3434_s21 + $0x4f0] sm:$0xff] %v837_v62  ;;  %840 = vst [vmem:[%s3434_s21 + $0x4f8] sm:$0xff] %v839_v63 }
  0xc2 PF: > { %p2885_p7 = scmp.ge.s32.totalorder %s3008_s18, 1  ;;  %p853_p8 = scmp.lt.s32.totalorder %s3008_s18, 5 }
  0xc4   : > { %p854_p9 = pnand %p2885_p7, %p853_p8 }
  0xc5   : > { %s860_s30 = sand.u32 (!%p854_p9), 1, %s2984_s12   ;;  %s902_s4 = smul.u32 (!%p854_p9), 10, %s2992_s14 }
  0xc6   : > { %857 = sbr.rel (%p854_p9) target bundleno = 681 (0x2a9), region = 70  ;;  %s2886_s6 = sshll.u32 (!%p854_p9), %s2996_s15, 4 }
  0xc7   : > { %s2896_s5 = smul.u32 (!%p854_p9), 1280, %s860_s30  ;;  %p903_p10 = scmp.lt.s32.totalorder (!%p854_p9), %s902_s4, 19 }
  0xc8   : > { %p908_p11 = scmp.lt.s32.totalorder (!%p854_p9), %s2886_s6, 31  ;;  %p2888_p12 = scmp.ne.s32.totalorder (!%p854_p9), %s2992_s14, 0 }
  0xc9   : > { %s3768_s24 = scalar_lea.vmem (!%p854_p9), [#allocation3], %s2896_s5  ;;  %s3770_s12 = scalar_lea.vmem (!%p854_p9), [#allocation4], %s2896_s5 }
  0xcb   : > { %s4535_s4 = smov (!%p903_p10, %s902_s4), 19  ;;  %s4537_s6 = smov (!%p908_p11, %s2886_s6), 31 }
  0xcc   : > { %s3761_s9 = scalar_lea.vmem %s4519_s2, %s4535_s4  ;;  %s2887_s10 = sshll.u32 %s4537_s6, 3 }
  0xcd   : > { %s3766_s23 = scalar_lea.vmem %s4520_s3, %s2887_s10  ;;  %916 = sbr.rel (%p2888_p12) target bundleno = 291 (0x123), region = 82 }
  0xd2   : > { %v3010_v0 = vmov 0.0  }
  0xd3   : > { %917 = vst [vmem:[#allocation2 + $0x2b0] sm:$0xff] %v3010_v0  ;;  %918 = vst [vmem:[#allocation2 + $0x3b0] sm:$0xff] %v3010_v0 }
  0xd4   : > { %919 = vst [vmem:[#allocation2 + $0x4d8] sm:$0xff] %v3010_v0  ;;  %920 = vst [vmem:[#allocation2 + $0x18] sm:$0xff] %v3010_v0 }
  0xd5   : > { %921 = vst [vmem:[#allocation2 + $0x450] sm:$0xff] %v3010_v0  ;;  %922 = vst [vmem:[#allocation2 + $0x328] sm:$0xff] %v3010_v0 }
  0xd6   : > { %923 = vst [vmem:[#allocation2 + $0x440] sm:$0xff] %v3010_v0  ;;  %924 = vst [vmem:[#allocation2 + $0x378] sm:$0xff] %v3010_v0 }
  0xd7   : > { %925 = vst [vmem:[#allocation2 + $0x108] sm:$0xff] %v3010_v0  ;;  %926 = vst [vmem:[#allocation2 + $0x488] sm:$0xff] %v3010_v0 }
  0xd8   : > { %927 = vst [vmem:[#allocation2 + $0x310] sm:$0xff] %v3010_v0  ;;  %928 = vst [vmem:[#allocation2 + $0x4f0] sm:$0xff] %v3010_v0 }
  0xd9   : > { %929 = vst [vmem:[#allocation2 + $0x308] sm:$0xff] %v3010_v0  ;;  %930 = vst [vmem:[#allocation2 + $0x2a8] sm:$0xff] %v3010_v0 }
  0xda   : > { %931 = vst [vmem:[#allocation2 + $0x398] sm:$0xff] %v3010_v0  ;;  %932 = vst [vmem:[#allocation2 + $0x60] sm:$0xff] %v3010_v0 }
  0xdb   : > { %933 = vst [vmem:[#allocation2 + $0xd8] sm:$0xff] %v3010_v0  ;;  %934 = vst [vmem:[#allocation2 + $0x388] sm:$0xff] %v3010_v0 }
  0xdc   : > { %935 = vst [vmem:[#allocation2 + $0x160] sm:$0xff] %v3010_v0  ;;  %936 = vst [vmem:[#allocation2 + $0x220] sm:$0xff] %v3010_v0 }
  0xdd   : > { %937 = vst [vmem:[#allocation2 + $0xa0] sm:$0xff] %v3010_v0  ;;  %938 = vst [vmem:[#allocation2 + $0x360] sm:$0xff] %v3010_v0 }
  0xde   : > { %939 = vst [vmem:[#allocation2 + $0x4f8] sm:$0xff] %v3010_v0  ;;  %940 = vst [vmem:[#allocation2 + $0x380] sm:$0xff] %v3010_v0 }
  0xdf   : > { %941 = vst [vmem:[#allocation2 + $0x458] sm:$0xff] %v3010_v0  ;;  %942 = vst [vmem:[#allocation2 + $0x4a0] sm:$0xff] %v3010_v0 }
  0xe0   : > { %943 = vst [vmem:[#allocation2 + $0x390] sm:$0xff] %v3010_v0  ;;  %944 = vst [vmem:[#allocation2 + $0xb8] sm:$0xff] %v3010_v0 }
  0xe1   : > { %945 = vst [vmem:[#allocation2 + $0x270] sm:$0xff] %v3010_v0  ;;  %946 = vst [vmem:[#allocation2 + $0x480] sm:$0xff] %v3010_v0 }
  0xe2   : > { %947 = vst [vmem:[#allocation2 + $0x1a8] sm:$0xff] %v3010_v0  ;;  %948 = vst [vmem:[#allocation2 + $0x2a0] sm:$0xff] %v3010_v0 }
  0xe3   : > { %949 = vst [vmem:[#allocation2 + $0x38] sm:$0xff] %v3010_v0  ;;  %950 = vst [vmem:[#allocation2 + $0x3f8] sm:$0xff] %v3010_v0 }
  0xe4   : > { %951 = vst [vmem:[#allocation2 + $0xb0] sm:$0xff] %v3010_v0  ;;  %952 = vst [vmem:[#allocation2 + $0x320] sm:$0xff] %v3010_v0 }
  0xe5   : > { %953 = vst [vmem:[#allocation2 + $0x188] sm:$0xff] %v3010_v0  ;;  %954 = vst [vmem:[#allocation2 + $0x210] sm:$0xff] %v3010_v0 }
  0xe6   : > { %955 = vst [vmem:[#allocation2 + $0x78] sm:$0xff] %v3010_v0  ;;  %956 = vst [vmem:[#allocation2 + $0x20] sm:$0xff] %v3010_v0 }
  0xe7   : > { %957 = vst [vmem:[#allocation2 + $0x3c8] sm:$0xff] %v3010_v0  ;;  %958 = vst [vmem:[#allocation2 + $0x280] sm:$0xff] %v3010_v0 }
  0xe8   : > { %959 = vst [vmem:[#allocation2 + $0x3b8] sm:$0xff] %v3010_v0  ;;  %960 = vst [vmem:[#allocation2 + $0x8] sm:$0xff] %v3010_v0 }
  0xe9   : > { %961 = vst [vmem:[#allocation2 + $0x48] sm:$0xff] %v3010_v0  ;;  %962 = vst [vmem:[#allocation2 + $0x300] sm:$0xff] %v3010_v0 }
  0xea   : > { %963 = vst [vmem:[#allocation2 + $0x4a8] sm:$0xff] %v3010_v0  ;;  %964 = vst [vmem:[#allocation2 + $0x218] sm:$0xff] %v3010_v0 }
  0xeb   : > { %965 = vst [vmem:[#allocation2 + $0x168] sm:$0xff] %v3010_v0  ;;  %966 = vst [vmem:[#allocation2 + $0x1f0] sm:$0xff] %v3010_v0 }
  0xec   : > { %967 = vst [vmem:[#allocation2 + $0x10] sm:$0xff] %v3010_v0  ;;  %968 = vst [vmem:[#allocation2 + $0x1f8] sm:$0xff] %v3010_v0 }
  0xed   : > { %969 = vst [vmem:[#allocation2 + $0x2e8] sm:$0xff] %v3010_v0  ;;  %970 = vst [vmem:[#allocation2 + $0x258] sm:$0xff] %v3010_v0 }
  0xee   : > { %971 = vst [vmem:[#allocation2 + $0x260] sm:$0xff] %v3010_v0  ;;  %972 = vst [vmem:[#allocation2 + $0x2c0] sm:$0xff] %v3010_v0 }
  0xef   : > { %973 = vst [vmem:[#allocation2 + $0x140] sm:$0xff] %v3010_v0  ;;  %974 = vst [vmem:[#allocation2 + $0xf8] sm:$0xff] %v3010_v0 }
  0xf0   : > { %975 = vst [vmem:[#allocation2 + $0x70] sm:$0xff] %v3010_v0  ;;  %976 = vst [vmem:[#allocation2 + $0x4c0] sm:$0xff] %v3010_v0 }
  0xf1   : > { %977 = vst [vmem:[#allocation2 + $0x40] sm:$0xff] %v3010_v0  ;;  %978 = vst [vmem:[#allocation2 + $0x350] sm:$0xff] %v3010_v0 }
  0xf2   : > { %979 = vst [vmem:[#allocation2 + $0x250] sm:$0xff] %v3010_v0  ;;  %980 = vst [vmem:[#allocation2 + $0x1e0] sm:$0xff] %v3010_v0 }
  0xf3   : > { %981 = vst [vmem:[#allocation2 + $0x318] sm:$0xff] %v3010_v0  ;;  %982 = vst [vmem:[#allocation2 + $0x3a0] sm:$0xff] %v3010_v0 }
  0xf4   : > { %983 = vst [vmem:[#allocation2 + $0x80] sm:$0xff] %v3010_v0  ;;  %984 = vst [vmem:[#allocation2 + $0x400] sm:$0xff] %v3010_v0 }
  0xf5   : > { %985 = vst [vmem:[#allocation2 + $0x228] sm:$0xff] %v3010_v0  ;;  %986 = vst [vmem:[#allocation2 + $0x348] sm:$0xff] %v3010_v0 }
  0xf6   : > { %987 = vst [vmem:[#allocation2 + $0x288] sm:$0xff] %v3010_v0  ;;  %988 = vst [vmem:[#allocation2 + $0x460] sm:$0xff] %v3010_v0 }
  0xf7   : > { %989 = vst [vmem:[#allocation2 + $0x4b0] sm:$0xff] %v3010_v0  ;;  %990 = vst [vmem:[#allocation2 + $0x1d8] sm:$0xff] %v3010_v0 }
  0xf8   : > { %991 = vst [vmem:[#allocation2 + $0x200] sm:$0xff] %v3010_v0  ;;  %992 = vst [vmem:[#allocation2 + $0x50] sm:$0xff] %v3010_v0 }
  0xf9   : > { %993 = vst [vmem:[#allocation2 + $0x1b0] sm:$0xff] %v3010_v0  ;;  %994 = vst [vmem:[#allocation2 + $0x150] sm:$0xff] %v3010_v0 }
  0xfa   : > { %995 = vst [vmem:[#allocation2 + $0x4e8] sm:$0xff] %v3010_v0  ;;  %996 = vst [vmem:[#allocation2 + $0x190] sm:$0xff] %v3010_v0 }
  0xfb   : > { %997 = vst [vmem:[#allocation2 + $0x418] sm:$0xff] %v3010_v0  ;;  %998 = vst [vmem:[#allocation2 + $0x338] sm:$0xff] %v3010_v0 }
  0xfc   : > { %999 = vst [vmem:[#allocation2 + $0x358] sm:$0xff] %v3010_v0  ;;  %1000 = vst [vmem:[#allocation2 + $0x158] sm:$0xff] %v3010_v0 }
  0xfd   : > { %1001 = vst [vmem:[#allocation2 + $0x88] sm:$0xff] %v3010_v0  ;;  %1002 = vst [vmem:[#allocation2 + $0x448] sm:$0xff] %v3010_v0 }
  0xfe   : > { %1003 = vst [vmem:[#allocation2] sm:$0xff] %v3010_v0  ;;  %1004 = vst [vmem:[#allocation2 + $0x2d0] sm:$0xff] %v3010_v0 }
  0xff   : > { %1005 = vst [vmem:[#allocation2 + $0x278] sm:$0xff] %v3010_v0  ;;  %1006 = vst [vmem:[#allocation2 + $0x478] sm:$0xff] %v3010_v0 }
 0x100   : > { %1007 = vst [vmem:[#allocation2 + $0x90] sm:$0xff] %v3010_v0  ;;  %1008 = vst [vmem:[#allocation2 + $0x138] sm:$0xff] %v3010_v0 }
 0x101   : > { %1009 = vst [vmem:[#allocation2 + $0x438] sm:$0xff] %v3010_v0  ;;  %1010 = vst [vmem:[#allocation2 + $0x2c8] sm:$0xff] %v3010_v0 }
 0x102   : > { %1011 = vst [vmem:[#allocation2 + $0x3e0] sm:$0xff] %v3010_v0  ;;  %1012 = vst [vmem:[#allocation2 + $0x130] sm:$0xff] %v3010_v0 }
 0x103   : > { %1013 = vst [vmem:[#allocation2 + $0x298] sm:$0xff] %v3010_v0  ;;  %1014 = vst [vmem:[#allocation2 + $0x2f8] sm:$0xff] %v3010_v0 }
 0x104   : > { %1015 = vst [vmem:[#allocation2 + $0x68] sm:$0xff] %v3010_v0  ;;  %1016 = vst [vmem:[#allocation2 + $0x3c0] sm:$0xff] %v3010_v0 }
 0x105   : > { %1017 = vst [vmem:[#allocation2 + $0x368] sm:$0xff] %v3010_v0  ;;  %1018 = vst [vmem:[#allocation2 + $0x2e0] sm:$0xff] %v3010_v0 }
 0x106   : > { %1019 = vst [vmem:[#allocation2 + $0x3a8] sm:$0xff] %v3010_v0  ;;  %1020 = vst [vmem:[#allocation2 + $0x1c8] sm:$0xff] %v3010_v0 }
 0x107   : > { %1021 = vst [vmem:[#allocation2 + $0x3d8] sm:$0xff] %v3010_v0  ;;  %1022 = vst [vmem:[#allocation2 + $0x408] sm:$0xff] %v3010_v0 }
 0x108   : > { %1023 = vst [vmem:[#allocation2 + $0xe8] sm:$0xff] %v3010_v0  ;;  %1024 = vst [vmem:[#allocation2 + $0x98] sm:$0xff] %v3010_v0 }
 0x109   : > { %1025 = vst [vmem:[#allocation2 + $0x410] sm:$0xff] %v3010_v0  ;;  %1026 = vst [vmem:[#allocation2 + $0xc8] sm:$0xff] %v3010_v0 }
 0x10a   : > { %1027 = vst [vmem:[#allocation2 + $0x420] sm:$0xff] %v3010_v0  ;;  %1028 = vst [vmem:[#allocation2 + $0x28] sm:$0xff] %v3010_v0 }
 0x10b   : > { %1029 = vst [vmem:[#allocation2 + $0x290] sm:$0xff] %v3010_v0  ;;  %1030 = vst [vmem:[#allocation2 + $0x330] sm:$0xff] %v3010_v0 }
 0x10c   : > { %1031 = vst [vmem:[#allocation2 + $0x118] sm:$0xff] %v3010_v0  ;;  %1032 = vst [vmem:[#allocation2 + $0x490] sm:$0xff] %v3010_v0 }
 0x10d   : > { %1033 = vst [vmem:[#allocation2 + $0x4c8] sm:$0xff] %v3010_v0  ;;  %1034 = vst [vmem:[#allocation2 + $0x120] sm:$0xff] %v3010_v0 }
 0x10e   : > { %1035 = vst [vmem:[#allocation2 + $0x1d0] sm:$0xff] %v3010_v0  ;;  %1036 = vst [vmem:[#allocation2 + $0x208] sm:$0xff] %v3010_v0 }
 0x10f   : > { %1037 = vst [vmem:[#allocation2 + $0xa8] sm:$0xff] %v3010_v0  ;;  %1038 = vst [vmem:[#allocation2 + $0x428] sm:$0xff] %v3010_v0 }
 0x110   : > { %1039 = vst [vmem:[#allocation2 + $0x268] sm:$0xff] %v3010_v0  ;;  %1040 = vst [vmem:[#allocation2 + $0x180] sm:$0xff] %v3010_v0 }
 0x111   : > { %1041 = vst [vmem:[#allocation2 + $0x4b8] sm:$0xff] %v3010_v0  ;;  %1042 = vst [vmem:[#allocation2 + $0x178] sm:$0xff] %v3010_v0 }
 0x112   : > { %1043 = vst [vmem:[#allocation2 + $0x1e8] sm:$0xff] %v3010_v0  ;;  %1044 = vst [vmem:[#allocation2 + $0x2f0] sm:$0xff] %v3010_v0 }
 0x113   : > { %1045 = vst [vmem:[#allocation2 + $0x3f0] sm:$0xff] %v3010_v0  ;;  %1046 = vst [vmem:[#allocation2 + $0x170] sm:$0xff] %v3010_v0 }
 0x114   : > { %1047 = vst [vmem:[#allocation2 + $0x198] sm:$0xff] %v3010_v0  ;;  %1048 = vst [vmem:[#allocation2 + $0x1b8] sm:$0xff] %v3010_v0 }
 0x115   : > { %1049 = vst [vmem:[#allocation2 + $0xf0] sm:$0xff] %v3010_v0  ;;  %1050 = vst [vmem:[#allocation2 + $0x238] sm:$0xff] %v3010_v0 }
 0x116   : > { %1051 = vst [vmem:[#allocation2 + $0x248] sm:$0xff] %v3010_v0  ;;  %1052 = vst [vmem:[#allocation2 + $0x4d0] sm:$0xff] %v3010_v0 }
 0x117   : > { %1053 = vst [vmem:[#allocation2 + $0x498] sm:$0xff] %v3010_v0  ;;  %1054 = vst [vmem:[#allocation2 + $0x240] sm:$0xff] %v3010_v0 }
 0x118   : > { %1055 = vst [vmem:[#allocation2 + $0x100] sm:$0xff] %v3010_v0  ;;  %1056 = vst [vmem:[#allocation2 + $0x2d8] sm:$0xff] %v3010_v0 }
 0x119   : > { %1057 = vst [vmem:[#allocation2 + $0x4e0] sm:$0xff] %v3010_v0  ;;  %1058 = vst [vmem:[#allocation2 + $0x30] sm:$0xff] %v3010_v0 }
 0x11a   : > { %1059 = vst [vmem:[#allocation2 + $0x2b8] sm:$0xff] %v3010_v0  ;;  %1060 = vst [vmem:[#allocation2 + $0x1c0] sm:$0xff] %v3010_v0 }
 0x11b   : > { %1061 = vst [vmem:[#allocation2 + $0x468] sm:$0xff] %v3010_v0  ;;  %1062 = vst [vmem:[#allocation2 + $0xe0] sm:$0xff] %v3010_v0 }
 0x11c   : > { %1063 = vst [vmem:[#allocation2 + $0x58] sm:$0xff] %v3010_v0  ;;  %1064 = vst [vmem:[#allocation2 + $0x3d0] sm:$0xff] %v3010_v0 }
 0x11d   : > { %1065 = vst [vmem:[#allocation2 + $0x340] sm:$0xff] %v3010_v0  ;;  %1066 = vst [vmem:[#allocation2 + $0x3e8] sm:$0xff] %v3010_v0 }
 0x11e   : > { %1067 = vst [vmem:[#allocation2 + $0x128] sm:$0xff] %v3010_v0  ;;  %1068 = vst [vmem:[#allocation2 + $0x470] sm:$0xff] %v3010_v0 }
 0x11f   : > { %1069 = vst [vmem:[#allocation2 + $0x148] sm:$0xff] %v3010_v0  ;;  %1070 = vst [vmem:[#allocation2 + $0xd0] sm:$0xff] %v3010_v0 }
 0x120   : > { %1071 = vst [vmem:[#allocation2 + $0x230] sm:$0xff] %v3010_v0  ;;  %1072 = vst [vmem:[#allocation2 + $0x430] sm:$0xff] %v3010_v0 }
 0x121   : > { %1073 = vst [vmem:[#allocation2 + $0x370] sm:$0xff] %v3010_v0  ;;  %1074 = vst [vmem:[#allocation2 + $0xc0] sm:$0xff] %v3010_v0 }
 0x122   : > { %1075 = vst [vmem:[#allocation2 + $0x110] sm:$0xff] %v3010_v0  ;;  %1076 = vst [vmem:[#allocation2 + $0x1a0] sm:$0xff] %v3010_v0 }
 0x123 PF: > { %v1077_v1 = vld [vmem:[%s3768_s24] sm:$0xff]  ;;  %v1881_v3 = vlaneseq  ;;  %v1078_v5 = vld [vmem:[%s3768_s24 + $0x8] sm:$0xff]  ;;  %v1079_v9 = vld [vmem:[%s3768_s24 + $0x10] sm:$0xff]  ;;  %p2889_p13 = scmp.ne.s32.totalorder %s2992_s14, 1 }
 0x124   : > { %v1237_v2 = vld [vmem:[%s3770_s12] sm:$0xff]  ;;  %v1238_v6 = vld [vmem:[%s3770_s12 + $0x8] sm:$0xff]  ;;  %v1239_v10 = vld [vmem:[%s3770_s12 + $0x10] sm:$0xff] }
 0x125   : > { %v1559_v4 = vsub.f32 %v1077_v1, %v1237_v2  ;;  %v3937_v7 = vshrl.u32 %v1881_v3, 7  ;;  %v1560_v8 = vsub.f32 %v1078_v5, %v1238_v6  ;;  %v3942_v11 = vld [vmem:[%s3761_s9] sm:$0xff]  ;;  %v1561_v13 = vsub.f32 %v1079_v9, %v1239_v10  ;;  %v1080_v14 = vld [vmem:[%s3768_s24 + $0x18] sm:$0xff]  ;;  %v1399_v20 = vld [vmem:[#allocation2 + $0x2b0] sm:$0xff] }
 0x126   : > { %v1240_v15 = vld [vmem:[%s3770_s12 + $0x18] sm:$0xff]  ;;  %v1081_v24 = vld [vmem:[%s3768_s24 + $0x20] sm:$0xff]  ;;  %v1400_v27 = vld [vmem:[#allocation2 + $0x3b0] sm:$0xff] }
 0x127   : > { %v1719_v12 = vand.u32 2147483647, %v1559_v4  ;;  %v1883_v16 = vsub.s32 0, %v3937_v7  ;;  %v1720_v17 = vand.u32 2147483647, %v1560_v8  ;;  %v1887_v18 = vsub.s32 1, %v3937_v7 }
 0x128   : > { %v1891_v19 = vsub.s32 2, %v3937_v7  ;;  %v1721_v21 = vand.u32 2147483647, %v1561_v13  ;;  %v1562_v22 = vsub.f32 %v1080_v14, %v1240_v15  ;;  %v1895_v23 = vsub.s32 3, %v3937_v7  ;;  %v1241_v25 = vld [vmem:[%s3770_s12 + $0x20] sm:$0xff]  ;;  %v1082_v31 = vld [vmem:[%s3768_s24 + $0x28] sm:$0xff] }
 0x129   : > { %v3955_v26 = vrot.slane %v3942_v11, %v1883_v16  ;;  %v3960_v28 = vrot.slane %v3942_v11, %v1887_v18  ;;  %v1563_v30 = vsub.f32 %v1081_v24, %v1241_v25  ;;  %v1242_v32 = vld [vmem:[%s3770_s12 + $0x28] sm:$0xff]  ;;  %v1401_v33 = vld [vmem:[#allocation2 + $0x4d8] sm:$0xff]  ;;  %v1899_v36 = vsub.s32 4, %v3937_v7  ;;  %v1083_v38 = vld [vmem:[%s3768_s24 + $0x30] sm:$0xff] }
 0x12a   : > { %v3963_v29 = vrot.slane %v3942_v11, %v1891_v19  ;;  %v1722_v34 = vand.u32 2147483647, %v1562_v22  ;;  %v3968_v35 = vrot.slane %v3942_v11, %v1895_v23  ;;  %v1564_v37 = vsub.f32 %v1082_v31, %v1242_v32  ;;  %v1243_v39 = vld [vmem:[%s3770_s12 + $0x30] sm:$0xff]  ;;  %v1402_v43 = vld [vmem:[#allocation2 + $0x18] sm:$0xff]  ;;  %v1085_v51 = vld [vmem:[%s3768_s24 + $0x40] sm:$0xff] }
 0x12b   : > { %v1931_v40 = vmul.f32 %v3955_v26, %v1719_v12  ;;  %v1932_v41 = vmul.f32 %v3960_v28, %v1720_v17  ;;  %v1723_v44 = vand.u32 2147483647, %v1563_v30  ;;  %v1084_v45 = vld [vmem:[%s3768_s24 + $0x38] sm:$0xff]  ;;  %v3979_v47 = vrot.slane %v3942_v11, %v1899_v36  ;;  %v1245_v52 = vld [vmem:[%s3770_s12 + $0x40] sm:$0xff]  ;;  %v1403_v56 = vld [vmem:[#allocation2 + $0x450] sm:$0xff] }
 0x12c   : > { %v1933_v42 = vmul.f32 %v3963_v29, %v1721_v21  ;;  %v1934_v46 = vmul.f32 %v3968_v35, %v1722_v34  ;;  %v1724_v48 = vand.u32 2147483647, %v1564_v37  ;;  %v1903_v49 = vsub.s32 5, %v3937_v7  ;;  %v1244_v50 = vld [vmem:[%s3770_s12 + $0x38] sm:$0xff]  ;;  %v1398_v58 = vld [vmem:[%s3761_s9 + $0x8] sm:$0x3] }
 0x12d   : > { %v2091_v53 = vadd.f32 %v1931_v40, %v1399_v20  ;;  %v2092_v54 = vadd.f32 %v1932_v41, %v1400_v27  ;;  %v1565_v57 = vsub.f32 %v1083_v38, %v1243_v39  ;;  %v1935_v60 = vmul.f32 %v3979_v47, %v1723_v44  ;;  %v1404_v61 = vld [vmem:[#allocation2 + $0x328] sm:$0xff]  ;;  %v1405_v2 = vld [vmem:[#allocation2 + $0x440] sm:$0xff]  ;;  %v1087_v8 = vld [vmem:[%s3768_s24 + $0x50] sm:$0xff] }
 0x12e   : > { %v2093_v55 = vadd.f32 %v1933_v42, %v1401_v33  ;;  %v2094_v59 = vadd.f32 %v1934_v46, %v1402_v43  ;;  %v3988_v62 = vrot.slane %v3942_v11, %v1903_v49  ;;  %v1907_v63 = vsub.s32 6, %v3937_v7  ;;  %v1086_v0 = vld [vmem:[%s3768_s24 + $0x48] sm:$0xff]  ;;  %v1247_v9 = vld [vmem:[%s3770_s12 + $0x50] sm:$0xff]  ;;  %v1406_v14 = vld [vmem:[#allocation2 + $0x378] sm:$0xff] }
 0x12f   : > { %v1246_v1 = vld [vmem:[%s3770_s12 + $0x48] sm:$0xff]  ;;  %2251 = vst [vmem:[#allocation2 + $0x2b0] sm:$0xff] %v2091_v53  ;;  %2252 = vst [vmem:[#allocation2 + $0x3b0] sm:$0xff] %v2092_v54  ;;  %v1725_v3 = vand.u32 2147483647, %v1565_v57  ;;  %v1566_v4 = vsub.f32 %v1084_v45, %v1244_v50  ;;  %v1911_v5 = vsub.s32 7, %v3937_v7  ;;  %v1567_v6 = vsub.f32 %v1085_v51, %v1245_v52 }
 0x130   : > { %2253 = vst [vmem:[#allocation2 + $0x4d8] sm:$0xff] %v2093_v55  ;;  %2254 = vst [vmem:[#allocation2 + $0x18] sm:$0xff] %v2094_v59  ;;  %v2095_v10 = vadd.f32 %v1935_v60, %v1403_v56  ;;  %v1936_v12 = vmul.f32 %v3988_v62, %v1724_v48  ;;  %v3998_v13 = vrot.slane %v3942_v11, %v1907_v63  ;;  %v1088_v17 = vld [vmem:[%s3768_s24 + $0x58] sm:$0xff]  ;;  %v1089_v20 = vld [vmem:[%s3768_s24 + $0x60] sm:$0xff] }
 0x131   : > { %v4002_v15 = vrot.slane %v1398_v58, %v1883_v16  ;;  %v1248_v19 = vld [vmem:[%s3770_s12 + $0x58] sm:$0xff]  ;;  %v1726_v21 = vand.u32 2147483647, %v1566_v4  ;;  %v4008_v22 = vrot.slane %v3942_v11, %v1911_v5  ;;  %v1727_v23 = vand.u32 2147483647, %v1567_v6  ;;  %v1249_v25 = vld [vmem:[%s3770_s12 + $0x60] sm:$0xff] }
 0x132   : > { %v1568_v24 = vsub.f32 %v1086_v0, %v1246_v1  ;;  %v1090_v27 = vld [vmem:[%s3768_s24 + $0x68] sm:$0xff]  ;;  %2255 = vst [vmem:[#allocation2 + $0x450] sm:$0xff] %v2095_v10  ;;  %v2096_v30 = vadd.f32 %v1936_v12, %v1404_v61  ;;  %v1937_v31 = vmul.f32 %v3998_v13, %v1725_v3  ;;  %v4015_v33 = vrot.slane %v1398_v58, %v1887_v18  ;;  %v1409_v39 = vld [vmem:[#allocation2 + $0x310] sm:$0xff]  ;;  %v1092_v46 = vld [vmem:[%s3768_s24 + $0x78] sm:$0xff] }
 0x133   : > { %v1407_v16 = vld [vmem:[#allocation2 + $0x108] sm:$0xff]  ;;  %v1569_v34 = vsub.f32 %v1087_v8, %v1247_v9  ;;  %v1938_v36 = vmul.f32 %v4008_v22, %v1726_v21  ;;  %v1939_v37 = vmul.f32 %v4002_v15, %v1727_v23  ;;  %v1570_v40 = vsub.f32 %v1088_v17, %v1248_v19  ;;  %v1091_v41 = vld [vmem:[%s3768_s24 + $0x70] sm:$0xff]  ;;  %v1252_v48 = vld [vmem:[%s3770_s12 + $0x78] sm:$0xff] }
 0x134   : > { %v1408_v32 = vld [vmem:[#allocation2 + $0x488] sm:$0xff]  ;;  %v1728_v38 = vand.u32 2147483647, %v1568_v24  ;;  %v1251_v42 = vld [vmem:[%s3770_s12 + $0x70] sm:$0xff]  ;;  %2256 = vst [vmem:[#allocation2 + $0x328] sm:$0xff] %v2096_v30  ;;  %v2097_v43 = vadd.f32 %v1937_v31, %v1405_v2  ;;  %v1571_v44 = vsub.f32 %v1089_v20, %v1249_v25  ;;  %v1093_v49 = vld [vmem:[%s3768_s24 + $0x80] sm:$0xff]  ;;  %v1574_v3 = vsub.f32 %v1092_v46, %v1252_v48 }
 0x135   : > { %v1250_v11 = vld [vmem:[%s3770_s12 + $0x68] sm:$0xff]  ;;  %v1729_v7 = vand.u32 2147483647, %v1569_v34  ;;  %v1410_v18 = vld [vmem:[#allocation2 + $0x4f0] sm:$0xff]  ;;  %v2098_v50 = vadd.f32 %v1938_v36, %v1406_v14  ;;  %v2099_v51 = vadd.f32 %v1939_v37, %v1407_v16  ;;  %v1730_v53 = vand.u32 2147483647, %v1570_v40 }
 0x136   : > { %v1572_v45 = vsub.f32 %v1090_v27, %v1250_v11  ;;  %v1940_v52 = vmul.f32 %v4015_v33, %v1728_v38  ;;  %v1411_v54 = vld [vmem:[#allocation2 + $0x308] sm:$0xff]  ;;  %v1253_v56 = vld [vmem:[%s3770_s12 + $0x80] sm:$0xff]  ;;  %2257 = vst [vmem:[#allocation2 + $0x440] sm:$0xff] %v2097_v43  ;;  %v1731_v58 = vand.u32 2147483647, %v1571_v44  ;;  %v1573_v60 = vsub.f32 %v1091_v41, %v1251_v42  ;;  %v1413_v2 = vld [vmem:[#allocation2 + $0x398] sm:$0xff] }
 0x137   : > { %v1412_v55 = vld [vmem:[#allocation2 + $0x2a8] sm:$0xff]  ;;  %v1941_v57 = vmul.f32 %v3955_v26, %v1729_v7  ;;  %2258 = vst [vmem:[#allocation2 + $0x378] sm:$0xff] %v2098_v50  ;;  %2259 = vst [vmem:[#allocation2 + $0x108] sm:$0xff] %v2099_v51  ;;  %v1942_v1 = vmul.f32 %v3960_v28, %v1730_v53  ;;  %v1575_v4 = vsub.f32 %v1093_v49, %v1253_v56  ;;  %v1095_v5 = vld [vmem:[%s3768_s24 + $0x90] sm:$0xff]  ;;  %v1734_v23 = vand.u32 2147483647, %v1574_v3 }
 0x138   : > { %v1732_v59 = vand.u32 2147483647, %v1572_v45  ;;  %v1094_v61 = vld [vmem:[%s3768_s24 + $0x88] sm:$0xff]  ;;  %v2100_v0 = vadd.f32 %v1940_v52, %v1408_v32  ;;  %v1255_v6 = vld [vmem:[%s3770_s12 + $0x90] sm:$0xff]  ;;  %v1943_v9 = vmul.f32 %v3963_v29, %v1731_v58  ;;  %v1733_v12 = vand.u32 2147483647, %v1573_v60 }
 0x139   : > { %v1254_v63 = vld [vmem:[%s3770_s12 + $0x88] sm:$0xff]  ;;  %v2101_v8 = vadd.f32 %v1941_v57, %v1409_v39  ;;  %v1414_v14 = vld [vmem:[#allocation2 + $0x60] sm:$0xff]  ;;  %v1415_v17 = vld [vmem:[#allocation2 + $0xd8] sm:$0xff]  ;;  %v2102_v21 = vadd.f32 %v1942_v1, %v1410_v18  ;;  %v1735_v24 = vand.u32 2147483647, %v1575_v4  ;;  %v1577_v11 = vsub.f32 %v1095_v5, %v1255_v6 }
 0x13a   : > { %v1944_v10 = vmul.f32 %v3968_v35, %v1732_v59  ;;  %v1096_v19 = vld [vmem:[%s3768_s24 + $0x98] sm:$0xff]  ;;  %2260 = vst [vmem:[#allocation2 + $0x488] sm:$0xff] %v2100_v0  ;;  %v1576_v25 = vsub.f32 %v1094_v61, %v1254_v63  ;;  %v1097_v27 = vld [vmem:[%s3768_s24 + $0xa0] sm:$0xff]  ;;  %v2103_v31 = vadd.f32 %v1943_v9, %v1411_v54  ;;  %v1945_v32 = vmul.f32 %v3979_v47, %v1733_v12  ;;  %v1416_v34 = vld [vmem:[#allocation2 + $0x388] sm:$0xff] }
 0x13b   : > { %v1256_v20 = vld [vmem:[%s3770_s12 + $0x98] sm:$0xff]  ;;  %v1257_v30 = vld [vmem:[%s3770_s12 + $0xa0] sm:$0xff]  ;;  %2261 = vst [vmem:[#allocation2 + $0x310] sm:$0xff] %v2101_v8  ;;  %v1098_v36 = vld [vmem:[%s3768_s24 + $0xa8] sm:$0xff]  ;;  %v1946_v38 = vmul.f32 %v3988_v62, %v1734_v23  ;;  %v1947_v39 = vmul.f32 %v3998_v13, %v1735_v24  ;;  %v1737_v44 = vand.u32 2147483647, %v1577_v11 }
 0x13c   : > { %v2104_v16 = vadd.f32 %v1944_v10, %v1412_v55  ;;  %v1258_v37 = vld [vmem:[%s3770_s12 + $0xa8] sm:$0xff]  ;;  %2262 = vst [vmem:[#allocation2 + $0x4f0] sm:$0xff] %v2102_v21  ;;  %v1736_v40 = vand.u32 2147483647, %v1576_v25  ;;  %v1417_v41 = vld [vmem:[#allocation2 + $0x160] sm:$0xff]  ;;  %v1578_v42 = vsub.f32 %v1096_v19, %v1256_v20  ;;  %v1099_v43 = vld [vmem:[%s3768_s24 + $0xb0] sm:$0xff]  ;;  %v2105_v18 = vadd.f32 %v1945_v32, %v1413_v2 }
 0x13d   : > { %v1259_v7 = vld [vmem:[%s3770_s12 + $0xb0] sm:$0xff]  ;;  %2263 = vst [vmem:[#allocation2 + $0x308] sm:$0xff] %v2103_v31  ;;  %v1418_v45 = vld [vmem:[#allocation2 + $0x220] sm:$0xff]  ;;  %v1579_v46 = vsub.f32 %v1097_v27, %v1257_v30  ;;  %v1580_v48 = vsub.f32 %v1098_v36, %v1258_v37  ;;  %v1100_v49 = vld [vmem:[%s3768_s24 + $0xb8] sm:$0xff]  ;;  %v2106_v51 = vadd.f32 %v1946_v38, %v1414_v14  ;;  %v2107_v52 = vadd.f32 %v1947_v39, %v1415_v17 }
 0x13e   : > { %2264 = vst [vmem:[#allocation2 + $0x2a8] sm:$0xff] %v2104_v16  ;;  %v1260_v50 = vld [vmem:[%s3770_s12 + $0xb8] sm:$0xff]  ;;  %v1948_v53 = vmul.f32 %v4008_v22, %v1736_v40  ;;  %v1738_v54 = vand.u32 2147483647, %v1578_v42  ;;  %v1419_v55 = vld [vmem:[#allocation2 + $0xa0] sm:$0xff]  ;;  %2265 = vst [vmem:[#allocation2 + $0x398] sm:$0xff] %v2105_v18  ;;  %v1949_v58 = vmul.f32 %v4002_v15, %v1737_v44  ;;  %v1581_v63 = vsub.f32 %v1099_v43, %v1259_v7 }
 0x13f   : > { %v1101_v56 = vld [vmem:[%s3768_s24 + $0xc0] sm:$0xff]  ;;  %v1739_v59 = vand.u32 2147483647, %v1579_v46  ;;  %v1740_v61 = vand.u32 2147483647, %v1580_v48  ;;  %v1102_v0 = vld [vmem:[%s3768_s24 + $0xc8] sm:$0xff]  ;;  %v1582_v4 = vsub.f32 %v1100_v49, %v1260_v50 }
 0x140   : > { %v1261_v57 = vld [vmem:[%s3770_s12 + $0xc0] sm:$0xff]  ;;  %2266 = vst [vmem:[#allocation2 + $0x60] sm:$0xff] %v2106_v51  ;;  %2267 = vst [vmem:[#allocation2 + $0xd8] sm:$0xff] %v2107_v52  ;;  %v2108_v1 = vadd.f32 %v1948_v53, %v1416_v34  ;;  %v1950_v2 = vmul.f32 %v4015_v33, %v1738_v54  ;;  %v1421_v3 = vld [vmem:[#allocation2 + $0x4f8] sm:$0xff]  ;;  %v2109_v9 = vadd.f32 %v1949_v58, %v1417_v41  ;;  %v1741_v14 = vand.u32 2147483647, %v1581_v63 }
 0x141   : > { %v1420_v60 = vld [vmem:[#allocation2 + $0x360] sm:$0xff]  ;;  %v1583_v5 = vsub.f32 %v1101_v56, %v1261_v57  ;;  %v1262_v6 = vld [vmem:[%s3770_s12 + $0xc8] sm:$0xff]  ;;  %v1103_v8 = vld [vmem:[%s3768_s24 + $0xd0] sm:$0xff]  ;;  %v1951_v10 = vmul.f32 %v3955_v26, %v1739_v59  ;;  %v1952_v12 = vmul.f32 %v3960_v28, %v1740_v61  ;;  %v1742_v23 = vand.u32 2147483647, %v1582_v4 }
 0x142   : > { %v1422_v17 = vld [vmem:[#allocation2 + $0x380] sm:$0xff]  ;;  %v1263_v19 = vld [vmem:[%s3770_s12 + $0xd0] sm:$0xff]  ;;  %v1104_v20 = vld [vmem:[%s3768_s24 + $0xd8] sm:$0xff]  ;;  %2268 = vst [vmem:[#allocation2 + $0x388] sm:$0xff] %v2108_v1  ;;  %v2110_v21 = vadd.f32 %v1950_v2, %v1418_v45  ;;  %v1584_v27 = vsub.f32 %v1102_v0, %v1262_v6  ;;  %v1953_v32 = vmul.f32 %v3963_v29, %v1741_v14 }
 0x143   : > { %v1423_v24 = vld [vmem:[#allocation2 + $0x458] sm:$0xff]  ;;  %v1743_v25 = vand.u32 2147483647, %v1583_v5  ;;  %2269 = vst [vmem:[#allocation2 + $0x160] sm:$0xff] %v2109_v9  ;;  %v2111_v31 = vadd.f32 %v1951_v10, %v1419_v55  ;;  %v2112_v16 = vadd.f32 %v1952_v12, %v1420_v60  ;;  %v1424_v34 = vld [vmem:[#allocation2 + $0x4a0] sm:$0xff]  ;;  %v1585_v11 = vsub.f32 %v1103_v8, %v1263_v19  ;;  %v1425_v41 = vld [vmem:[#allocation2 + $0x390] sm:$0xff] }
 0x144   : > { %v1264_v30 = vld [vmem:[%s3770_s12 + $0xd8] sm:$0xff]  ;;  %v1105_v36 = vld [vmem:[%s3768_s24 + $0xe0] sm:$0xff]  ;;  %2270 = vst [vmem:[#allocation2 + $0x220] sm:$0xff] %v2110_v21  ;;  %v1954_v38 = vmul.f32 %v3968_v35, %v1742_v23  ;;  %v1744_v40 = vand.u32 2147483647, %v1584_v27  ;;  %v1106_v43 = vld [vmem:[%s3768_s24 + $0xe8] sm:$0xff]  ;;  %v2113_v18 = vadd.f32 %v1953_v32, %v1421_v3 }
 0x145   : > { %v1265_v37 = vld [vmem:[%s3770_s12 + $0xe0] sm:$0xff]  ;;  %v1955_v39 = vmul.f32 %v3979_v47, %v1743_v25  ;;  %v1586_v42 = vsub.f32 %v1104_v20, %v1264_v30  ;;  %v1266_v7 = vld [vmem:[%s3770_s12 + $0xe8] sm:$0xff]  ;;  %2271 = vst [vmem:[#allocation2 + $0xa0] sm:$0xff] %v2111_v31  ;;  %2272 = vst [vmem:[#allocation2 + $0x360] sm:$0xff] %v2112_v16  ;;  %v1745_v44 = vand.u32 2147483647, %v1585_v11 }
 0x146   : > { %v1426_v45 = vld [vmem:[#allocation2 + $0xb8] sm:$0xff]  ;;  %v1587_v46 = vsub.f32 %v1105_v36, %v1265_v37  ;;  %v1588_v48 = vsub.f32 %v1106_v43, %v1266_v7  ;;  %v1107_v49 = vld [vmem:[%s3768_s24 + $0xf0] sm:$0xff]  ;;  %v2114_v51 = vadd.f32 %v1954_v38, %v1422_v17  ;;  %v1956_v53 = vmul.f32 %v3988_v62, %v1744_v40  ;;  %2273 = vst [vmem:[#allocation2 + $0x4f8] sm:$0xff] %v2113_v18  ;;  %v1109_v63 = vld [vmem:[%s3768_s24 + $0x100] sm:$0xff] }
 0x147   : > { %v1267_v50 = vld [vmem:[%s3770_s12 + $0xf0] sm:$0xff]  ;;  %v2115_v52 = vadd.f32 %v1955_v39, %v1423_v24  ;;  %v1746_v54 = vand.u32 2147483647, %v1586_v42  ;;  %v1108_v56 = vld [vmem:[%s3768_s24 + $0xf8] sm:$0xff]  ;;  %v1957_v58 = vmul.f32 %v3998_v13, %v1745_v44  ;;  %v1269_v0 = vld [vmem:[%s3770_s12 + $0x100] sm:$0xff] }
 0x148   : > { %v1427_v55 = vld [vmem:[#allocation2 + $0x270] sm:$0xff]  ;;  %v1268_v57 = vld [vmem:[%s3770_s12 + $0xf8] sm:$0xff]  ;;  %v1747_v59 = vand.u32 2147483647, %v1587_v46  ;;  %v1748_v60 = vand.u32 2147483647, %v1588_v48  ;;  %v1589_v61 = vsub.f32 %v1107_v49, %v1267_v50  ;;  %v2116_v1 = vadd.f32 %v1956_v53, %v1424_v34 }
 0x149   : > { %2274 = vst [vmem:[#allocation2 + $0x380] sm:$0xff] %v2114_v51  ;;  %2275 = vst [vmem:[#allocation2 + $0x458] sm:$0xff] %v2115_v52  ;;  %v1958_v2 = vmul.f32 %v4008_v22, %v1746_v54  ;;  %v1428_v3 = vld [vmem:[#allocation2 + $0x480] sm:$0xff]  ;;  %v1590_v4 = vsub.f32 %v1108_v56, %v1268_v57  ;;  %v1591_v5 = vsub.f32 %v1109_v63, %v1269_v0  ;;  %v1110_v6 = vld [vmem:[%s3768_s24 + $0x108] sm:$0xff] }
 0x14a   : > { %v1270_v8 = vld [vmem:[%s3770_s12 + $0x108] sm:$0xff]  ;;  %v2117_v9 = vadd.f32 %v1957_v58, %v1425_v41  ;;  %v1959_v10 = vmul.f32 %v4002_v15, %v1747_v59  ;;  %v1960_v12 = vmul.f32 %v4015_v33, %v1748_v60  ;;  %v1749_v17 = vand.u32 2147483647, %v1589_v61  ;;  %v1111_v19 = vld [vmem:[%s3768_s24 + $0x110] sm:$0xff]  ;;  %2276 = vst [vmem:[#allocation2 + $0x4a0] sm:$0xff] %v2116_v1  ;;  %v1430_v23 = vld [vmem:[#allocation2 + $0x2a0] sm:$0xff] }
 0x14b   : > { %v1429_v14 = vld [vmem:[#allocation2 + $0x1a8] sm:$0xff]  ;;  %v1271_v20 = vld [vmem:[%s3770_s12 + $0x110] sm:$0xff]  ;;  %v2118_v21 = vadd.f32 %v1958_v2, %v1426_v45  ;;  %v1750_v24 = vand.u32 2147483647, %v1590_v4  ;;  %v1751_v25 = vand.u32 2147483647, %v1591_v5  ;;  %v1592_v27 = vsub.f32 %v1110_v6, %v1270_v8 }
 0x14c   : > { %v1112_v30 = vld [vmem:[%s3768_s24 + $0x118] sm:$0xff]  ;;  %2277 = vst [vmem:[#allocation2 + $0x390] sm:$0xff] %v2117_v9  ;;  %v2119_v31 = vadd.f32 %v1959_v10, %v1427_v55  ;;  %v2120_v16 = vadd.f32 %v1960_v12, %v1428_v3  ;;  %v1961_v32 = vmul.f32 %v3955_v26, %v1749_v17  ;;  %v1593_v11 = vsub.f32 %v1111_v19, %v1271_v20  ;;  %v1113_v37 = vld [vmem:[%s3768_s24 + $0x120] sm:$0xff]  ;;  %v1114_v7 = vld [vmem:[%s3768_s24 + $0x128] sm:$0xff] }
 0x14d   : > { %v1431_v34 = vld [vmem:[#allocation2 + $0x38] sm:$0xff]  ;;  %2278 = vst [vmem:[#allocation2 + $0xb8] sm:$0xff] %v2118_v21  ;;  %v1962_v38 = vmul.f32 %v3960_v28, %v1750_v24  ;;  %v1963_v39 = vmul.f32 %v3963_v29, %v1751_v25  ;;  %v1752_v41 = vand.u32 2147483647, %v1592_v27  ;;  %v1273_v43 = vld [vmem:[%s3770_s12 + $0x120] sm:$0xff]  ;;  %v1433_v44 = vld [vmem:[#allocation2 + $0xb0] sm:$0xff] }
 0x14e   : > { %v1272_v36 = vld [vmem:[%s3770_s12 + $0x118] sm:$0xff]  ;;  %2279 = vst [vmem:[#allocation2 + $0x270] sm:$0xff] %v2119_v31  ;;  %2280 = vst [vmem:[#allocation2 + $0x480] sm:$0xff] %v2120_v16  ;;  %v2121_v18 = vadd.f32 %v1961_v32, %v1429_v14  ;;  %v1753_v45 = vand.u32 2147483647, %v1593_v11  ;;  %v1595_v46 = vsub.f32 %v1113_v37, %v1273_v43  ;;  %v1274_v48 = vld [vmem:[%s3770_s12 + $0x128] sm:$0xff] }
 0x14f   : > { %v1432_v40 = vld [vmem:[#allocation2 + $0x3f8] sm:$0xff]  ;;  %v1594_v42 = vsub.f32 %v1112_v30, %v1272_v36  ;;  %v1115_v49 = vld [vmem:[%s3768_s24 + $0x130] sm:$0xff]  ;;  %v2122_v50 = vadd.f32 %v1962_v38, %v1430_v23  ;;  %v2123_v51 = vadd.f32 %v1963_v39, %v1431_v34  ;;  %v1964_v52 = vmul.f32 %v3968_v35, %v1752_v41  ;;  %v1434_v53 = vld [vmem:[#allocation2 + $0x320] sm:$0xff] }
 0x150   : > { %v1275_v55 = vld [vmem:[%s3770_s12 + $0x130] sm:$0xff]  ;;  %v1116_v56 = vld [vmem:[%s3768_s24 + $0x138] sm:$0xff]  ;;  %2281 = vst [vmem:[#allocation2 + $0x1a8] sm:$0xff] %v2121_v18  ;;  %v1965_v57 = vmul.f32 %v3979_v47, %v1753_v45  ;;  %v1435_v58 = vld [vmem:[#allocation2 + $0x188] sm:$0xff]  ;;  %v1755_v59 = vand.u32 2147483647, %v1595_v46  ;;  %v1596_v60 = vsub.f32 %v1114_v7, %v1274_v48 }
 0x151   : > { %v1754_v54 = vand.u32 2147483647, %v1594_v42  ;;  %v1597_v61 = vsub.f32 %v1115_v49, %v1275_v55  ;;  %v1276_v63 = vld [vmem:[%s3770_s12 + $0x138] sm:$0xff]  ;;  %v1117_v0 = vld [vmem:[%s3768_s24 + $0x140] sm:$0xff]  ;;  %2282 = vst [vmem:[#allocation2 + $0x2a0] sm:$0xff] %v2122_v50  ;;  %2283 = vst [vmem:[#allocation2 + $0x38] sm:$0xff] %v2123_v51  ;;  %v2124_v1 = vadd.f32 %v1964_v52, %v1432_v40 }
 0x152   : > { %v1436_v3 = vld [vmem:[#allocation2 + $0x210] sm:$0xff]  ;;  %v1598_v4 = vsub.f32 %v1116_v56, %v1276_v63  ;;  %v1277_v5 = vld [vmem:[%s3770_s12 + $0x140] sm:$0xff]  ;;  %v1118_v6 = vld [vmem:[%s3768_s24 + $0x148] sm:$0xff]  ;;  %v2125_v8 = vadd.f32 %v1965_v57, %v1433_v44  ;;  %v1967_v9 = vmul.f32 %v3998_v13, %v1755_v59  ;;  %v1756_v10 = vand.u32 2147483647, %v1596_v60 }
 0x153   : > { %v1966_v2 = vmul.f32 %v3988_v62, %v1754_v54  ;;  %v1437_v12 = vld [vmem:[#allocation2 + $0x78] sm:$0xff]  ;;  %v1757_v14 = vand.u32 2147483647, %v1597_v61  ;;  %v1278_v17 = vld [vmem:[%s3770_s12 + $0x148] sm:$0xff]  ;;  %2284 = vst [vmem:[#allocation2 + $0x3f8] sm:$0xff] %v2124_v1  ;;  %v1438_v20 = vld [vmem:[#allocation2 + $0x20] sm:$0xff]  ;;  %v1599_v23 = vsub.f32 %v1117_v0, %v1277_v5 }
 0x154   : > { %v1758_v21 = vand.u32 2147483647, %v1598_v4  ;;  %v1600_v24 = vsub.f32 %v1118_v6, %v1278_v17  ;;  %v1119_v25 = vld [vmem:[%s3768_s24 + $0x150] sm:$0xff]  ;;  %2285 = vst [vmem:[#allocation2 + $0xb0] sm:$0xff] %v2125_v8  ;;  %v2127_v30 = vadd.f32 %v1967_v9, %v1435_v58  ;;  %v1968_v31 = vmul.f32 %v4008_v22, %v1756_v10  ;;  %v1439_v32 = vld [vmem:[#allocation2 + $0x3c8] sm:$0xff]  ;;  %v1120_v11 = vld [vmem:[%s3768_s24 + $0x158] sm:$0xff] }
 0x155   : > { %v2126_v19 = vadd.f32 %v1966_v2, %v1434_v53  ;;  %v1279_v27 = vld [vmem:[%s3770_s12 + $0x150] sm:$0xff]  ;;  %v1969_v16 = vmul.f32 %v4002_v15, %v1757_v14  ;;  %v1280_v36 = vld [vmem:[%s3770_s12 + $0x158] sm:$0xff]  ;;  %v1759_v38 = vand.u32 2147483647, %v1599_v23  ;;  %v1121_v41 = vld [vmem:[%s3768_s24 + $0x160] sm:$0xff] }
 0x156   : > { %v1601_v34 = vsub.f32 %v1119_v25, %v1279_v27  ;;  %v1970_v37 = vmul.f32 %v4015_v33, %v1758_v21  ;;  %v1760_v39 = vand.u32 2147483647, %v1600_v24  ;;  %v1602_v40 = vsub.f32 %v1120_v11, %v1280_v36  ;;  %v1281_v42 = vld [vmem:[%s3770_s12 + $0x160] sm:$0xff]  ;;  %2287 = vst [vmem:[#allocation2 + $0x188] sm:$0xff] %v2127_v30  ;;  %v1122_v46 = vld [vmem:[%s3768_s24 + $0x168] sm:$0xff]  ;;  %v1441_v52 = vld [vmem:[#allocation2 + $0x3b8] sm:$0xff] }
 0x157   : > { %2286 = vst [vmem:[#allocation2 + $0x320] sm:$0xff] %v2126_v19  ;;  %v2128_v43 = vadd.f32 %v1968_v31, %v1436_v3  ;;  %v2129_v7 = vadd.f32 %v1969_v16, %v1437_v12  ;;  %v1440_v18 = vld [vmem:[#allocation2 + $0x280] sm:$0xff]  ;;  %v1603_v45 = vsub.f32 %v1121_v41, %v1281_v42  ;;  %v1282_v48 = vld [vmem:[%s3770_s12 + $0x168] sm:$0xff]  ;;  %v1971_v50 = vmul.f32 %v3955_v26, %v1759_v38  ;;  %v1123_v54 = vld [vmem:[%s3768_s24 + $0x170] sm:$0xff] }
 0x158   : > { %v1761_v44 = vand.u32 2147483647, %v1601_v34  ;;  %v2130_v49 = vadd.f32 %v1970_v37, %v1438_v20  ;;  %v1972_v51 = vmul.f32 %v3960_v28, %v1760_v39  ;;  %v1762_v53 = vand.u32 2147483647, %v1602_v40  ;;  %v1283_v55 = vld [vmem:[%s3770_s12 + $0x170] sm:$0xff]  ;;  %v1442_v57 = vld [vmem:[#allocation2 + $0x8] sm:$0xff] }
 0x159   : > { %2288 = vst [vmem:[#allocation2 + $0x210] sm:$0xff] %v2128_v43  ;;  %2289 = vst [vmem:[#allocation2 + $0x78] sm:$0xff] %v2129_v7  ;;  %v1763_v58 = vand.u32 2147483647, %v1603_v45  ;;  %v1604_v59 = vsub.f32 %v1122_v46, %v1282_v48  ;;  %v1605_v60 = vsub.f32 %v1123_v54, %v1283_v55  ;;  %v1124_v61 = vld [vmem:[%s3768_s24 + $0x178] sm:$0xff]  ;;  %v2131_v0 = vadd.f32 %v1971_v50, %v1439_v32  ;;  %v1443_v3 = vld [vmem:[#allocation2 + $0x48] sm:$0xff] }
 0x15a   : > { %v1973_v56 = vmul.f32 %v3963_v29, %v1761_v44  ;;  %v1284_v63 = vld [vmem:[%s3770_s12 + $0x178] sm:$0xff]  ;;  %2290 = vst [vmem:[#allocation2 + $0x20] sm:$0xff] %v2130_v49  ;;  %v2132_v1 = vadd.f32 %v1972_v51, %v1440_v18  ;;  %v1974_v2 = vmul.f32 %v3968_v35, %v1762_v53  ;;  %v1125_v5 = vld [vmem:[%s3768_s24 + $0x180] sm:$0xff]  ;;  %v1126_v17 = vld [vmem:[%s3768_s24 + $0x188] sm:$0xff] }
 0x15b   : > { %v1606_v4 = vsub.f32 %v1124_v61, %v1284_v63  ;;  %v1285_v6 = vld [vmem:[%s3770_s12 + $0x180] sm:$0xff]  ;;  %v1975_v9 = vmul.f32 %v3979_v47, %v1763_v58  ;;  %v1764_v12 = vand.u32 2147483647, %v1604_v59  ;;  %v1765_v14 = vand.u32 2147483647, %v1605_v60  ;;  %2291 = vst [vmem:[#allocation2 + $0x3c8] sm:$0xff] %v2131_v0 }
 0x15c   : > { %v2133_v8 = vadd.f32 %v1973_v56, %v1441_v52  ;;  %v1444_v10 = vld [vmem:[#allocation2 + $0x300] sm:$0xff]  ;;  %2292 = vst [vmem:[#allocation2 + $0x280] sm:$0xff] %v2132_v1  ;;  %v2134_v19 = vadd.f32 %v1974_v2, %v1442_v57  ;;  %v1445_v20 = vld [vmem:[#allocation2 + $0x4a8] sm:$0xff]  ;;  %v1607_v23 = vsub.f32 %v1125_v5, %v1285_v6  ;;  %v1127_v25 = vld [vmem:[%s3768_s24 + $0x190] sm:$0xff] }
 0x15d   : > { %v1766_v21 = vand.u32 2147483647, %v1606_v4  ;;  %v1286_v24 = vld [vmem:[%s3770_s12 + $0x188] sm:$0xff]  ;;  %v2135_v27 = vadd.f32 %v1975_v9, %v1443_v3  ;;  %v1976_v30 = vmul.f32 %v3988_v62, %v1764_v12  ;;  %v1977_v31 = vmul.f32 %v3998_v13, %v1765_v14  ;;  %v1446_v16 = vld [vmem:[#allocation2 + $0x218] sm:$0xff]  ;;  %v1287_v34 = vld [vmem:[%s3770_s12 + $0x190] sm:$0xff] }
 0x15e   : > { %2293 = vst [vmem:[#allocation2 + $0x3b8] sm:$0xff] %v2133_v8  ;;  %v1608_v32 = vsub.f32 %v1126_v17, %v1286_v24  ;;  %v1128_v11 = vld [vmem:[%s3768_s24 + $0x198] sm:$0xff]  ;;  %2294 = vst [vmem:[#allocation2 + $0x8] sm:$0xff] %v2134_v19  ;;  %v1767_v37 = vand.u32 2147483647, %v1607_v23  ;;  %v1609_v38 = vsub.f32 %v1127_v25, %v1287_v34  ;;  %v1129_v40 = vld [vmem:[%s3768_s24 + $0x1a0] sm:$0xff] }
 0x15f   : > { %v1978_v36 = vmul.f32 %v4008_v22, %v1766_v21  ;;  %v1288_v39 = vld [vmem:[%s3770_s12 + $0x198] sm:$0xff]  ;;  %2295 = vst [vmem:[#allocation2 + $0x48] sm:$0xff] %v2135_v27  ;;  %v2136_v41 = vadd.f32 %v1976_v30, %v1444_v10  ;;  %v2137_v42 = vadd.f32 %v1977_v31, %v1445_v20  ;;  %v1447_v43 = vld [vmem:[#allocation2 + $0x168] sm:$0xff]  ;;  %v1289_v44 = vld [vmem:[%s3770_s12 + $0x1a0] sm:$0xff] }
 0x160   : > { %v1768_v7 = vand.u32 2147483647, %v1608_v32  ;;  %v1610_v18 = vsub.f32 %v1128_v11, %v1288_v39  ;;  %v1130_v45 = vld [vmem:[%s3768_s24 + $0x1a8] sm:$0xff]  ;;  %v1979_v48 = vmul.f32 %v4002_v15, %v1767_v37  ;;  %v1448_v49 = vld [vmem:[#allocation2 + $0x1f0] sm:$0xff]  ;;  %v1769_v50 = vand.u32 2147483647, %v1609_v38 }
 0x161   : > { %v2138_v46 = vadd.f32 %v1978_v36, %v1446_v16  ;;  %v1611_v51 = vsub.f32 %v1129_v40, %v1289_v44  ;;  %v1290_v52 = vld [vmem:[%s3770_s12 + $0x1a8] sm:$0xff]  ;;  %v1131_v53 = vld [vmem:[%s3768_s24 + $0x1b0] sm:$0xff]  ;;  %2296 = vst [vmem:[#allocation2 + $0x300] sm:$0xff] %v2136_v41  ;;  %2297 = vst [vmem:[#allocation2 + $0x4a8] sm:$0xff] %v2137_v42 }
 0x162   : > { %v1980_v54 = vmul.f32 %v4015_v33, %v1768_v7  ;;  %v1449_v55 = vld [vmem:[#allocation2 + $0x10] sm:$0xff]  ;;  %v1770_v56 = vand.u32 2147483647, %v1610_v18  ;;  %v1612_v57 = vsub.f32 %v1130_v45, %v1290_v52  ;;  %v1132_v59 = vld [vmem:[%s3768_s24 + $0x1b8] sm:$0xff]  ;;  %v2139_v60 = vadd.f32 %v1979_v48, %v1447_v43  ;;  %v1133_v3 = vld [vmem:[%s3768_s24 + $0x1c0] sm:$0xff] }
 0x163   : > { %v1291_v58 = vld [vmem:[%s3770_s12 + $0x1b0] sm:$0xff]  ;;  %2298 = vst [vmem:[#allocation2 + $0x218] sm:$0xff] %v2138_v46  ;;  %v1981_v61 = vmul.f32 %v3955_v26, %v1769_v50  ;;  %v1450_v63 = vld [vmem:[#allocation2 + $0x1f8] sm:$0xff]  ;;  %v1771_v0 = vand.u32 2147483647, %v1611_v51  ;;  %v1451_v6 = vld [vmem:[#allocation2 + $0x2e8] sm:$0xff] }
 0x164   : > { %v1613_v1 = vsub.f32 %v1131_v53, %v1291_v58  ;;  %v1292_v2 = vld [vmem:[%s3770_s12 + $0x1b8] sm:$0xff]  ;;  %v2140_v4 = vadd.f32 %v1980_v54, %v1448_v49  ;;  %v1982_v5 = vmul.f32 %v3960_v28, %v1770_v56  ;;  %v1772_v8 = vand.u32 2147483647, %v1612_v57  ;;  %v1293_v10 = vld [vmem:[%s3770_s12 + $0x1c0] sm:$0xff]  ;;  %v1134_v12 = vld [vmem:[%s3768_s24 + $0x1c8] sm:$0xff]  ;;  %2299 = vst [vmem:[#allocation2 + $0x168] sm:$0xff] %v2139_v60 }
 0x165   : > { %v1614_v9 = vsub.f32 %v1132_v59, %v1292_v2  ;;  %v2141_v14 = vadd.f32 %v1981_v61, %v1449_v55  ;;  %v1983_v17 = vmul.f32 %v3963_v29, %v1771_v0  ;;  %v1452_v19 = vld [vmem:[#allocation2 + $0x258] sm:$0xff]  ;;  %v1615_v21 = vsub.f32 %v1133_v3, %v1293_v10  ;;  %v1294_v23 = vld [vmem:[%s3770_s12 + $0x1c8] sm:$0xff]  ;;  %v1135_v24 = vld [vmem:[%s3768_s24 + $0x1d0] sm:$0xff] }
 0x166   : > { %v1773_v20 = vand.u32 2147483647, %v1613_v1  ;;  %2300 = vst [vmem:[#allocation2 + $0x1f0] sm:$0xff] %v2140_v4  ;;  %v2142_v25 = vadd.f32 %v1982_v5, %v1450_v63  ;;  %v1984_v27 = vmul.f32 %v3968_v35, %v1772_v8  ;;  %v1453_v30 = vld [vmem:[#allocation2 + $0x260] sm:$0xff]  ;;  %v1616_v16 = vsub.f32 %v1134_v12, %v1294_v23  ;;  %v1295_v32 = vld [vmem:[%s3770_s12 + $0x1d0] sm:$0xff]  ;;  %v1136_v34 = vld [vmem:[%s3768_s24 + $0x1d8] sm:$0xff] }
 0x167   : > { %v1774_v31 = vand.u32 2147483647, %v1614_v9  ;;  %2301 = vst [vmem:[#allocation2 + $0x10] sm:$0xff] %v2141_v14  ;;  %v2143_v11 = vadd.f32 %v1983_v17, %v1451_v6  ;;  %v1454_v37 = vld [vmem:[#allocation2 + $0x2c0] sm:$0xff]  ;;  %v1775_v38 = vand.u32 2147483647, %v1615_v21  ;;  %v1617_v39 = vsub.f32 %v1135_v24, %v1295_v32 }
 0x168   : > { %v1985_v36 = vmul.f32 %v3979_v47, %v1773_v20  ;;  %v1296_v40 = vld [vmem:[%s3770_s12 + $0x1d8] sm:$0xff]  ;;  %v1137_v41 = vld [vmem:[%s3768_s24 + $0x1e0] sm:$0xff]  ;;  %2302 = vst [vmem:[#allocation2 + $0x1f8] sm:$0xff] %v2142_v25  ;;  %v2144_v42 = vadd.f32 %v1984_v27, %v1452_v19  ;;  %v1776_v18 = vand.u32 2147483647, %v1616_v16  ;;  %v1138_v46 = vld [vmem:[%s3768_s24 + $0x1e8] sm:$0xff] }
 0x169   : > { %v1986_v43 = vmul.f32 %v3988_v62, %v1774_v31  ;;  %v1455_v7 = vld [vmem:[#allocation2 + $0x140] sm:$0xff]  ;;  %v1618_v44 = vsub.f32 %v1136_v34, %v1296_v40  ;;  %2303 = vst [vmem:[#allocation2 + $0x2e8] sm:$0xff] %v2143_v11  ;;  %v1987_v49 = vmul.f32 %v3998_v13, %v1775_v38  ;;  %v1456_v50 = vld [vmem:[#allocation2 + $0xf8] sm:$0xff]  ;;  %v1777_v51 = vand.u32 2147483647, %v1617_v39  ;;  %v1298_v53 = vld [vmem:[%s3770_s12 + $0x1e8] sm:$0xff] }
 0x16a   : > { %v1297_v45 = vld [vmem:[%s3770_s12 + $0x1e0] sm:$0xff]  ;;  %v2145_v48 = vadd.f32 %v1985_v36, %v1453_v30  ;;  %v1139_v54 = vld [vmem:[%s3768_s24 + $0x1f0] sm:$0xff]  ;;  %2304 = vst [vmem:[#allocation2 + $0x258] sm:$0xff] %v2144_v42  ;;  %v1988_v56 = vmul.f32 %v4008_v22, %v1776_v18  ;;  %v1620_v59 = vsub.f32 %v1138_v46, %v1298_v53  ;;  %v1140_v61 = vld [vmem:[%s3768_s24 + $0x1f8] sm:$0xff] }
 0x16b   : > { %v1619_v52 = vsub.f32 %v1137_v41, %v1297_v45  ;;  %v2146_v55 = vadd.f32 %v1986_v43, %v1454_v37  ;;  %v1457_v57 = vld [vmem:[#allocation2 + $0x70] sm:$0xff]  ;;  %v1778_v58 = vand.u32 2147483647, %v1618_v44  ;;  %v2147_v63 = vadd.f32 %v1987_v49, %v1455_v7  ;;  %v1458_v1 = vld [vmem:[#allocation2 + $0x4c0] sm:$0xff]  ;;  %v1300_v4 = vld [vmem:[%s3770_s12 + $0x1f8] sm:$0xff] }
 0x16c   : > { %v1299_v60 = vld [vmem:[%s3770_s12 + $0x1f0] sm:$0xff]  ;;  %2305 = vst [vmem:[#allocation2 + $0x260] sm:$0xff] %v2145_v48  ;;  %v1989_v0 = vmul.f32 %v4002_v15, %v1777_v51  ;;  %v1141_v5 = vld [vmem:[%s3768_s24 + $0x200] sm:$0xff]  ;;  %v2148_v6 = vadd.f32 %v1988_v56, %v1456_v50  ;;  %v1780_v10 = vand.u32 2147483647, %v1620_v59  ;;  %v1622_v12 = vsub.f32 %v1140_v61, %v1300_v4  ;;  %v1142_v17 = vld [vmem:[%s3768_s24 + $0x208] sm:$0xff] }
 0x16d   : > { %v1779_v2 = vand.u32 2147483647, %v1619_v52  ;;  %v1621_v3 = vsub.f32 %v1139_v54, %v1299_v60  ;;  %2306 = vst [vmem:[#allocation2 + $0x2c0] sm:$0xff] %v2146_v55  ;;  %v1990_v8 = vmul.f32 %v4015_v33, %v1778_v58  ;;  %v1459_v9 = vld [vmem:[#allocation2 + $0x40] sm:$0xff]  ;;  %2307 = vst [vmem:[#allocation2 + $0x140] sm:$0xff] %v2147_v63  ;;  %v1460_v21 = vld [vmem:[#allocation2 + $0x350] sm:$0xff] }
 0x16e   : > { %v1301_v14 = vld [vmem:[%s3770_s12 + $0x200] sm:$0xff]  ;;  %v2149_v19 = vadd.f32 %v1989_v0, %v1457_v57  ;;  %v1302_v25 = vld [vmem:[%s3770_s12 + $0x208] sm:$0xff]  ;;  %v1143_v27 = vld [vmem:[%s3768_s24 + $0x210] sm:$0xff]  ;;  %2308 = vst [vmem:[#allocation2 + $0xf8] sm:$0xff] %v2148_v6  ;;  %v1992_v31 = vmul.f32 %v3960_v28, %v1780_v10  ;;  %v1782_v32 = vand.u32 2147483647, %v1622_v12 }
 0x16f   : > { %v1991_v20 = vmul.f32 %v3955_v26, %v1779_v2  ;;  %v1781_v23 = vand.u32 2147483647, %v1621_v3  ;;  %v1623_v24 = vsub.f32 %v1141_v5, %v1301_v14  ;;  %v2150_v30 = vadd.f32 %v1990_v8, %v1458_v1  ;;  %v1461_v16 = vld [vmem:[#allocation2 + $0x250] sm:$0xff]  ;;  %v1144_v36 = vld [vmem:[%s3768_s24 + $0x218] sm:$0xff]  ;;  %v1462_v39 = vld [vmem:[#allocation2 + $0x1e0] sm:$0xff] }
 0x170   : > { %v1624_v34 = vsub.f32 %v1142_v17, %v1302_v25  ;;  %v1303_v11 = vld [vmem:[%s3770_s12 + $0x210] sm:$0xff]  ;;  %2309 = vst [vmem:[#allocation2 + $0x70] sm:$0xff] %v2149_v19  ;;  %v1304_v42 = vld [vmem:[%s3770_s12 + $0x218] sm:$0xff]  ;;  %v1145_v43 = vld [vmem:[%s3768_s24 + $0x220] sm:$0xff]  ;;  %v2152_v7 = vadd.f32 %v1992_v31, %v1460_v21  ;;  %v1994_v18 = vmul.f32 %v3968_v35, %v1782_v32 }
 0x171   : > { %v2151_v37 = vadd.f32 %v1991_v20, %v1459_v9  ;;  %v1993_v38 = vmul.f32 %v3963_v29, %v1781_v23  ;;  %v1783_v40 = vand.u32 2147483647, %v1623_v24  ;;  %v1625_v41 = vsub.f32 %v1143_v27, %v1303_v11  ;;  %2310 = vst [vmem:[#allocation2 + $0x4c0] sm:$0xff] %v2150_v30  ;;  %v1463_v44 = vld [vmem:[#allocation2 + $0x318] sm:$0xff]  ;;  %v1305_v48 = vld [vmem:[%s3770_s12 + $0x220] sm:$0xff]  ;;  %v1146_v49 = vld [vmem:[%s3768_s24 + $0x228] sm:$0xff] }
 0x172   : > { %v1784_v45 = vand.u32 2147483647, %v1624_v34  ;;  %v1626_v46 = vsub.f32 %v1144_v36, %v1304_v42  ;;  %v1464_v52 = vld [vmem:[#allocation2 + $0x3a0] sm:$0xff]  ;;  %v1627_v54 = vsub.f32 %v1145_v43, %v1305_v48  ;;  %v1306_v55 = vld [vmem:[%s3770_s12 + $0x228] sm:$0xff]  ;;  %v1147_v56 = vld [vmem:[%s3768_s24 + $0x230] sm:$0xff]  ;;  %2312 = vst [vmem:[#allocation2 + $0x350] sm:$0xff] %v2152_v7  ;;  %v2154_v57 = vadd.f32 %v1994_v18, %v1462_v39 }
 0x173   : > { %2311 = vst [vmem:[#allocation2 + $0x40] sm:$0xff] %v2151_v37  ;;  %v2153_v50 = vadd.f32 %v1993_v38, %v1461_v16  ;;  %v1995_v51 = vmul.f32 %v3979_v47, %v1783_v40  ;;  %v1785_v53 = vand.u32 2147483647, %v1625_v41  ;;  %v1465_v59 = vld [vmem:[#allocation2 + $0x80] sm:$0xff]  ;;  %v1628_v61 = vsub.f32 %v1146_v49, %v1306_v55  ;;  %v1307_v63 = vld [vmem:[%s3770_s12 + $0x230] sm:$0xff]  ;;  %v1148_v0 = vld [vmem:[%s3768_s24 + $0x238] sm:$0xff] }
 0x174   : > { %v1996_v58 = vmul.f32 %v3988_v62, %v1784_v45  ;;  %v1786_v60 = vand.u32 2147483647, %v1626_v46  ;;  %v1466_v3 = vld [vmem:[#allocation2 + $0x400] sm:$0xff]  ;;  %v1787_v4 = vand.u32 2147483647, %v1627_v54  ;;  %v1629_v5 = vsub.f32 %v1147_v56, %v1307_v63  ;;  %v1308_v6 = vld [vmem:[%s3770_s12 + $0x238] sm:$0xff] }
 0x175   : > { %2313 = vst [vmem:[#allocation2 + $0x250] sm:$0xff] %v2153_v50  ;;  %v2155_v1 = vadd.f32 %v1995_v51, %v1463_v44  ;;  %v1997_v2 = vmul.f32 %v3998_v13, %v1785_v53  ;;  %v1149_v8 = vld [vmem:[%s3768_s24 + $0x240] sm:$0xff]  ;;  %2314 = vst [vmem:[#allocation2 + $0x1e0] sm:$0xff] %v2154_v57  ;;  %v1467_v12 = vld [vmem:[#allocation2 + $0x228] sm:$0xff]  ;;  %v1788_v14 = vand.u32 2147483647, %v1628_v61  ;;  %v1630_v17 = vsub.f32 %v1148_v0, %v1308_v6 }
 0x176   : > { %v2156_v9 = vadd.f32 %v1996_v58, %v1464_v52  ;;  %v1998_v10 = vmul.f32 %v4008_v22, %v1786_v60  ;;  %v1309_v19 = vld [vmem:[%s3770_s12 + $0x240] sm:$0xff]  ;;  %v1150_v20 = vld [vmem:[%s3768_s24 + $0x248] sm:$0xff]  ;;  %v1999_v23 = vmul.f32 %v4002_v15, %v1787_v4  ;;  %v1789_v25 = vand.u32 2147483647, %v1629_v5  ;;  %v1151_v31 = vld [vmem:[%s3768_s24 + $0x250] sm:$0xff] }
 0x177   : > { %2315 = vst [vmem:[#allocation2 + $0x318] sm:$0xff] %v2155_v1  ;;  %v2157_v21 = vadd.f32 %v1997_v2, %v1465_v59  ;;  %v1468_v24 = vld [vmem:[#allocation2 + $0x348] sm:$0xff]  ;;  %v1631_v27 = vsub.f32 %v1149_v8, %v1309_v19  ;;  %v2000_v32 = vmul.f32 %v4015_v33, %v1788_v14  ;;  %v1790_v11 = vand.u32 2147483647, %v1630_v17  ;;  %v1311_v37 = vld [vmem:[%s3770_s12 + $0x250] sm:$0xff]  ;;  %v1152_v38 = vld [vmem:[%s3768_s24 + $0x258] sm:$0xff] }
 0x178   : > { %v1310_v30 = vld [vmem:[%s3770_s12 + $0x248] sm:$0xff]  ;;  %2316 = vst [vmem:[#allocation2 + $0x3a0] sm:$0xff] %v2156_v9  ;;  %v2158_v16 = vadd.f32 %v1998_v10, %v1466_v3  ;;  %v2159_v39 = vadd.f32 %v1999_v23, %v1467_v12  ;;  %v2001_v40 = vmul.f32 %v3955_v26, %v1789_v25  ;;  %v1470_v41 = vld [vmem:[#allocation2 + $0x460] sm:$0xff]  ;;  %v1633_v43 = vsub.f32 %v1151_v31, %v1311_v37  ;;  %v1312_v7 = vld [vmem:[%s3770_s12 + $0x258] sm:$0xff] }
 0x179   : > { %v1469_v34 = vld [vmem:[#allocation2 + $0x288] sm:$0xff]  ;;  %v1632_v36 = vsub.f32 %v1150_v20, %v1310_v30  ;;  %2317 = vst [vmem:[#allocation2 + $0x80] sm:$0xff] %v2157_v21  ;;  %v1791_v42 = vand.u32 2147483647, %v1631_v27  ;;  %v1153_v18 = vld [vmem:[%s3768_s24 + $0x260] sm:$0xff]  ;;  %v2160_v44 = vadd.f32 %v2000_v32, %v1468_v24  ;;  %v2002_v45 = vmul.f32 %v3960_v28, %v1790_v11  ;;  %v1471_v46 = vld [vmem:[#allocation2 + $0x4b0] sm:$0xff] }
 0x17a   : > { %2318 = vst [vmem:[#allocation2 + $0x400] sm:$0xff] %v2158_v16  ;;  %v1634_v49 = vsub.f32 %v1152_v38, %v1312_v7  ;;  %v1313_v50 = vld [vmem:[%s3770_s12 + $0x260] sm:$0xff]  ;;  %v1154_v51 = vld [vmem:[%s3768_s24 + $0x268] sm:$0xff]  ;;  %2319 = vst [vmem:[#allocation2 + $0x228] sm:$0xff] %v2159_v39  ;;  %v2161_v52 = vadd.f32 %v2001_v40, %v1469_v34  ;;  %v1793_v55 = vand.u32 2147483647, %v1633_v43 }
 0x17b   : > { %v1792_v48 = vand.u32 2147483647, %v1632_v36  ;;  %v2003_v53 = vmul.f32 %v3963_v29, %v1791_v42  ;;  %v1472_v54 = vld [vmem:[#allocation2 + $0x1d8] sm:$0xff]  ;;  %v1635_v56 = vsub.f32 %v1153_v18, %v1313_v50  ;;  %v1314_v57 = vld [vmem:[%s3770_s12 + $0x268] sm:$0xff]  ;;  %v1155_v58 = vld [vmem:[%s3768_s24 + $0x270] sm:$0xff]  ;;  %2320 = vst [vmem:[#allocation2 + $0x348] sm:$0xff] %v2160_v44  ;;  %v2162_v59 = vadd.f32 %v2002_v45, %v1470_v41 }
 0x17c   : > { %v1473_v61 = vld [vmem:[#allocation2 + $0x200] sm:$0xff]  ;;  %v1794_v63 = vand.u32 2147483647, %v1634_v49  ;;  %v1636_v0 = vsub.f32 %v1154_v51, %v1314_v57  ;;  %v1315_v1 = vld [vmem:[%s3770_s12 + $0x270] sm:$0xff]  ;;  %v1156_v2 = vld [vmem:[%s3768_s24 + $0x278] sm:$0xff]  ;;  %2321 = vst [vmem:[#allocation2 + $0x288] sm:$0xff] %v2161_v52  ;;  %v2005_v4 = vmul.f32 %v3979_v47, %v1793_v55 }
 0x17d   : > { %v2004_v60 = vmul.f32 %v3968_v35, %v1792_v48  ;;  %v2163_v3 = vadd.f32 %v2003_v53, %v1471_v46  ;;  %v1474_v5 = vld [vmem:[#allocation2 + $0x50] sm:$0xff]  ;;  %v1795_v6 = vand.u32 2147483647, %v1635_v56  ;;  %v1637_v8 = vsub.f32 %v1155_v58, %v1315_v1  ;;  %v1316_v9 = vld [vmem:[%s3770_s12 + $0x278] sm:$0xff]  ;;  %v1157_v10 = vld [vmem:[%s3768_s24 + $0x280] sm:$0xff]  ;;  %2322 = vst [vmem:[#allocation2 + $0x460] sm:$0xff] %v2162_v59 }
 0x17e   : > { %v2006_v14 = vmul.f32 %v3988_v62, %v1794_v63  ;;  %v1475_v17 = vld [vmem:[#allocation2 + $0x1b0] sm:$0xff]  ;;  %v1796_v19 = vand.u32 2147483647, %v1636_v0  ;;  %v1638_v20 = vsub.f32 %v1156_v2, %v1316_v9  ;;  %v1317_v21 = vld [vmem:[%s3770_s12 + $0x280] sm:$0xff]  ;;  %v1158_v23 = vld [vmem:[%s3768_s24 + $0x288] sm:$0xff]  ;;  %v2165_v24 = vadd.f32 %v2005_v4, %v1473_v61 }
 0x17f   : > { %v2164_v12 = vadd.f32 %v2004_v60, %v1472_v54  ;;  %2323 = vst [vmem:[#allocation2 + $0x4b0] sm:$0xff] %v2163_v3  ;;  %v2007_v25 = vmul.f32 %v3998_v13, %v1795_v6  ;;  %v1476_v27 = vld [vmem:[#allocation2 + $0x150] sm:$0xff]  ;;  %v1797_v30 = vand.u32 2147483647, %v1637_v8  ;;  %v1639_v31 = vsub.f32 %v1157_v10, %v1317_v21  ;;  %v1318_v16 = vld [vmem:[%s3770_s12 + $0x288] sm:$0xff]  ;;  %v1160_v40 = vld [vmem:[%s3768_s24 + $0x298] sm:$0xff] }
 0x180   : > { %v1159_v32 = vld [vmem:[%s3768_s24 + $0x290] sm:$0xff]  ;;  %v2166_v34 = vadd.f32 %v2006_v14, %v1474_v5  ;;  %v2008_v11 = vmul.f32 %v4008_v22, %v1796_v19  ;;  %v1477_v36 = vld [vmem:[#allocation2 + $0x4e8] sm:$0xff]  ;;  %v1798_v37 = vand.u32 2147483647, %v1638_v20  ;;  %v1640_v38 = vsub.f32 %v1158_v23, %v1318_v16  ;;  %2325 = vst [vmem:[#allocation2 + $0x200] sm:$0xff] %v2165_v24  ;;  %v1320_v44 = vld [vmem:[%s3770_s12 + $0x298] sm:$0xff] }
 0x181   : > { %2324 = vst [vmem:[#allocation2 + $0x1d8] sm:$0xff] %v2164_v12  ;;  %v1319_v39 = vld [vmem:[%s3770_s12 + $0x290] sm:$0xff]  ;;  %v2167_v41 = vadd.f32 %v2007_v25, %v1475_v17  ;;  %v2009_v42 = vmul.f32 %v4002_v15, %v1797_v30  ;;  %v1799_v7 = vand.u32 2147483647, %v1639_v31  ;;  %v1161_v45 = vld [vmem:[%s3768_s24 + $0x2a0] sm:$0xff]  ;;  %v1479_v49 = vld [vmem:[#allocation2 + $0x418] sm:$0xff]  ;;  %v1642_v51 = vsub.f32 %v1160_v40, %v1320_v44 }
 0x182   : > { %v1478_v43 = vld [vmem:[#allocation2 + $0x190] sm:$0xff]  ;;  %v1641_v18 = vsub.f32 %v1159_v32, %v1319_v39  ;;  %2326 = vst [vmem:[#allocation2 + $0x50] sm:$0xff] %v2166_v34  ;;  %v2168_v46 = vadd.f32 %v2008_v11, %v1476_v27  ;;  %v2010_v48 = vmul.f32 %v4015_v33, %v1798_v37  ;;  %v1800_v50 = vand.u32 2147483647, %v1640_v38  ;;  %v1321_v52 = vld [vmem:[%s3770_s12 + $0x2a0] sm:$0xff]  ;;  %v1162_v53 = vld [vmem:[%s3768_s24 + $0x2a8] sm:$0xff] }
 0x183   : > { %2327 = vst [vmem:[#allocation2 + $0x1b0] sm:$0xff] %v2167_v41  ;;  %v2169_v54 = vadd.f32 %v2009_v42, %v1477_v36  ;;  %v2011_v55 = vmul.f32 %v3955_v26, %v1799_v7  ;;  %v1480_v56 = vld [vmem:[#allocation2 + $0x338] sm:$0xff]  ;;  %v1643_v58 = vsub.f32 %v1161_v45, %v1321_v52  ;;  %v1322_v59 = vld [vmem:[%s3770_s12 + $0x2a8] sm:$0xff]  ;;  %v1163_v60 = vld [vmem:[%s3768_s24 + $0x2b0] sm:$0xff]  ;;  %v1802_v1 = vand.u32 2147483647, %v1642_v51 }
 0x184   : > { %v1801_v57 = vand.u32 2147483647, %v1641_v18  ;;  %2328 = vst [vmem:[#allocation2 + $0x150] sm:$0xff] %v2168_v46  ;;  %v2170_v61 = vadd.f32 %v2010_v48, %v1478_v43  ;;  %v2012_v63 = vmul.f32 %v3960_v28, %v1800_v50  ;;  %v1481_v0 = vld [vmem:[#allocation2 + $0x358] sm:$0xff]  ;;  %v1644_v2 = vsub.f32 %v1162_v53, %v1322_v59  ;;  %v1323_v3 = vld [vmem:[%s3770_s12 + $0x2b0] sm:$0xff]  ;;  %v1165_v14 = vld [vmem:[%s3768_s24 + $0x2c0] sm:$0xff] }
 0x185   : > { %v1164_v4 = vld [vmem:[%s3768_s24 + $0x2b8] sm:$0xff]  ;;  %2329 = vst [vmem:[#allocation2 + $0x4e8] sm:$0xff] %v2169_v54  ;;  %v2171_v5 = vadd.f32 %v2011_v55, %v1479_v49  ;;  %v1803_v9 = vand.u32 2147483647, %v1643_v58  ;;  %v1645_v10 = vsub.f32 %v1163_v60, %v1323_v3  ;;  %v2014_v19 = vmul.f32 %v3968_v35, %v1802_v1  ;;  %v1483_v20 = vld [vmem:[#allocation2 + $0x88] sm:$0xff]  ;;  %v1325_v24 = vld [vmem:[%s3770_s12 + $0x2c0] sm:$0xff] }
 0x186   : > { %v2013_v6 = vmul.f32 %v3963_v29, %v1801_v57  ;;  %v1482_v8 = vld [vmem:[#allocation2 + $0x158] sm:$0xff]  ;;  %2330 = vst [vmem:[#allocation2 + $0x190] sm:$0xff] %v2170_v61  ;;  %v2172_v17 = vadd.f32 %v2012_v63, %v1480_v56  ;;  %v1804_v21 = vand.u32 2147483647, %v1644_v2  ;;  %v1166_v25 = vld [vmem:[%s3768_s24 + $0x2c8] sm:$0xff]  ;;  %v1647_v32 = vsub.f32 %v1165_v14, %v1325_v24  ;;  %v1167_v11 = vld [vmem:[%s3768_s24 + $0x2d0] sm:$0xff] }
 0x187   : > { %v1324_v12 = vld [vmem:[%s3770_s12 + $0x2b8] sm:$0xff]  ;;  %2331 = vst [vmem:[#allocation2 + $0x418] sm:$0xff] %v2171_v5  ;;  %v2015_v30 = vmul.f32 %v3979_v47, %v1803_v9  ;;  %v1484_v31 = vld [vmem:[#allocation2 + $0x448] sm:$0xff]  ;;  %v1805_v16 = vand.u32 2147483647, %v1645_v10  ;;  %v2174_v36 = vadd.f32 %v2014_v19, %v1482_v8  ;;  %v1485_v38 = vld [vmem:[#allocation2] sm:$0xff] }
 0x188   : > { %v1646_v23 = vsub.f32 %v1164_v4, %v1324_v12  ;;  %v2173_v27 = vadd.f32 %v2013_v6, %v1481_v0  ;;  %v1326_v34 = vld [vmem:[%s3770_s12 + $0x2c8] sm:$0xff]  ;;  %2332 = vst [vmem:[#allocation2 + $0x338] sm:$0xff] %v2172_v17  ;;  %v2016_v37 = vmul.f32 %v3988_v62, %v1804_v21  ;;  %v1327_v41 = vld [vmem:[%s3770_s12 + $0x2d0] sm:$0xff]  ;;  %v1168_v42 = vld [vmem:[%s3768_s24 + $0x2d8] sm:$0xff]  ;;  %v1807_v44 = vand.u32 2147483647, %v1647_v32 }
 0x189   : > { %v1648_v40 = vsub.f32 %v1166_v25, %v1326_v34  ;;  %v2175_v43 = vadd.f32 %v2015_v30, %v1483_v20  ;;  %v2017_v7 = vmul.f32 %v3998_v13, %v1805_v16  ;;  %v1486_v18 = vld [vmem:[#allocation2 + $0x2d0] sm:$0xff]  ;;  %v1649_v45 = vsub.f32 %v1167_v11, %v1327_v41  ;;  %v1328_v46 = vld [vmem:[%s3770_s12 + $0x2d8] sm:$0xff]  ;;  %v1169_v48 = vld [vmem:[%s3768_s24 + $0x2e0] sm:$0xff]  ;;  %2334 = vst [vmem:[#allocation2 + $0x158] sm:$0xff] %v2174_v36 }
 0x18a   : > { %v1806_v39 = vand.u32 2147483647, %v1646_v23  ;;  %2333 = vst [vmem:[#allocation2 + $0x358] sm:$0xff] %v2173_v27  ;;  %v2176_v49 = vadd.f32 %v2016_v37, %v1484_v31  ;;  %v1487_v51 = vld [vmem:[#allocation2 + $0x278] sm:$0xff]  ;;  %v1650_v53 = vsub.f32 %v1168_v42, %v1328_v46  ;;  %v1329_v54 = vld [vmem:[%s3770_s12 + $0x2e0] sm:$0xff]  ;;  %v1170_v55 = vld [vmem:[%s3768_s24 + $0x2e8] sm:$0xff]  ;;  %v2019_v57 = vmul.f32 %v4002_v15, %v1807_v44 }
 0x18b   : > { %v1808_v52 = vand.u32 2147483647, %v1648_v40  ;;  %2335 = vst [vmem:[#allocation2 + $0x88] sm:$0xff] %v2175_v43  ;;  %v2177_v56 = vadd.f32 %v2017_v7, %v1485_v38  ;;  %v1488_v58 = vld [vmem:[#allocation2 + $0x478] sm:$0xff]  ;;  %v1809_v59 = vand.u32 2147483647, %v1649_v45  ;;  %v1651_v60 = vsub.f32 %v1169_v48, %v1329_v54 }
 0x18c   : > { %v2018_v50 = vmul.f32 %v4008_v22, %v1806_v39  ;;  %v1330_v61 = vld [vmem:[%s3770_s12 + $0x2e8] sm:$0xff]  ;;  %v1171_v63 = vld [vmem:[%s3768_s24 + $0x2f0] sm:$0xff]  ;;  %2336 = vst [vmem:[#allocation2 + $0x448] sm:$0xff] %v2176_v49  ;;  %v1810_v3 = vand.u32 2147483647, %v1650_v53  ;;  %v1172_v6 = vld [vmem:[%s3768_s24 + $0x2f8] sm:$0xff]  ;;  %v2179_v8 = vadd.f32 %v2019_v57, %v1487_v51 }
 0x18d   : > { %v2020_v1 = vmul.f32 %v4015_v33, %v1808_v52  ;;  %v1489_v2 = vld [vmem:[#allocation2 + $0x90] sm:$0xff]  ;;  %v1652_v4 = vsub.f32 %v1170_v55, %v1330_v61  ;;  %2337 = vst [vmem:[#allocation2] sm:$0xff] %v2177_v56  ;;  %v2021_v9 = vmul.f32 %v3955_v26, %v1809_v59  ;;  %v1490_v10 = vld [vmem:[#allocation2 + $0x138] sm:$0xff]  ;;  %v1811_v12 = vand.u32 2147483647, %v1651_v60  ;;  %v1173_v19 = vld [vmem:[%s3768_s24 + $0x300] sm:$0xff] }
 0x18e   : > { %v2178_v0 = vadd.f32 %v2018_v50, %v1486_v18  ;;  %v1331_v5 = vld [vmem:[%s3770_s12 + $0x2f0] sm:$0xff]  ;;  %v1332_v17 = vld [vmem:[%s3770_s12 + $0x2f8] sm:$0xff]  ;;  %v2022_v21 = vmul.f32 %v3960_v28, %v1810_v3  ;;  %v1333_v27 = vld [vmem:[%s3770_s12 + $0x300] sm:$0xff]  ;;  %2339 = vst [vmem:[#allocation2 + $0x278] sm:$0xff] %v2179_v8 }
 0x18f   : > { %v1653_v14 = vsub.f32 %v1171_v63, %v1331_v5  ;;  %v2180_v20 = vadd.f32 %v2020_v1, %v1488_v58  ;;  %v1491_v23 = vld [vmem:[#allocation2 + $0x438] sm:$0xff]  ;;  %v1812_v24 = vand.u32 2147483647, %v1652_v4  ;;  %v1654_v25 = vsub.f32 %v1172_v6, %v1332_v17  ;;  %v1174_v30 = vld [vmem:[%s3768_s24 + $0x308] sm:$0xff]  ;;  %v1175_v37 = vld [vmem:[%s3768_s24 + $0x310] sm:$0xff] }
 0x190   : > { %2338 = vst [vmem:[#allocation2 + $0x2d0] sm:$0xff] %v2178_v0  ;;  %v2181_v31 = vadd.f32 %v2021_v9, %v1489_v2  ;;  %v2023_v16 = vmul.f32 %v3963_v29, %v1811_v12  ;;  %v1492_v32 = vld [vmem:[#allocation2 + $0x2c8] sm:$0xff]  ;;  %v1655_v11 = vsub.f32 %v1173_v19, %v1333_v27  ;;  %v2182_v38 = vadd.f32 %v2022_v21, %v1490_v10  ;;  %v1493_v40 = vld [vmem:[#allocation2 + $0x3e0] sm:$0xff]  ;;  %v1335_v43 = vld [vmem:[%s3770_s12 + $0x310] sm:$0xff] }
 0x191   : > { %v1813_v34 = vand.u32 2147483647, %v1653_v14  ;;  %v1334_v36 = vld [vmem:[%s3770_s12 + $0x308] sm:$0xff]  ;;  %2340 = vst [vmem:[#allocation2 + $0x478] sm:$0xff] %v2180_v20  ;;  %v2024_v39 = vmul.f32 %v3968_v35, %v1812_v24  ;;  %v1814_v41 = vand.u32 2147483647, %v1654_v25  ;;  %v1657_v48 = vsub.f32 %v1175_v37, %v1335_v43 }
 0x192   : > { %v1656_v42 = vsub.f32 %v1174_v30, %v1334_v36  ;;  %v1176_v7 = vld [vmem:[%s3768_s24 + $0x318] sm:$0xff]  ;;  %2341 = vst [vmem:[#allocation2 + $0x90] sm:$0xff] %v2181_v31  ;;  %v2183_v18 = vadd.f32 %v2023_v16, %v1491_v23  ;;  %v1494_v45 = vld [vmem:[#allocation2 + $0x130] sm:$0xff]  ;;  %v1815_v46 = vand.u32 2147483647, %v1655_v11  ;;  %v1177_v50 = vld [vmem:[%s3768_s24 + $0x320] sm:$0xff] }
 0x193   : > { %v2025_v44 = vmul.f32 %v3979_v47, %v1813_v34  ;;  %v1336_v49 = vld [vmem:[%s3770_s12 + $0x318] sm:$0xff]  ;;  %2342 = vst [vmem:[#allocation2 + $0x138] sm:$0xff] %v2182_v38  ;;  %v2184_v51 = vadd.f32 %v2024_v39, %v1492_v32  ;;  %v2026_v52 = vmul.f32 %v3988_v62, %v1814_v41  ;;  %v1337_v56 = vld [vmem:[%s3770_s12 + $0x320] sm:$0xff]  ;;  %v1178_v57 = vld [vmem:[%s3768_s24 + $0x328] sm:$0xff]  ;;  %v1817_v61 = vand.u32 2147483647, %v1657_v48 }
 0x194   : > { %v1495_v53 = vld [vmem:[#allocation2 + $0x298] sm:$0xff]  ;;  %v1816_v54 = vand.u32 2147483647, %v1656_v42  ;;  %v1658_v55 = vsub.f32 %v1176_v7, %v1336_v49  ;;  %2343 = vst [vmem:[#allocation2 + $0x438] sm:$0xff] %v2183_v18  ;;  %v2027_v59 = vmul.f32 %v3998_v13, %v1815_v46  ;;  %v1659_v63 = vsub.f32 %v1177_v50, %v1337_v56  ;;  %v1338_v0 = vld [vmem:[%s3770_s12 + $0x328] sm:$0xff]  ;;  %v1179_v1 = vld [vmem:[%s3768_s24 + $0x330] sm:$0xff] }
 0x195   : > { %v2185_v58 = vadd.f32 %v2025_v44, %v1493_v40  ;;  %v1496_v60 = vld [vmem:[#allocation2 + $0x2f8] sm:$0xff]  ;;  %2344 = vst [vmem:[#allocation2 + $0x2c8] sm:$0xff] %v2184_v51  ;;  %v2186_v2 = vadd.f32 %v2026_v52, %v1494_v45  ;;  %v1497_v4 = vld [vmem:[#allocation2 + $0x68] sm:$0xff]  ;;  %v1660_v6 = vsub.f32 %v1178_v57, %v1338_v0  ;;  %v1339_v8 = vld [vmem:[%s3770_s12 + $0x330] sm:$0xff]  ;;  %v2029_v12 = vmul.f32 %v4002_v15, %v1817_v61 }
 0x196   : > { %v2028_v3 = vmul.f32 %v4008_v22, %v1816_v54  ;;  %v1818_v5 = vand.u32 2147483647, %v1658_v55  ;;  %v1180_v9 = vld [vmem:[%s3768_s24 + $0x338] sm:$0xff]  ;;  %v2187_v10 = vadd.f32 %v2027_v59, %v1495_v53  ;;  %v1498_v14 = vld [vmem:[#allocation2 + $0x3c0] sm:$0xff]  ;;  %v1819_v17 = vand.u32 2147483647, %v1659_v63 }
 0x197   : > { %2345 = vst [vmem:[#allocation2 + $0x3e0] sm:$0xff] %v2185_v58  ;;  %v1661_v19 = vsub.f32 %v1179_v1, %v1339_v8  ;;  %v1340_v20 = vld [vmem:[%s3770_s12 + $0x338] sm:$0xff]  ;;  %v1181_v21 = vld [vmem:[%s3768_s24 + $0x340] sm:$0xff]  ;;  %2346 = vst [vmem:[#allocation2 + $0x130] sm:$0xff] %v2186_v2  ;;  %v1820_v27 = vand.u32 2147483647, %v1660_v6  ;;  %v2189_v32 = vadd.f32 %v2029_v12, %v1497_v4 }
 0x198   : > { %v2188_v23 = vadd.f32 %v2028_v3, %v1496_v60  ;;  %v2030_v24 = vmul.f32 %v4015_v33, %v1818_v5  ;;  %v1499_v25 = vld [vmem:[#allocation2 + $0x368] sm:$0xff]  ;;  %v1662_v30 = vsub.f32 %v1180_v9, %v1340_v20  ;;  %v1341_v31 = vld [vmem:[%s3770_s12 + $0x340] sm:$0xff]  ;;  %2347 = vst [vmem:[#allocation2 + $0x298] sm:$0xff] %v2187_v10  ;;  %v2031_v34 = vmul.f32 %v3955_v26, %v1819_v17  ;;  %v1183_v39 = vld [vmem:[%s3768_s24 + $0x350] sm:$0xff] }
 0x199   : > { %v1182_v16 = vld [vmem:[%s3768_s24 + $0x348] sm:$0xff]  ;;  %v1500_v11 = vld [vmem:[#allocation2 + $0x2e0] sm:$0xff]  ;;  %v1821_v36 = vand.u32 2147483647, %v1661_v19  ;;  %v1663_v37 = vsub.f32 %v1181_v21, %v1341_v31  ;;  %v2032_v41 = vmul.f32 %v3960_v28, %v1820_v27  ;;  %v1343_v18 = vld [vmem:[%s3770_s12 + $0x350] sm:$0xff]  ;;  %2349 = vst [vmem:[#allocation2 + $0x68] sm:$0xff] %v2189_v32 }
 0x19a   : > { %v1342_v38 = vld [vmem:[%s3770_s12 + $0x348] sm:$0xff]  ;;  %2348 = vst [vmem:[#allocation2 + $0x2f8] sm:$0xff] %v2188_v23  ;;  %v2190_v40 = vadd.f32 %v2030_v24, %v1498_v14  ;;  %v1822_v43 = vand.u32 2147483647, %v1662_v30  ;;  %v1184_v44 = vld [vmem:[%s3768_s24 + $0x358] sm:$0xff]  ;;  %v2191_v45 = vadd.f32 %v2031_v34, %v1499_v25  ;;  %v1665_v50 = vsub.f32 %v1183_v39, %v1343_v18  ;;  %v1185_v52 = vld [vmem:[%s3768_s24 + $0x360] sm:$0xff] }
 0x19b   : > { %v1501_v42 = vld [vmem:[#allocation2 + $0x3a8] sm:$0xff]  ;;  %v1664_v7 = vsub.f32 %v1182_v16, %v1342_v38  ;;  %v2033_v46 = vmul.f32 %v3963_v29, %v1821_v36  ;;  %v1823_v49 = vand.u32 2147483647, %v1663_v37  ;;  %v1344_v51 = vld [vmem:[%s3770_s12 + $0x358] sm:$0xff]  ;;  %v2192_v53 = vadd.f32 %v2032_v41, %v1500_v11  ;;  %v1345_v58 = vld [vmem:[%s3770_s12 + $0x360] sm:$0xff] }
 0x19c   : > { %v1502_v48 = vld [vmem:[#allocation2 + $0x1c8] sm:$0xff]  ;;  %2350 = vst [vmem:[#allocation2 + $0x3c0] sm:$0xff] %v2190_v40  ;;  %v2034_v54 = vmul.f32 %v3968_v35, %v1822_v43  ;;  %v1503_v55 = vld [vmem:[#allocation2 + $0x3d8] sm:$0xff]  ;;  %v1666_v57 = vsub.f32 %v1184_v44, %v1344_v51  ;;  %2351 = vst [vmem:[#allocation2 + $0x368] sm:$0xff] %v2191_v45  ;;  %v1825_v0 = vand.u32 2147483647, %v1665_v50  ;;  %v1667_v1 = vsub.f32 %v1185_v52, %v1345_v58 }
 0x19d   : > { %v1824_v56 = vand.u32 2147483647, %v1664_v7  ;;  %v1186_v59 = vld [vmem:[%s3768_s24 + $0x368] sm:$0xff]  ;;  %v2193_v60 = vadd.f32 %v2033_v46, %v1501_v42  ;;  %v2035_v61 = vmul.f32 %v3979_v47, %v1823_v49  ;;  %v1187_v3 = vld [vmem:[%s3768_s24 + $0x370] sm:$0xff]  ;;  %2352 = vst [vmem:[#allocation2 + $0x2e0] sm:$0xff] %v2192_v53  ;;  %v1188_v12 = vld [vmem:[%s3768_s24 + $0x378] sm:$0xff] }
 0x19e   : > { %v1504_v63 = vld [vmem:[#allocation2 + $0x408] sm:$0xff]  ;;  %v2194_v4 = vadd.f32 %v2034_v54, %v1502_v48  ;;  %v1826_v8 = vand.u32 2147483647, %v1666_v57  ;;  %v1347_v10 = vld [vmem:[%s3770_s12 + $0x370] sm:$0xff]  ;;  %v2037_v17 = vmul.f32 %v3998_v13, %v1825_v0  ;;  %v1506_v19 = vld [vmem:[#allocation2 + $0x98] sm:$0xff] }
 0x19f   : > { %v1346_v2 = vld [vmem:[%s3770_s12 + $0x368] sm:$0xff]  ;;  %v2036_v5 = vmul.f32 %v3988_v62, %v1824_v56  ;;  %2353 = vst [vmem:[#allocation2 + $0x3a8] sm:$0xff] %v2193_v60  ;;  %v2195_v14 = vadd.f32 %v2035_v61, %v1503_v55  ;;  %v1827_v20 = vand.u32 2147483647, %v1667_v1  ;;  %v1669_v21 = vsub.f32 %v1187_v3, %v1347_v10  ;;  %v1348_v23 = vld [vmem:[%s3770_s12 + $0x378] sm:$0xff]  ;;  %v1189_v24 = vld [vmem:[%s3768_s24 + $0x380] sm:$0xff] }
 0x1a0   : > { %v1505_v6 = vld [vmem:[#allocation2 + $0xe8] sm:$0xff]  ;;  %v1668_v9 = vsub.f32 %v1186_v59, %v1346_v2  ;;  %2354 = vst [vmem:[#allocation2 + $0x1c8] sm:$0xff] %v2194_v4  ;;  %v2038_v27 = vmul.f32 %v4008_v22, %v1826_v8  ;;  %v1507_v30 = vld [vmem:[#allocation2 + $0x410] sm:$0xff]  ;;  %v1670_v16 = vsub.f32 %v1188_v12, %v1348_v23  ;;  %v1349_v32 = vld [vmem:[%s3770_s12 + $0x380] sm:$0xff] }
 0x1a1   : > { %v2196_v25 = vadd.f32 %v2036_v5, %v1504_v63  ;;  %v1190_v34 = vld [vmem:[%s3768_s24 + $0x388] sm:$0xff]  ;;  %2355 = vst [vmem:[#allocation2 + $0x3d8] sm:$0xff] %v2195_v14  ;;  %v2197_v11 = vadd.f32 %v2037_v17, %v1505_v6  ;;  %v2039_v36 = vmul.f32 %v4002_v15, %v1827_v20  ;;  %v1829_v38 = vand.u32 2147483647, %v1669_v21  ;;  %v1191_v41 = vld [vmem:[%s3768_s24 + $0x390] sm:$0xff]  ;;  %v1509_v7 = vld [vmem:[#allocation2 + $0x420] sm:$0xff] }
 0x1a2   : > { %v1828_v31 = vand.u32 2147483647, %v1668_v9  ;;  %v1508_v37 = vld [vmem:[#allocation2 + $0xc8] sm:$0xff]  ;;  %v1671_v39 = vsub.f32 %v1189_v24, %v1349_v32  ;;  %v2198_v42 = vadd.f32 %v2038_v27, %v1506_v19  ;;  %v1830_v18 = vand.u32 2147483647, %v1670_v16  ;;  %v1351_v45 = vld [vmem:[%s3770_s12 + $0x390] sm:$0xff] }
 0x1a3   : > { %v1350_v40 = vld [vmem:[%s3770_s12 + $0x388] sm:$0xff]  ;;  %2356 = vst [vmem:[#allocation2 + $0x408] sm:$0xff] %v2196_v25  ;;  %v1192_v46 = vld [vmem:[%s3768_s24 + $0x398] sm:$0xff]  ;;  %2357 = vst [vmem:[#allocation2 + $0xe8] sm:$0xff] %v2197_v11  ;;  %v2199_v48 = vadd.f32 %v2039_v36, %v1507_v30  ;;  %v2041_v49 = vmul.f32 %v3955_v26, %v1829_v38  ;;  %v1673_v52 = vsub.f32 %v1191_v41, %v1351_v45 }
 0x1a4   : > { %v2040_v43 = vmul.f32 %v4015_v33, %v1828_v31  ;;  %v1672_v44 = vsub.f32 %v1190_v34, %v1350_v40  ;;  %v1510_v50 = vld [vmem:[#allocation2 + $0x28] sm:$0xff]  ;;  %v1831_v51 = vand.u32 2147483647, %v1671_v39  ;;  %v1352_v53 = vld [vmem:[%s3770_s12 + $0x398] sm:$0xff]  ;;  %v1193_v54 = vld [vmem:[%s3768_s24 + $0x3a0] sm:$0xff]  ;;  %2358 = vst [vmem:[#allocation2 + $0x98] sm:$0xff] %v2198_v42  ;;  %v2042_v56 = vmul.f32 %v3960_v28, %v1830_v18 }
 0x1a5   : > { %v1511_v57 = vld [vmem:[#allocation2 + $0x290] sm:$0xff]  ;;  %v1674_v59 = vsub.f32 %v1192_v46, %v1352_v53  ;;  %v1353_v60 = vld [vmem:[%s3770_s12 + $0x3a0] sm:$0xff]  ;;  %v1194_v61 = vld [vmem:[%s3768_s24 + $0x3a8] sm:$0xff]  ;;  %2359 = vst [vmem:[#allocation2 + $0x410] sm:$0xff] %v2199_v48  ;;  %v2201_v63 = vadd.f32 %v2041_v49, %v1509_v7  ;;  %v1833_v2 = vand.u32 2147483647, %v1673_v52 }
 0x1a6   : > { %v2200_v55 = vadd.f32 %v2040_v43, %v1508_v37  ;;  %v1832_v58 = vand.u32 2147483647, %v1672_v44  ;;  %v2043_v0 = vmul.f32 %v3963_v29, %v1831_v51  ;;  %v1512_v1 = vld [vmem:[#allocation2 + $0x330] sm:$0xff]  ;;  %v1675_v3 = vsub.f32 %v1193_v54, %v1353_v60  ;;  %v1354_v4 = vld [vmem:[%s3770_s12 + $0x3a8] sm:$0xff]  ;;  %v1513_v9 = vld [vmem:[#allocation2 + $0x118] sm:$0xff] }
 0x1a7   : > { %v1195_v5 = vld [vmem:[%s3768_s24 + $0x3b0] sm:$0xff]  ;;  %v2202_v6 = vadd.f32 %v2042_v56, %v1510_v50  ;;  %v1834_v10 = vand.u32 2147483647, %v1674_v59  ;;  %v1676_v12 = vsub.f32 %v1194_v61, %v1354_v4  ;;  %v1196_v17 = vld [vmem:[%s3768_s24 + $0x3b8] sm:$0xff]  ;;  %2361 = vst [vmem:[#allocation2 + $0x420] sm:$0xff] %v2201_v63  ;;  %v2045_v20 = vmul.f32 %v3979_v47, %v1833_v2  ;;  %v1197_v27 = vld [vmem:[%s3768_s24 + $0x3c0] sm:$0xff] }
 0x1a8   : > { %2360 = vst [vmem:[#allocation2 + $0xc8] sm:$0xff] %v2200_v55  ;;  %v2044_v8 = vmul.f32 %v3968_v35, %v1832_v58  ;;  %v1355_v14 = vld [vmem:[%s3770_s12 + $0x3b0] sm:$0xff]  ;;  %v2203_v19 = vadd.f32 %v2043_v0, %v1511_v57  ;;  %v1835_v23 = vand.u32 2147483647, %v1675_v3  ;;  %v1356_v25 = vld [vmem:[%s3770_s12 + $0x3b8] sm:$0xff]  ;;  %v1515_v16 = vld [vmem:[#allocation2 + $0x4c8] sm:$0xff] }
 0x1a9   : > { %v1514_v21 = vld [vmem:[#allocation2 + $0x490] sm:$0xff]  ;;  %v1677_v24 = vsub.f32 %v1195_v5, %v1355_v14  ;;  %2362 = vst [vmem:[#allocation2 + $0x28] sm:$0xff] %v2202_v6  ;;  %v2046_v31 = vmul.f32 %v3988_v62, %v1834_v10  ;;  %v1836_v32 = vand.u32 2147483647, %v1676_v12  ;;  %v1678_v34 = vsub.f32 %v1196_v17, %v1356_v25  ;;  %v1357_v11 = vld [vmem:[%s3770_s12 + $0x3c0] sm:$0xff]  ;;  %v1198_v36 = vld [vmem:[%s3768_s24 + $0x3c8] sm:$0xff] }
 0x1aa   : > { %v2204_v30 = vadd.f32 %v2044_v8, %v1512_v1  ;;  %2363 = vst [vmem:[#allocation2 + $0x290] sm:$0xff] %v2203_v19  ;;  %v2205_v37 = vadd.f32 %v2045_v20, %v1513_v9  ;;  %v2047_v38 = vmul.f32 %v3998_v13, %v1835_v23  ;;  %v1516_v39 = vld [vmem:[#allocation2 + $0x120] sm:$0xff]  ;;  %v1679_v41 = vsub.f32 %v1197_v27, %v1357_v11  ;;  %v1358_v42 = vld [vmem:[%s3770_s12 + $0x3c8] sm:$0xff]  ;;  %v1199_v43 = vld [vmem:[%s3768_s24 + $0x3d0] sm:$0xff] }
 0x1ab   : > { %v1837_v40 = vand.u32 2147483647, %v1677_v24  ;;  %v2206_v7 = vadd.f32 %v2046_v31, %v1514_v21  ;;  %v2048_v18 = vmul.f32 %v4008_v22, %v1836_v32  ;;  %v1517_v44 = vld [vmem:[#allocation2 + $0x1d0] sm:$0xff]  ;;  %v1838_v45 = vand.u32 2147483647, %v1678_v34  ;;  %v1200_v49 = vld [vmem:[%s3768_s24 + $0x3d8] sm:$0xff] }
 0x1ac   : > { %2364 = vst [vmem:[#allocation2 + $0x330] sm:$0xff] %v2204_v30  ;;  %v1680_v46 = vsub.f32 %v1198_v36, %v1358_v42  ;;  %v1359_v48 = vld [vmem:[%s3770_s12 + $0x3d0] sm:$0xff]  ;;  %2365 = vst [vmem:[#allocation2 + $0x118] sm:$0xff] %v2205_v37  ;;  %v2207_v50 = vadd.f32 %v2047_v38, %v1515_v16  ;;  %v1518_v52 = vld [vmem:[#allocation2 + $0x208] sm:$0xff]  ;;  %v1839_v53 = vand.u32 2147483647, %v1679_v41 }
 0x1ad   : > { %v2049_v51 = vmul.f32 %v4002_v15, %v1837_v40  ;;  %v1681_v54 = vsub.f32 %v1199_v43, %v1359_v48  ;;  %v1360_v55 = vld [vmem:[%s3770_s12 + $0x3d8] sm:$0xff]  ;;  %v1201_v56 = vld [vmem:[%s3768_s24 + $0x3e0] sm:$0xff]  ;;  %2366 = vst [vmem:[#allocation2 + $0x490] sm:$0xff] %v2206_v7  ;;  %v2208_v57 = vadd.f32 %v2048_v18, %v1516_v39  ;;  %v2050_v58 = vmul.f32 %v4015_v33, %v1838_v45  ;;  %v1519_v59 = vld [vmem:[#allocation2 + $0xa8] sm:$0xff] }
 0x1ae   : > { %v1840_v60 = vand.u32 2147483647, %v1680_v46  ;;  %v1682_v61 = vsub.f32 %v1200_v49, %v1360_v55  ;;  %v1361_v63 = vld [vmem:[%s3770_s12 + $0x3e0] sm:$0xff]  ;;  %v1202_v0 = vld [vmem:[%s3768_s24 + $0x3e8] sm:$0xff]  ;;  %2367 = vst [vmem:[#allocation2 + $0x4c8] sm:$0xff] %v2207_v50  ;;  %v2051_v2 = vmul.f32 %v3955_v26, %v1839_v53  ;;  %v1203_v8 = vld [vmem:[%s3768_s24 + $0x3f0] sm:$0xff] }
 0x1af   : > { %v2209_v1 = vadd.f32 %v2049_v51, %v1517_v44  ;;  %v1520_v3 = vld [vmem:[#allocation2 + $0x428] sm:$0xff]  ;;  %v1841_v4 = vand.u32 2147483647, %v1681_v54  ;;  %v1683_v5 = vsub.f32 %v1201_v56, %v1361_v63  ;;  %2368 = vst [vmem:[#allocation2 + $0x120] sm:$0xff] %v2208_v57  ;;  %v2210_v9 = vadd.f32 %v2050_v58, %v1518_v52  ;;  %v1363_v19 = vld [vmem:[%s3770_s12 + $0x3f0] sm:$0xff]  ;;  %v1204_v20 = vld [vmem:[%s3768_s24 + $0x3f8] sm:$0xff] }
 0x1b0   : > { %v1362_v6 = vld [vmem:[%s3770_s12 + $0x3e8] sm:$0xff]  ;;  %v2052_v10 = vmul.f32 %v3960_v28, %v1840_v60  ;;  %v1842_v14 = vand.u32 2147483647, %v1682_v61  ;;  %v2211_v21 = vadd.f32 %v2051_v2, %v1519_v59  ;;  %v1522_v24 = vld [vmem:[#allocation2 + $0x180] sm:$0xff]  ;;  %v1685_v27 = vsub.f32 %v1203_v8, %v1363_v19  ;;  %v1364_v30 = vld [vmem:[%s3770_s12 + $0x3f8] sm:$0xff] }
 0x1b1   : > { %v1521_v12 = vld [vmem:[#allocation2 + $0x268] sm:$0xff]  ;;  %v1684_v17 = vsub.f32 %v1202_v0, %v1362_v6  ;;  %2369 = vst [vmem:[#allocation2 + $0x1d0] sm:$0xff] %v2209_v1  ;;  %v2053_v23 = vmul.f32 %v3963_v29, %v1841_v4  ;;  %v1843_v25 = vand.u32 2147483647, %v1683_v5  ;;  %v1205_v31 = vld [vmem:[%s3768_s24 + $0x400] sm:$0xff]  ;;  %2370 = vst [vmem:[#allocation2 + $0x208] sm:$0xff] %v2210_v9  ;;  %v1686_v36 = vsub.f32 %v1204_v20, %v1364_v30 }
 0x1b2   : > { %v2212_v16 = vadd.f32 %v2052_v10, %v1520_v3  ;;  %v2054_v32 = vmul.f32 %v3968_v35, %v1842_v14  ;;  %v1523_v34 = vld [vmem:[#allocation2 + $0x4b8] sm:$0xff]  ;;  %v1365_v37 = vld [vmem:[%s3770_s12 + $0x400] sm:$0xff]  ;;  %v1206_v38 = vld [vmem:[%s3768_s24 + $0x408] sm:$0xff]  ;;  %2371 = vst [vmem:[#allocation2 + $0xa8] sm:$0xff] %v2211_v21  ;;  %v1845_v42 = vand.u32 2147483647, %v1685_v27 }
 0x1b3   : > { %v1844_v11 = vand.u32 2147483647, %v1684_v17  ;;  %v2213_v39 = vadd.f32 %v2053_v23, %v1521_v12  ;;  %v2055_v40 = vmul.f32 %v3979_v47, %v1843_v25  ;;  %v1524_v41 = vld [vmem:[#allocation2 + $0x178] sm:$0xff]  ;;  %v1687_v43 = vsub.f32 %v1205_v31, %v1365_v37  ;;  %v1366_v7 = vld [vmem:[%s3770_s12 + $0x408] sm:$0xff]  ;;  %v1207_v18 = vld [vmem:[%s3768_s24 + $0x410] sm:$0xff] }
 0x1b4   : > { %2372 = vst [vmem:[#allocation2 + $0x428] sm:$0xff] %v2212_v16  ;;  %v2214_v44 = vadd.f32 %v2054_v32, %v1522_v24  ;;  %v1525_v46 = vld [vmem:[#allocation2 + $0x1e8] sm:$0xff]  ;;  %v1846_v48 = vand.u32 2147483647, %v1686_v36  ;;  %v1688_v49 = vsub.f32 %v1206_v38, %v1366_v7  ;;  %v1367_v50 = vld [vmem:[%s3770_s12 + $0x410] sm:$0xff]  ;;  %v1208_v51 = vld [vmem:[%s3768_s24 + $0x418] sm:$0xff]  ;;  %v2057_v53 = vmul.f32 %v3998_v13, %v1845_v42 }
 0x1b5   : > { %v2056_v45 = vmul.f32 %v3988_v62, %v1844_v11  ;;  %2373 = vst [vmem:[#allocation2 + $0x268] sm:$0xff] %v2213_v39  ;;  %v2215_v52 = vadd.f32 %v2055_v40, %v1523_v34  ;;  %v1526_v54 = vld [vmem:[#allocation2 + $0x2f0] sm:$0xff]  ;;  %v1847_v55 = vand.u32 2147483647, %v1687_v43  ;;  %v1689_v56 = vsub.f32 %v1207_v18, %v1367_v50  ;;  %v1368_v57 = vld [vmem:[%s3770_s12 + $0x418] sm:$0xff]  ;;  %v1209_v58 = vld [vmem:[%s3768_s24 + $0x420] sm:$0xff] }
 0x1b6   : > { %2374 = vst [vmem:[#allocation2 + $0x180] sm:$0xff] %v2214_v44  ;;  %v2058_v60 = vmul.f32 %v4008_v22, %v1846_v48  ;;  %v1527_v61 = vld [vmem:[#allocation2 + $0x3f0] sm:$0xff]  ;;  %v1848_v63 = vand.u32 2147483647, %v1688_v49  ;;  %v1690_v0 = vsub.f32 %v1208_v51, %v1368_v57  ;;  %v1369_v1 = vld [vmem:[%s3770_s12 + $0x420] sm:$0xff]  ;;  %v1210_v2 = vld [vmem:[%s3768_s24 + $0x428] sm:$0xff]  ;;  %v2217_v3 = vadd.f32 %v2057_v53, %v1525_v46 }
 0x1b7   : > { %v2216_v59 = vadd.f32 %v2056_v45, %v1524_v41  ;;  %2375 = vst [vmem:[#allocation2 + $0x4b8] sm:$0xff] %v2215_v52  ;;  %v2059_v4 = vmul.f32 %v4002_v15, %v1847_v55  ;;  %v1528_v5 = vld [vmem:[#allocation2 + $0x170] sm:$0xff]  ;;  %v1849_v6 = vand.u32 2147483647, %v1689_v56  ;;  %v1691_v8 = vsub.f32 %v1209_v58, %v1369_v1  ;;  %v1370_v9 = vld [vmem:[%s3770_s12 + $0x428] sm:$0xff]  ;;  %v1529_v17 = vld [vmem:[#allocation2 + $0x198] sm:$0xff] }
 0x1b8   : > { %v1211_v10 = vld [vmem:[%s3768_s24 + $0x430] sm:$0xff]  ;;  %v2218_v12 = vadd.f32 %v2058_v60, %v1526_v54  ;;  %v2060_v14 = vmul.f32 %v4015_v33, %v1848_v63  ;;  %v1850_v19 = vand.u32 2147483647, %v1690_v0  ;;  %v1692_v20 = vsub.f32 %v1210_v2, %v1370_v9  ;;  %v1212_v23 = vld [vmem:[%s3768_s24 + $0x438] sm:$0xff]  ;;  %2377 = vst [vmem:[#allocation2 + $0x1e8] sm:$0xff] %v2217_v3  ;;  %v1213_v32 = vld [vmem:[%s3768_s24 + $0x440] sm:$0xff] }
 0x1b9   : > { %2376 = vst [vmem:[#allocation2 + $0x178] sm:$0xff] %v2216_v59  ;;  %v1371_v21 = vld [vmem:[%s3770_s12 + $0x430] sm:$0xff]  ;;  %v2219_v24 = vadd.f32 %v2059_v4, %v1527_v61  ;;  %v2061_v25 = vmul.f32 %v3955_v26, %v1849_v6  ;;  %v1530_v27 = vld [vmem:[#allocation2 + $0x1b8] sm:$0xff]  ;;  %v1851_v30 = vand.u32 2147483647, %v1691_v8  ;;  %v1373_v39 = vld [vmem:[%s3770_s12 + $0x440] sm:$0xff] }
 0x1ba   : > { %v1693_v31 = vsub.f32 %v1211_v10, %v1371_v21  ;;  %v1372_v16 = vld [vmem:[%s3770_s12 + $0x438] sm:$0xff]  ;;  %2378 = vst [vmem:[#allocation2 + $0x2f0] sm:$0xff] %v2218_v12  ;;  %v2220_v34 = vadd.f32 %v2060_v14, %v1528_v5  ;;  %v2062_v11 = vmul.f32 %v3960_v28, %v1850_v19  ;;  %v1531_v36 = vld [vmem:[#allocation2 + $0xf0] sm:$0xff]  ;;  %v1852_v37 = vand.u32 2147483647, %v1692_v20  ;;  %v1214_v40 = vld [vmem:[%s3768_s24 + $0x448] sm:$0xff] }
 0x1bb   : > { %v1694_v38 = vsub.f32 %v1212_v23, %v1372_v16  ;;  %2379 = vst [vmem:[#allocation2 + $0x3f0] sm:$0xff] %v2219_v24  ;;  %v2221_v41 = vadd.f32 %v2061_v25, %v1529_v17  ;;  %v2063_v42 = vmul.f32 %v3963_v29, %v1851_v30  ;;  %v1532_v43 = vld [vmem:[#allocation2 + $0x238] sm:$0xff]  ;;  %v1695_v18 = vsub.f32 %v1213_v32, %v1373_v39  ;;  %v1374_v44 = vld [vmem:[%s3770_s12 + $0x448] sm:$0xff]  ;;  %v1215_v45 = vld [vmem:[%s3768_s24 + $0x450] sm:$0xff] }
 0x1bc   : > { %v1853_v7 = vand.u32 2147483647, %v1693_v31  ;;  %2380 = vst [vmem:[#allocation2 + $0x170] sm:$0xff] %v2220_v34  ;;  %v2222_v46 = vadd.f32 %v2062_v11, %v1530_v27  ;;  %v2064_v48 = vmul.f32 %v3968_v35, %v1852_v37  ;;  %v1533_v49 = vld [vmem:[#allocation2 + $0x248] sm:$0xff]  ;;  %v1696_v51 = vsub.f32 %v1214_v40, %v1374_v44  ;;  %v1375_v52 = vld [vmem:[%s3770_s12 + $0x450] sm:$0xff]  ;;  %v1216_v53 = vld [vmem:[%s3768_s24 + $0x458] sm:$0xff] }
 0x1bd   : > { %v1854_v50 = vand.u32 2147483647, %v1694_v38  ;;  %2381 = vst [vmem:[#allocation2 + $0x198] sm:$0xff] %v2221_v41  ;;  %v2223_v54 = vadd.f32 %v2063_v42, %v1531_v36  ;;  %v1534_v56 = vld [vmem:[#allocation2 + $0x4d0] sm:$0xff]  ;;  %v1855_v57 = vand.u32 2147483647, %v1695_v18  ;;  %v1697_v58 = vsub.f32 %v1215_v45, %v1375_v52 }
 0x1be   : > { %v2065_v55 = vmul.f32 %v3979_v47, %v1853_v7  ;;  %v1376_v59 = vld [vmem:[%s3770_s12 + $0x458] sm:$0xff]  ;;  %v1217_v60 = vld [vmem:[%s3768_s24 + $0x460] sm:$0xff]  ;;  %2382 = vst [vmem:[#allocation2 + $0x1b8] sm:$0xff] %v2222_v46  ;;  %v2224_v61 = vadd.f32 %v2064_v48, %v1532_v43  ;;  %v1856_v1 = vand.u32 2147483647, %v1696_v51  ;;  %v1218_v4 = vld [vmem:[%s3768_s24 + $0x468] sm:$0xff] }
 0x1bf   : > { %v2066_v63 = vmul.f32 %v3988_v62, %v1854_v50  ;;  %v1535_v0 = vld [vmem:[#allocation2 + $0x498] sm:$0xff]  ;;  %v1698_v2 = vsub.f32 %v1216_v53, %v1376_v59  ;;  %v1377_v3 = vld [vmem:[%s3770_s12 + $0x460] sm:$0xff]  ;;  %2383 = vst [vmem:[#allocation2 + $0xf0] sm:$0xff] %v2223_v54  ;;  %v2067_v6 = vmul.f32 %v3998_v13, %v1855_v57  ;;  %v1857_v9 = vand.u32 2147483647, %v1697_v58  ;;  %v1378_v12 = vld [vmem:[%s3770_s12 + $0x468] sm:$0xff] }
 0x1c0   : > { %v2225_v5 = vadd.f32 %v2065_v55, %v1533_v49  ;;  %v1536_v8 = vld [vmem:[#allocation2 + $0x240] sm:$0xff]  ;;  %v1699_v10 = vsub.f32 %v1217_v60, %v1377_v3  ;;  %v1219_v14 = vld [vmem:[%s3768_s24 + $0x470] sm:$0xff]  ;;  %2384 = vst [vmem:[#allocation2 + $0x238] sm:$0xff] %v2224_v61  ;;  %v2068_v19 = vmul.f32 %v4008_v22, %v1856_v1  ;;  %v1700_v23 = vsub.f32 %v1218_v4, %v1378_v12  ;;  %v1220_v25 = vld [vmem:[%s3768_s24 + $0x478] sm:$0xff] }
 0x1c1   : > { %v2226_v17 = vadd.f32 %v2066_v63, %v1534_v56  ;;  %v1537_v20 = vld [vmem:[#allocation2 + $0x100] sm:$0xff]  ;;  %v1858_v21 = vand.u32 2147483647, %v1698_v2  ;;  %v1379_v24 = vld [vmem:[%s3770_s12 + $0x470] sm:$0xff]  ;;  %v2227_v27 = vadd.f32 %v2067_v6, %v1535_v0  ;;  %v2069_v30 = vmul.f32 %v4002_v15, %v1857_v9  ;;  %v1538_v31 = vld [vmem:[#allocation2 + $0x2d8] sm:$0xff] }
 0x1c2   : > { %2385 = vst [vmem:[#allocation2 + $0x248] sm:$0xff] %v2225_v5  ;;  %v1859_v16 = vand.u32 2147483647, %v1699_v10  ;;  %v1701_v32 = vsub.f32 %v1219_v14, %v1379_v24  ;;  %v1380_v34 = vld [vmem:[%s3770_s12 + $0x478] sm:$0xff]  ;;  %v1221_v11 = vld [vmem:[%s3768_s24 + $0x480] sm:$0xff]  ;;  %v2228_v36 = vadd.f32 %v2068_v19, %v1536_v8  ;;  %v1222_v42 = vld [vmem:[%s3768_s24 + $0x488] sm:$0xff] }
 0x1c3   : > { %2386 = vst [vmem:[#allocation2 + $0x4d0] sm:$0xff] %v2226_v17  ;;  %v2070_v37 = vmul.f32 %v4015_v33, %v1858_v21  ;;  %v1539_v38 = vld [vmem:[#allocation2 + $0x4e0] sm:$0xff]  ;;  %v1860_v39 = vand.u32 2147483647, %v1700_v23  ;;  %v1702_v40 = vsub.f32 %v1220_v25, %v1380_v34  ;;  %2387 = vst [vmem:[#allocation2 + $0x498] sm:$0xff] %v2227_v27  ;;  %v2229_v43 = vadd.f32 %v2069_v30, %v1537_v20  ;;  %v1540_v18 = vld [vmem:[#allocation2 + $0x30] sm:$0xff] }
 0x1c4   : > { %v1381_v41 = vld [vmem:[%s3770_s12 + $0x480] sm:$0xff]  ;;  %v2071_v7 = vmul.f32 %v3955_v26, %v1859_v16  ;;  %v1861_v44 = vand.u32 2147483647, %v1701_v32  ;;  %v1382_v46 = vld [vmem:[%s3770_s12 + $0x488] sm:$0xff]  ;;  %v1223_v48 = vld [vmem:[%s3768_s24 + $0x490] sm:$0xff]  ;;  %2388 = vst [vmem:[#allocation2 + $0x240] sm:$0xff] %v2228_v36 }
 0x1c5   : > { %v1703_v45 = vsub.f32 %v1221_v11, %v1381_v41  ;;  %v2230_v49 = vadd.f32 %v2070_v37, %v1538_v31  ;;  %v2072_v50 = vmul.f32 %v3960_v28, %v1860_v39  ;;  %v1541_v51 = vld [vmem:[#allocation2 + $0x2b8] sm:$0xff]  ;;  %v1862_v52 = vand.u32 2147483647, %v1702_v40  ;;  %v1383_v54 = vld [vmem:[%s3770_s12 + $0x490] sm:$0xff]  ;;  %2389 = vst [vmem:[#allocation2 + $0x100] sm:$0xff] %v2229_v43  ;;  %v1542_v58 = vld [vmem:[#allocation2 + $0x1c0] sm:$0xff] }
 0x1c6   : > { %v1704_v53 = vsub.f32 %v1222_v42, %v1382_v46  ;;  %v1224_v55 = vld [vmem:[%s3768_s24 + $0x498] sm:$0xff]  ;;  %v2231_v56 = vadd.f32 %v2071_v7, %v1539_v38  ;;  %v2073_v57 = vmul.f32 %v3963_v29, %v1861_v44  ;;  %v1705_v60 = vsub.f32 %v1223_v48, %v1383_v54  ;;  %v1225_v63 = vld [vmem:[%s3768_s24 + $0x4a0] sm:$0xff]  ;;  %v1543_v2 = vld [vmem:[#allocation2 + $0x468] sm:$0xff] }
 0x1c7   : > { %v1863_v59 = vand.u32 2147483647, %v1703_v45  ;;  %v1384_v61 = vld [vmem:[%s3770_s12 + $0x498] sm:$0xff]  ;;  %2390 = vst [vmem:[#allocation2 + $0x2d8] sm:$0xff] %v2230_v49  ;;  %v2232_v0 = vadd.f32 %v2072_v50, %v1540_v18  ;;  %v2074_v1 = vmul.f32 %v3968_v35, %v1862_v52  ;;  %v1385_v5 = vld [vmem:[%s3770_s12 + $0x4a0] sm:$0xff]  ;;  %v1226_v6 = vld [vmem:[%s3768_s24 + $0x4a8] sm:$0xff] }
 0x1c8   : > { %v1864_v3 = vand.u32 2147483647, %v1704_v53  ;;  %v1706_v4 = vsub.f32 %v1224_v55, %v1384_v61  ;;  %2391 = vst [vmem:[#allocation2 + $0x4e0] sm:$0xff] %v2231_v56  ;;  %v2233_v8 = vadd.f32 %v2073_v57, %v1541_v51  ;;  %v1544_v10 = vld [vmem:[#allocation2 + $0xe0] sm:$0xff]  ;;  %v1865_v12 = vand.u32 2147483647, %v1705_v60 }
 0x1c9   : > { %v2075_v9 = vmul.f32 %v3979_v47, %v1863_v59  ;;  %v1707_v14 = vsub.f32 %v1225_v63, %v1385_v5  ;;  %v1386_v17 = vld [vmem:[%s3770_s12 + $0x4a8] sm:$0xff]  ;;  %v1227_v19 = vld [vmem:[%s3768_s24 + $0x4b0] sm:$0xff]  ;;  %2392 = vst [vmem:[#allocation2 + $0x30] sm:$0xff] %v2232_v0  ;;  %v2234_v20 = vadd.f32 %v2074_v1, %v1542_v58  ;;  %v1545_v23 = vld [vmem:[#allocation2 + $0x58] sm:$0xff] }
 0x1ca   : > { %v2076_v21 = vmul.f32 %v3988_v62, %v1864_v3  ;;  %v1866_v24 = vand.u32 2147483647, %v1706_v4  ;;  %v1708_v25 = vsub.f32 %v1226_v6, %v1386_v17  ;;  %v1387_v27 = vld [vmem:[%s3770_s12 + $0x4b0] sm:$0xff]  ;;  %v1228_v30 = vld [vmem:[%s3768_s24 + $0x4b8] sm:$0xff]  ;;  %2393 = vst [vmem:[#allocation2 + $0x2b8] sm:$0xff] %v2233_v8  ;;  %v2077_v16 = vmul.f32 %v3998_v13, %v1865_v12  ;;  %v1229_v37 = vld [vmem:[%s3768_s24 + $0x4c0] sm:$0xff] }
 0x1cb   : > { %v2235_v31 = vadd.f32 %v2075_v9, %v1543_v2  ;;  %v1546_v32 = vld [vmem:[#allocation2 + $0x3d0] sm:$0xff]  ;;  %v1867_v34 = vand.u32 2147483647, %v1707_v14  ;;  %v1709_v11 = vsub.f32 %v1227_v19, %v1387_v27  ;;  %v1388_v36 = vld [vmem:[%s3770_s12 + $0x4b8] sm:$0xff]  ;;  %2394 = vst [vmem:[#allocation2 + $0x1c0] sm:$0xff] %v2234_v20  ;;  %v1547_v40 = vld [vmem:[#allocation2 + $0x340] sm:$0xff] }
 0x1cc   : > { %v2236_v38 = vadd.f32 %v2076_v21, %v1544_v10  ;;  %v2078_v39 = vmul.f32 %v4008_v22, %v1866_v24  ;;  %v1868_v41 = vand.u32 2147483647, %v1708_v25  ;;  %v1710_v42 = vsub.f32 %v1228_v30, %v1388_v36  ;;  %v1389_v43 = vld [vmem:[%s3770_s12 + $0x4c0] sm:$0xff]  ;;  %v1230_v7 = vld [vmem:[%s3768_s24 + $0x4c8] sm:$0xff]  ;;  %v1231_v50 = vld [vmem:[%s3768_s24 + $0x4d0] sm:$0xff] }
 0x1cd   : > { %2395 = vst [vmem:[#allocation2 + $0x468] sm:$0xff] %v2235_v31  ;;  %v2237_v18 = vadd.f32 %v2077_v16, %v1545_v23  ;;  %v2079_v44 = vmul.f32 %v4002_v15, %v1867_v34  ;;  %v1548_v45 = vld [vmem:[#allocation2 + $0x3e8] sm:$0xff]  ;;  %v1869_v46 = vand.u32 2147483647, %v1709_v11  ;;  %v1711_v48 = vsub.f32 %v1229_v37, %v1389_v43  ;;  %v1391_v56 = vld [vmem:[%s3770_s12 + $0x4d0] sm:$0xff]  ;;  %v1232_v57 = vld [vmem:[%s3768_s24 + $0x4d8] sm:$0xff] }
 0x1ce   : > { %v1390_v49 = vld [vmem:[%s3770_s12 + $0x4c8] sm:$0xff]  ;;  %2396 = vst [vmem:[#allocation2 + $0xe0] sm:$0xff] %v2236_v38  ;;  %v2238_v51 = vadd.f32 %v2078_v39, %v1546_v32  ;;  %v2080_v52 = vmul.f32 %v4015_v33, %v1868_v41  ;;  %v1870_v54 = vand.u32 2147483647, %v1710_v42  ;;  %v1550_v60 = vld [vmem:[#allocation2 + $0x470] sm:$0xff]  ;;  %v1713_v63 = vsub.f32 %v1231_v50, %v1391_v56  ;;  %v1392_v0 = vld [vmem:[%s3770_s12 + $0x4d8] sm:$0xff] }
 0x1cf   : > { %v1549_v53 = vld [vmem:[#allocation2 + $0x128] sm:$0xff]  ;;  %v1712_v55 = vsub.f32 %v1230_v7, %v1390_v49  ;;  %2397 = vst [vmem:[#allocation2 + $0x58] sm:$0xff] %v2237_v18  ;;  %v2239_v58 = vadd.f32 %v2079_v44, %v1547_v40  ;;  %v2081_v59 = vmul.f32 %v3955_v26, %v1869_v46  ;;  %v1871_v61 = vand.u32 2147483647, %v1711_v48  ;;  %v1233_v1 = vld [vmem:[%s3768_s24 + $0x4e0] sm:$0xff]  ;;  %v1552_v12 = vld [vmem:[#allocation2 + $0xd0] sm:$0xff] }
 0x1d0   : > { %2398 = vst [vmem:[#allocation2 + $0x3d0] sm:$0xff] %v2238_v51  ;;  %v2240_v2 = vadd.f32 %v2080_v52, %v1548_v45  ;;  %v2082_v3 = vmul.f32 %v3960_v28, %v1870_v54  ;;  %v1551_v4 = vld [vmem:[#allocation2 + $0x148] sm:$0xff]  ;;  %v1714_v6 = vsub.f32 %v1232_v57, %v1392_v0  ;;  %v1393_v8 = vld [vmem:[%s3770_s12 + $0x4e0] sm:$0xff]  ;;  %v1873_v14 = vand.u32 2147483647, %v1713_v63  ;;  %v1235_v20 = vld [vmem:[%s3768_s24 + $0x4f0] sm:$0xff] }
 0x1d1   : > { %v1872_v5 = vand.u32 2147483647, %v1712_v55  ;;  %v1234_v9 = vld [vmem:[%s3768_s24 + $0x4e8] sm:$0xff]  ;;  %2399 = vst [vmem:[#allocation2 + $0x340] sm:$0xff] %v2239_v58  ;;  %v2241_v26 = vadd.f32 %v2081_v59, %v1549_v53  ;;  %v2083_v10 = vmul.f32 %v3963_v29, %v1871_v61  ;;  %v1715_v17 = vsub.f32 %v1233_v1, %v1393_v8  ;;  %v1553_v23 = vld [vmem:[#allocation2 + $0x230] sm:$0xff]  ;;  %v1236_v30 = vld [vmem:[%s3768_s24 + $0x4f8] sm:$0xff] }
 0x1d2   : > { %v1394_v19 = vld [vmem:[%s3770_s12 + $0x4e8] sm:$0xff]  ;;  %2400 = vst [vmem:[#allocation2 + $0x3e8] sm:$0xff] %v2240_v2  ;;  %v2242_v21 = vadd.f32 %v2082_v3, %v1550_v60  ;;  %v1874_v24 = vand.u32 2147483647, %v1714_v6  ;;  %v1395_v27 = vld [vmem:[%s3770_s12 + $0x4f0] sm:$0xff]  ;;  %v2085_v16 = vmul.f32 %v3979_v47, %v1873_v14  ;;  %v1396_v11 = vld [vmem:[%s3770_s12 + $0x4f8] sm:$0xff] }
 0x1d3   : > { %v2084_v28 = vmul.f32 %v3968_v35, %v1872_v5  ;;  %v1716_v25 = vsub.f32 %v1234_v9, %v1394_v19  ;;  %2401 = vst [vmem:[#allocation2 + $0x128] sm:$0xff] %v2241_v26  ;;  %v2243_v31 = vadd.f32 %v2083_v10, %v1551_v4  ;;  %v1554_v29 = vld [vmem:[#allocation2 + $0x430] sm:$0xff]  ;;  %v1875_v32 = vand.u32 2147483647, %v1715_v17  ;;  %v1556_v42 = vld [vmem:[#allocation2 + $0xc0] sm:$0xff] }
 0x1d4   : > { %v1717_v34 = vsub.f32 %v1235_v20, %v1395_v27  ;;  %2402 = vst [vmem:[#allocation2 + $0x470] sm:$0xff] %v2242_v21  ;;  %v2086_v37 = vmul.f32 %v3988_v62, %v1874_v24  ;;  %v1555_v38 = vld [vmem:[#allocation2 + $0x370] sm:$0xff]  ;;  %v1718_v35 = vsub.f32 %v1236_v30, %v1396_v11  ;;  %v2245_v40 = vadd.f32 %v2085_v16, %v1553_v23  ;;  %v1558_v62 = vld [vmem:[#allocation2 + $0x1a0] sm:$0xff] }
 0x1d5   : > { %v2244_v36 = vadd.f32 %v2084_v28, %v1552_v12  ;;  %v1876_v39 = vand.u32 2147483647, %v1716_v25  ;;  %2403 = vst [vmem:[#allocation2 + $0x148] sm:$0xff] %v2243_v31  ;;  %v2087_v41 = vmul.f32 %v3998_v13, %v1875_v32  ;;  %v1557_v18 = vld [vmem:[#allocation2 + $0x110] sm:$0xff] }
 0x1d6   : > { %v1877_v43 = vand.u32 2147483647, %v1717_v34  ;;  %v2246_v7 = vadd.f32 %v2086_v37, %v1554_v29  ;;  %v1878_v44 = vand.u32 2147483647, %v1718_v35  ;;  %2405 = vst [vmem:[#allocation2 + $0x230] sm:$0xff] %v2245_v40 }
 0x1d7   : > { %2404 = vst [vmem:[#allocation2 + $0xd0] sm:$0xff] %v2244_v36  ;;  %v2088_v47 = vmul.f32 %v4008_v22, %v1876_v39  ;;  %v2247_v45 = vadd.f32 %v2087_v41, %v1555_v38 }
 0x1d8   : > { %v2089_v46 = vmul.f32 %v4002_v15, %v1877_v43  ;;  %2406 = vst [vmem:[#allocation2 + $0x430] sm:$0xff] %v2246_v7  ;;  %v2090_v49 = vmul.f32 %v4015_v33, %v1878_v44  ;;  %2414 = sbr.rel (%p2889_p13) target bundleno = 681 (0x2a9), region = 86 }
 0x1d9   : > { %v2248_v48 = vadd.f32 %v2088_v47, %v1556_v42  ;;  %2407 = vst [vmem:[#allocation2 + $0x370] sm:$0xff] %v2247_v45 }
 0x1da   : > { %v2249_v50 = vadd.f32 %v2089_v46, %v1557_v18  ;;  %v2250_v13 = vadd.f32 %v2090_v49, %v1558_v62 }
 0x1db   : > { %2408 = vst [vmem:[#allocation2 + $0xc0] sm:$0xff] %v2248_v48 }
 0x1dc   : > { %2409 = vst [vmem:[#allocation2 + $0x110] sm:$0xff] %v2249_v50  ;;  %2410 = vst [vmem:[#allocation2 + $0x1a0] sm:$0xff] %v2250_v13 }
 0x1dd   : > { %v2435_v22 = vld [vmem:[#allocation2 + $0xa0] sm:$0xff]  ;;  %v2437_v52 = vld [vmem:[#allocation2 + $0x4f8] sm:$0xff]  ;;  %v2415_v55 = vld [vmem:[#allocation2 + $0x2b0] sm:$0xff]  ;;  %vm2751_vm0 = vcmask 7168  }
 0x1de   : > { %v2436_v51 = vld [vmem:[#allocation2 + $0x360] sm:$0xff]  ;;  %v2416_v56 = vld [vmem:[#allocation2 + $0x3b0] sm:$0xff]  ;;  %v2439_v57 = vld [vmem:[#allocation2 + $0x458] sm:$0xff] }
 0x1df   : > { %v2597_v53 = vadd.f32 %v2436_v51, %v2435_v22  ;;  %v2438_v54 = vld [vmem:[#allocation2 + $0x380] sm:$0xff]  ;;  %v2417_v58 = vld [vmem:[#allocation2 + $0x4d8] sm:$0xff]  ;;  %v2575_v33 = vadd.f32 %v2416_v56, %v2415_v55  ;;  %v2445_v0 = vld [vmem:[#allocation2 + $0x1a8] sm:$0xff] }
 0x1e0   : > { %v2418_v60 = vld [vmem:[#allocation2 + $0x18] sm:$0xff]  ;;  %v2440_v61 = vld [vmem:[#allocation2 + $0x4a0] sm:$0xff]  ;;  %v2419_v2 = vld [vmem:[#allocation2 + $0x450] sm:$0xff] }
 0x1e1   : > { %v2598_v15 = vadd.f32 %v2597_v53, %v2437_v52  ;;  %v2576_v63 = vadd.f32 %v2575_v33, %v2417_v58  ;;  %v2446_v3 = vld [vmem:[#allocation2 + $0x2a0] sm:$0xff]  ;;  %v2447_v4 = vld [vmem:[#allocation2 + $0x38] sm:$0xff]  ;;  %v2441_v5 = vld [vmem:[#allocation2 + $0x390] sm:$0xff] }
 0x1e2   : > { %v2608_v8 = vadd.f32 %v2446_v3, %v2445_v0  ;;  %v2442_v9 = vld [vmem:[#allocation2 + $0xb8] sm:$0xff]  ;;  %v2420_v10 = vld [vmem:[#allocation2 + $0x328] sm:$0xff]  ;;  %v2425_v19 = vld [vmem:[#allocation2 + $0x310] sm:$0xff] }
 0x1e3   : > { %v2599_v59 = vadd.f32 %v2598_v15, %v2438_v54  ;;  %v2577_v6 = vadd.f32 %v2576_v63, %v2418_v60  ;;  %v2448_v12 = vld [vmem:[#allocation2 + $0x3f8] sm:$0xff]  ;;  %v2426_v20 = vld [vmem:[#allocation2 + $0x4f0] sm:$0xff]  ;;  %v2427_v21 = vld [vmem:[#allocation2 + $0x308] sm:$0xff] }
 0x1e4   : > { %v2609_v17 = vadd.f32 %v2608_v8, %v2447_v4  ;;  %v2443_v28 = vld [vmem:[#allocation2 + $0x270] sm:$0xff]  ;;  %v2421_v24 = vld [vmem:[#allocation2 + $0x440] sm:$0xff]  ;;  %v2586_v27 = vadd.f32 %v2426_v20, %v2425_v19  ;;  %v2422_v31 = vld [vmem:[#allocation2 + $0x378] sm:$0xff] }
 0x1e5   : > { %v2600_v1 = vadd.f32 %v2599_v59, %v2439_v57  ;;  %v2578_v14 = vadd.f32 %v2577_v6, %v2419_v2  ;;  %v2449_v25 = vld [vmem:[#allocation2 + $0xb0] sm:$0xff]  ;;  %v2444_v30 = vld [vmem:[#allocation2 + $0x480] sm:$0xff]  ;;  %v2428_v32 = vld [vmem:[#allocation2 + $0x2a8] sm:$0xff] }
 0x1e6   : > { %v2610_v29 = vadd.f32 %v2609_v17, %v2448_v12  ;;  %v2450_v11 = vld [vmem:[#allocation2 + $0x320] sm:$0xff]  ;;  %v2587_v36 = vadd.f32 %v2586_v27, %v2427_v21  ;;  %v2465_v37 = vld [vmem:[#allocation2 + $0x10] sm:$0xff]  ;;  %v2466_v38 = vld [vmem:[#allocation2 + $0x1f8] sm:$0xff] }
 0x1e7   : > { %v2601_v26 = vadd.f32 %v2600_v1, %v2440_v61  ;;  %v2579_v16 = vadd.f32 %v2578_v14, %v2420_v10  ;;  %v2423_v39 = vld [vmem:[#allocation2 + $0x108] sm:$0xff]  ;;  %v2429_v41 = vld [vmem:[#allocation2 + $0x398] sm:$0xff]  ;;  %v2630_v43 = vadd.f32 %v2466_v38, %v2465_v37  ;;  %v2452_v62 = vld [vmem:[#allocation2 + $0x210] sm:$0xff] }
 0x1e8   : > { %v2611_v40 = vadd.f32 %v2610_v29, %v2449_v25  ;;  %v2467_v42 = vld [vmem:[#allocation2 + $0x2e8] sm:$0xff]  ;;  %v2588_v44 = vadd.f32 %v2587_v36, %v2428_v32  ;;  %v2468_v45 = vld [vmem:[#allocation2 + $0x258] sm:$0xff]  ;;  %v2430_v49 = vld [vmem:[#allocation2 + $0x60] sm:$0xff] }
 0x1e9   : > { %v2602_v23 = vadd.f32 %v2601_v26, %v2441_v5  ;;  %v2580_v35 = vadd.f32 %v2579_v16, %v2421_v24  ;;  %v2424_v47 = vld [vmem:[#allocation2 + $0x488] sm:$0xff]  ;;  %v2631_v50 = vadd.f32 %v2630_v43, %v2467_v42  ;;  %v2469_v52 = vld [vmem:[#allocation2 + $0x260] sm:$0xff]  ;;  %v2457_v54 = vld [vmem:[#allocation2 + $0x3b8] sm:$0xff] }
 0x1ea   : > { %v2451_v18 = vld [vmem:[#allocation2 + $0x188] sm:$0xff]  ;;  %v2612_v48 = vadd.f32 %v2611_v40, %v2450_v11  ;;  %v2589_v51 = vadd.f32 %v2588_v44, %v2429_v41  ;;  %v2456_v53 = vld [vmem:[#allocation2 + $0x280] sm:$0xff]  ;;  %v2453_v55 = vld [vmem:[#allocation2 + $0x78] sm:$0xff] }
 0x1eb   : > { %v2603_v34 = vadd.f32 %v2602_v23, %v2442_v9  ;;  %v2581_v46 = vadd.f32 %v2580_v35, %v2422_v31  ;;  %v2455_v13 = vld [vmem:[#allocation2 + $0x3c8] sm:$0xff]  ;;  %v2431_v57 = vld [vmem:[#allocation2 + $0xd8] sm:$0xff]  ;;  %v2632_v58 = vadd.f32 %v2631_v50, %v2468_v45  ;;  %v2454_v59 = vld [vmem:[#allocation2 + $0x20] sm:$0xff] }
 0x1ec   : > { %v2613_v56 = vadd.f32 %v2612_v48, %v2451_v18  ;;  %v2619_v33 = vadd.f32 %v2456_v53, %v2455_v13  ;;  %v2432_v60 = vld [vmem:[#allocation2 + $0x388] sm:$0xff]  ;;  %v2590_v61 = vadd.f32 %v2589_v51, %v2430_v49  ;;  %v2470_v63 = vld [vmem:[#allocation2 + $0x2c0] sm:$0xff]  ;;  %v2487_v8 = vld [vmem:[#allocation2 + $0x4b0] sm:$0xff] }
 0x1ed   : > { %v2604_v7 = vadd.f32 %v2603_v34, %v2443_v28  ;;  %v2582_v15 = vadd.f32 %v2581_v46, %v2423_v39  ;;  %v2458_v0 = vld [vmem:[#allocation2 + $0x8] sm:$0xff]  ;;  %v2633_v3 = vadd.f32 %v2632_v58, %v2469_v52  ;;  %v2486_v6 = vld [vmem:[#allocation2 + $0x460] sm:$0xff]  ;;  %v2472_v20 = vld [vmem:[#allocation2 + $0xf8] sm:$0xff] }
 0x1ee   : > { %v2614_v2 = vadd.f32 %v2613_v56, %v2452_v62  ;;  %v2620_v4 = vadd.f32 %v2619_v33, %v2457_v54  ;;  %v2485_v5 = vld [vmem:[#allocation2 + $0x288] sm:$0xff]  ;;  %v2433_v9 = vld [vmem:[#allocation2 + $0x160] sm:$0xff]  ;;  %v2591_v26 = vadd.f32 %v2590_v61, %v2431_v57  ;;  %v2488_v23 = vld [vmem:[#allocation2 + $0x1d8] sm:$0xff] }
 0x1ef   : > { %v2605_v22 = vadd.f32 %v2604_v7, %v2444_v30  ;;  %v2583_v1 = vadd.f32 %v2582_v15, %v2424_v47  ;;  %v2471_v10 = vld [vmem:[#allocation2 + $0x140] sm:$0xff]  ;;  %v2459_v12 = vld [vmem:[#allocation2 + $0x48] sm:$0xff]  ;;  %v2652_v14 = vadd.f32 %v2486_v6, %v2485_v5  ;;  %v2634_v21 = vadd.f32 %v2633_v3, %v2470_v63  ;;  %v2476_v31 = vld [vmem:[#allocation2 + $0x350] sm:$0xff] }
 0x1f0   : > { %v2615_v17 = vadd.f32 %v2614_v2, %v2453_v55  ;;  %v2434_v19 = vld [vmem:[#allocation2 + $0x220] sm:$0xff]  ;;  %v2621_v28 = vadd.f32 %v2620_v4, %v2458_v0  ;;  %v2592_v24 = vadd.f32 %v2591_v26, %v2432_v60  ;;  %v2473_v29 = vld [vmem:[#allocation2 + $0x70] sm:$0xff]  ;;  %v2461_v35 = vld [vmem:[#allocation2 + $0x4a8] sm:$0xff] }
 0x1f1   : > { %2606 = vadd.xlane.f32.xlu1 %v2605_v22  ;;  %2584 = vadd.xlane.f32.xlu0 %v2583_v1  ;;  %v2460_v25 = vld [vmem:[#allocation2 + $0x300] sm:$0xff]  ;;  %v2653_v27 = vadd.f32 %v2652_v14, %v2487_v8  ;;  %v2635_v32 = vadd.f32 %v2634_v21, %v2471_v10  ;;  %v2477_v36 = vld [vmem:[#allocation2 + $0x250] sm:$0xff]  ;;  %v2462_v43 = vld [vmem:[#allocation2 + $0x218] sm:$0xff] }
 0x1f2   : > { %v2475_v30 = vld [vmem:[#allocation2 + $0x40] sm:$0xff]  ;;  %v2616_v16 = vadd.f32 %v2615_v17, %v2454_v59  ;;  %v2622_v34 = vadd.f32 %v2621_v28, %v2459_v12  ;;  %v2593_v38 = vadd.f32 %v2592_v24, %v2433_v9  ;;  %v2490_v47 = vld [vmem:[#allocation2 + $0x50] sm:$0xff]  ;;  %v2479_v62 = vld [vmem:[#allocation2 + $0x318] sm:$0xff] }
 0x1f3   : > { %v2489_v11 = vld [vmem:[#allocation2 + $0x200] sm:$0xff]  ;;  %v2641_v37 = vadd.f32 %v2476_v31, %v2475_v30  ;;  %v2654_v40 = vadd.f32 %v2653_v27, %v2488_v23  ;;  %v2636_v42 = vadd.f32 %v2635_v32, %v2472_v20  ;;  %v2505_v44 = vld [vmem:[#allocation2 + $0x90] sm:$0xff]  ;;  %v2506_v48 = vld [vmem:[#allocation2 + $0x138] sm:$0xff] }
 0x1f4   : > { %v2474_v39 = vld [vmem:[#allocation2 + $0x4c0] sm:$0xff]  ;;  %v2623_v7 = vadd.f32 %v2622_v34, %v2460_v25  ;;  %v2594_v45 = vadd.f32 %v2593_v38, %v2434_v19  ;;  %v2507_v49 = vld [vmem:[#allocation2 + $0x438] sm:$0xff]  ;;  %v2463_v13 = vld [vmem:[#allocation2 + $0x168] sm:$0xff]  ;;  %v2674_v53 = vadd.f32 %v2506_v48, %v2505_v44 }
 0x1f5   : > { %v2478_v41 = vld [vmem:[#allocation2 + $0x1e0] sm:$0xff]  ;;  %2617 = vadd.xlane.f32.xlu1 %v2616_v16  ;;  %v2642_v18 = vadd.f32 %v2641_v37, %v2477_v36  ;;  %v2655_v46 = vadd.f32 %v2654_v40, %v2489_v11  ;;  %v2637_v50 = vadd.f32 %v2636_v42, %v2473_v29  ;;  %v2491_v51 = vld [vmem:[#allocation2 + $0x1b0] sm:$0xff]  ;;  %v2508_v57 = vld [vmem:[#allocation2 + $0x2c8] sm:$0xff] }
 0x1f6   : > { %v2624_v22 = vadd.f32 %v2623_v7, %v2461_v35  ;;  %2595 = vadd.xlane.f32.xlu0 %v2594_v45  ;;  %v2464_v54 = vld [vmem:[#allocation2 + $0x1f0] sm:$0xff]  ;;  %v2480_v56 = vld [vmem:[#allocation2 + $0x3a0] sm:$0xff]  ;;  %v2675_v60 = vadd.f32 %v2674_v53, %v2507_v49  ;;  %v2495_v61 = vld [vmem:[#allocation2 + $0x418] sm:$0xff] }
 0x1f7   : > { %v2643_v52 = vadd.f32 %v2642_v18, %v2478_v41  ;;  %v2492_v15 = vld [vmem:[#allocation2 + $0x150] sm:$0xff]  ;;  %v2656_v55 = vadd.f32 %v2655_v46, %v2490_v47  ;;  %v2638_v58 = vadd.f32 %v2637_v50, %v2474_v39  ;;  %v2496_v63 = vld [vmem:[#allocation2 + $0x338] sm:$0xff]  ;;  %v2493_v1 = vld [vmem:[#allocation2 + $0x4e8] sm:$0xff] }
 0x1f8   : > { %v2625_v33 = vadd.f32 %v2624_v22, %v2462_v43  ;;  %v2497_v0 = vld [vmem:[#allocation2 + $0x358] sm:$0xff]  ;;  %v2481_v3 = vld [vmem:[#allocation2 + $0x80] sm:$0xff]  ;;  %v2663_v5 = vadd.f32 %v2496_v63, %v2495_v61  ;;  %v2494_v8 = vld [vmem:[#allocation2 + $0x190] sm:$0xff]  ;;  %v2676_v10 = vadd.f32 %v2675_v60, %v2508_v57 }
 0x1f9   : > { %v2644_v59 = vadd.f32 %v2643_v52, %v2479_v62  ;;  %v2657_v2 = vadd.f32 %v2656_v55, %v2491_v51  ;;  %v2509_v4 = vld [vmem:[#allocation2 + $0x3e0] sm:$0xff]  ;;  %2639 = vadd.xlane.f32.xlu1 %v2638_v58  ;;  %v2498_v12 = vld [vmem:[#allocation2 + $0x158] sm:$0xff]  ;;  %v2510_v17 = vld [vmem:[#allocation2 + $0x130] sm:$0xff] }
 0x1fa   : > { %v2626_v6 = vadd.f32 %v2625_v33, %v2463_v13  ;;  %v2482_v9 = vld [vmem:[#allocation2 + $0x400] sm:$0xff]  ;;  %v2664_v19 = vadd.f32 %v2663_v5, %v2497_v0  ;;  %v2526_v21 = vld [vmem:[#allocation2 + $0x28] sm:$0xff]  ;;  %v2677_v25 = vadd.f32 %v2676_v10, %v2509_v4  ;;  %v2527_v30 = vld [vmem:[#allocation2 + $0x290] sm:$0xff] }
 0x1fb   : > { %v2645_v26 = vadd.f32 %v2644_v59, %v2480_v56  ;;  %v2658_v14 = vadd.f32 %v2657_v2, %v2492_v15  ;;  %v2525_v20 = vld [vmem:[#allocation2 + $0x420] sm:$0xff]  ;;  %v2483_v23 = vld [vmem:[#allocation2 + $0x228] sm:$0xff]  ;;  %v2511_v32 = vld [vmem:[#allocation2 + $0x298] sm:$0xff] }
 0x1fc   : > { %v2627_v28 = vadd.f32 %v2626_v6, %v2464_v54  ;;  %v2499_v27 = vld [vmem:[#allocation2 + $0x88] sm:$0xff]  ;;  %v2696_v31 = vadd.f32 %v2526_v21, %v2525_v20  ;;  %v2665_v34 = vadd.f32 %v2664_v19, %v2498_v12  ;;  %v2528_v11 = vld [vmem:[#allocation2 + $0x330] sm:$0xff]  ;;  %v2512_v37 = vld [vmem:[#allocation2 + $0x2f8] sm:$0xff]  ;;  %v2678_v38 = vadd.f32 %v2677_v25, %v2510_v17 }
 0x1fd   : > { %v2646_v24 = vadd.f32 %v2645_v26, %v2481_v3  ;;  %v2659_v16 = vadd.f32 %v2658_v14, %v2493_v1  ;;  %v2484_v29 = vld [vmem:[#allocation2 + $0x348] sm:$0xff]  ;;  %v2529_v43 = vld [vmem:[#allocation2 + $0x118] sm:$0xff]  ;;  %v2516_v7 = vld [vmem:[#allocation2 + $0x2e0] sm:$0xff] }
 0x1fe   : > { %2628 = vadd.xlane.f32.xlu0 %v2627_v28  ;;  %v2500_v39 = vld [vmem:[#allocation2 + $0x448] sm:$0xff]  ;;  %v2697_v35 = vadd.f32 %v2696_v31, %v2527_v30  ;;  %v2666_v42 = vadd.f32 %v2665_v34, %v2499_v27  ;;  %v2679_v45 = vadd.f32 %v2678_v38, %v2511_v32  ;;  %v2501_v46 = vld [vmem:[#allocation2] sm:$0xff]  ;;  %v2502_v50 = vld [vmem:[#allocation2 + $0x2d0] sm:$0xff] }
 0x1ff   : > { %v2647_v36 = vadd.f32 %v2646_v24, %v2482_v9  ;;  %v2515_v40 = vld [vmem:[#allocation2 + $0x368] sm:$0xff]  ;;  %v2660_v41 = vadd.f32 %v2659_v16, %v2494_v8  ;;  %v2514_v49 = vld [vmem:[#allocation2 + $0x3c0] sm:$0xff]  ;;  %v2530_v22 = vld [vmem:[#allocation2 + $0x490] sm:$0xff] }
 0x200   : > { %v2517_v47 = vld [vmem:[#allocation2 + $0x3a8] sm:$0xff]  ;;  %v2698_v62 = vadd.f32 %v2697_v35, %v2528_v11  ;;  %v2685_v48 = vadd.f32 %v2516_v7, %v2515_v40  ;;  %v2667_v13 = vadd.f32 %v2666_v42, %v2500_v39  ;;  %v2680_v53 = vadd.f32 %v2679_v45, %v2512_v37  ;;  %v2545_v55 = vld [vmem:[#allocation2 + $0x198] sm:$0xff]  ;;  %v2547_v57 = vld [vmem:[#allocation2 + $0xf0] sm:$0xff] }
 0x201   : > { %v2648_v18 = vadd.f32 %v2647_v36, %v2483_v23  ;;  %v2513_v44 = vld [vmem:[#allocation2 + $0x68] sm:$0xff]  ;;  %2661 = vadd.xlane.f32.xlu1 %v2660_v41  ;;  %v2546_v56 = vld [vmem:[#allocation2 + $0x1b8] sm:$0xff]  ;;  %v2532_v1 = vld [vmem:[#allocation2 + $0x120] sm:$0xff] }
 0x202   : > { %v2518_v51 = vld [vmem:[#allocation2 + $0x1c8] sm:$0xff]  ;;  %v2699_v54 = vadd.f32 %v2698_v62, %v2529_v43  ;;  %v2686_v15 = vadd.f32 %v2685_v48, %v2517_v47  ;;  %v2503_v58 = vld [vmem:[#allocation2 + $0x278] sm:$0xff]  ;;  %v2668_v33 = vadd.f32 %v2667_v13, %v2501_v46  ;;  %v2718_v61 = vadd.f32 %v2546_v56, %v2545_v55  ;;  %v2533_v12 = vld [vmem:[#allocation2 + $0x1d0] sm:$0xff] }
 0x203   : > { %v2649_v52 = vadd.f32 %v2648_v18, %v2484_v29  ;;  %v2531_v59 = vld [vmem:[#allocation2 + $0x4c8] sm:$0xff]  ;;  %v2519_v60 = vld [vmem:[#allocation2 + $0x3d8] sm:$0xff]  ;;  %v2681_v63 = vadd.f32 %v2680_v53, %v2513_v44  ;;  %v2538_v27 = vld [vmem:[#allocation2 + $0x180] sm:$0xff] }
 0x204   : > { %v2504_v0 = vld [vmem:[#allocation2 + $0x478] sm:$0xff]  ;;  %v2700_v2 = vadd.f32 %v2699_v54, %v2530_v22  ;;  %v2687_v3 = vadd.f32 %v2686_v15, %v2518_v51  ;;  %v2669_v5 = vadd.f32 %v2668_v33, %v2502_v50  ;;  %v2520_v6 = vld [vmem:[#allocation2 + $0x408] sm:$0xff]  ;;  %v2719_v8 = vadd.f32 %v2718_v61, %v2547_v57  ;;  %v2550_v29 = vld [vmem:[#allocation2 + $0x4d0] sm:$0xff] }
 0x205   : > { %2650 = vadd.xlane.f32.xlu0 %v2649_v52  ;;  %v2548_v4 = vld [vmem:[#allocation2 + $0x238] sm:$0xff]  ;;  %v2535_v9 = vld [vmem:[#allocation2 + $0xa8] sm:$0xff]  ;;  %v2682_v10 = vadd.f32 %v2681_v63, %v2514_v49  ;;  %v2566_v38 = vld [vmem:[#allocation2 + $0x470] sm:$0xff] }
 0x206   : > { %v2536_v26 = vld [vmem:[#allocation2 + $0x428] sm:$0xff]  ;;  %v2701_v14 = vadd.f32 %v2700_v2, %v2531_v59  ;;  %v2688_v17 = vadd.f32 %v2687_v3, %v2519_v60  ;;  %v2670_v28 = vadd.f32 %v2669_v5, %v2503_v58  ;;  %v2720_v25 = vadd.f32 %v2719_v8, %v2548_v4  ;;  %v2522_v31 = vld [vmem:[#allocation2 + $0x98] sm:$0xff]  ;;  %v2523_v40 = vld [vmem:[#allocation2 + $0x410] sm:$0xff] }
 0x207   : > { %v2549_v19 = vld [vmem:[#allocation2 + $0x248] sm:$0xff]  ;;  %v2707_v21 = vadd.f32 %v2536_v26, %v2535_v9  ;;  %2683 = vadd.xlane.f32.xlu1 %v2682_v10  ;;  %v2539_v37 = vld [vmem:[#allocation2 + $0x4b8] sm:$0xff]  ;;  %v2552_v47 = vld [vmem:[#allocation2 + $0x240] sm:$0xff] }
 0x208   : > { %v2537_v20 = vld [vmem:[#allocation2 + $0x268] sm:$0xff]  ;;  %v2702_v30 = vadd.f32 %v2701_v14, %v2532_v1  ;;  %v2689_v16 = vadd.f32 %v2688_v17, %v2520_v6  ;;  %v2671_v11 = vadd.f32 %v2670_v28, %v2504_v0  ;;  %v2721_v36 = vadd.f32 %v2720_v25, %v2549_v19  ;;  %v2551_v42 = vld [vmem:[#allocation2 + $0x498] sm:$0xff]  ;;  %v2568_v45 = vld [vmem:[#allocation2 + $0xd0] sm:$0xff] }
 0x209   : > { %v2534_v23 = vld [vmem:[#allocation2 + $0x208] sm:$0xff]  ;;  %v2708_v32 = vadd.f32 %v2707_v21, %v2537_v20  ;;  %v2540_v44 = vld [vmem:[#allocation2 + $0x178] sm:$0xff]  ;;  %v2555_v50 = vld [vmem:[#allocation2 + $0x4e0] sm:$0xff] }
 0x20a   : > { %v2521_v24 = vld [vmem:[#allocation2 + $0xe8] sm:$0xff]  ;;  %v2703_v35 = vadd.f32 %v2702_v30, %v2533_v12  ;;  %2672 = vadd.xlane.f32.xlu0 %v2671_v11  ;;  %v2722_v18 = vadd.f32 %v2721_v36, %v2550_v29  ;;  %v2556_v13 = vld [vmem:[#allocation2 + $0x30] sm:$0xff]  ;;  %v2557_v22 = vld [vmem:[#allocation2 + $0x2b8] sm:$0xff] }
 0x20b   : > { %v2565_v34 = vld [vmem:[#allocation2 + $0x128] sm:$0xff]  ;;  %v2690_v41 = vadd.f32 %v2689_v16, %v2521_v24  ;;  %v2709_v43 = vadd.f32 %v2708_v32, %v2538_v27  ;;  %v2569_v54 = vld [vmem:[#allocation2 + $0x230] sm:$0xff]  ;;  %v2729_v15 = vadd.f32 %v2556_v13, %v2555_v50  ;;  %v2553_v56 = vld [vmem:[#allocation2 + $0x100] sm:$0xff] }
 0x20c   : > { %v2567_v39 = vld [vmem:[#allocation2 + $0x148] sm:$0xff]  ;;  %v2740_v7 = vadd.f32 %v2566_v38, %v2565_v34  ;;  %v2704_v46 = vadd.f32 %v2703_v35, %v2534_v23  ;;  %v2723_v52 = vadd.f32 %v2722_v18, %v2551_v42  ;;  %v2558_v33 = vld [vmem:[#allocation2 + $0x1c0] sm:$0xff]  ;;  %v2542_v60 = vld [vmem:[#allocation2 + $0x2f0] sm:$0xff] }
 0x20d   : > { %v2691_v62 = vadd.f32 %v2690_v41, %v2522_v31  ;;  %v2710_v48 = vadd.f32 %v2709_v43, %v2539_v37  ;;  %v2524_v51 = vld [vmem:[#allocation2 + $0xc8] sm:$0xff]  ;;  %v2570_v61 = vld [vmem:[#allocation2 + $0x430] sm:$0xff]  ;;  %v2730_v63 = vadd.f32 %v2729_v15, %v2557_v22  ;;  %v2554_v1 = vld [vmem:[#allocation2 + $0x2d8] sm:$0xff] }
 0x20e   : > { %v2741_v49 = vadd.f32 %v2740_v7, %v2567_v39  ;;  %v2541_v53 = vld [vmem:[#allocation2 + $0x1e8] sm:$0xff]  ;;  %2705 = vadd.xlane.f32.xlu1 %v2704_v46  ;;  %v2724_v59 = vadd.f32 %v2723_v52, %v2552_v47  ;;  %v2543_v6 = vld [vmem:[#allocation2 + $0x3f0] sm:$0xff]  ;;  %v2560_v12 = vld [vmem:[#allocation2 + $0xe0] sm:$0xff] }
 0x20f   : > { %v2692_v55 = vadd.f32 %v2691_v62, %v2523_v40  ;;  %v2711_v57 = vadd.f32 %v2710_v48, %v2540_v44  ;;  %v2559_v4 = vld [vmem:[#allocation2 + $0x468] sm:$0xff]  ;;  %v2571_v8 = vld [vmem:[#allocation2 + $0x370] sm:$0xff]  ;;  %v2731_v9 = vadd.f32 %v2730_v63, %v2558_v33  ;;  %v2572_v19 = vld [vmem:[#allocation2 + $0xc0] sm:$0xff] }
 0x210   : > { %v2742_v58 = vadd.f32 %v2741_v49, %v2568_v45  ;;  %v2725_v5 = vadd.f32 %v2724_v59, %v2553_v56  ;;  %v2544_v17 = vld [vmem:[#allocation2 + $0x170] sm:$0xff]  ;;  %v2561_v23 = vld [vmem:[#allocation2 + $0x58] sm:$0xff]  ;;  %v2574_v16 = vld [vmem:[#allocation2 + $0x1a0] sm:$0xff] }
 0x211   : > { %v2693_v0 = vadd.f32 %v2692_v55, %v2524_v51  ;;  %v2712_v2 = vadd.f32 %v2711_v57, %v2541_v53  ;;  %v2732_v20 = vadd.f32 %v2731_v9, %v2559_v4  ;;  %v2573_v24 = vld [vmem:[#allocation2 + $0x110] sm:$0xff]  ;;  %v2563_v34 = vld [vmem:[#allocation2 + $0x340] sm:$0xff]  ;;  %v2564_v37 = vld [vmem:[#allocation2 + $0x3e8] sm:$0xff] }
 0x212   : > { %v2743_v3 = vadd.f32 %v2742_v58, %v2569_v54  ;;  %v2726_v14 = vadd.f32 %v2725_v5, %v2554_v1  ;;  %v2562_v31 = vld [vmem:[#allocation2 + $0x3d0] sm:$0xff] }
 0x213   : > { %2694 = vadd.xlane.f32.xlu0 %v2693_v0  ;;  %v2713_v26 = vadd.f32 %v2712_v2, %v2542_v60  ;;  %v2733_v25 = vadd.f32 %v2732_v20, %v2560_v12 }
 0x214   : > { %v2744_v10 = vadd.f32 %v2743_v3, %v2570_v61  ;;  %2727 = vadd.xlane.f32.xlu1 %v2726_v14 }
 0x215   : > { %v2714_v21 = vadd.f32 %v2713_v26, %v2543_v6  ;;  %v2734_v29 = vadd.f32 %v2733_v25, %v2561_v23 }
 0x216   : > { %v2745_v28 = vadd.f32 %v2744_v10, %v2571_v8 }
 0x217   : > { %v2715_v27 = vadd.f32 %v2714_v21, %v2544_v17  ;;  %v2735_v11 = vadd.f32 %v2734_v29, %v2562_v31 }
 0x218   : > { %v2746_v30 = vadd.f32 %v2745_v28, %v2572_v19 }
 0x219   : > { %2716 = vadd.xlane.f32.xlu0 %v2715_v27  ;;  %v2736_v38 = vadd.f32 %v2735_v11, %v2563_v34 }
 0x21a   : > { %v2747_v32 = vadd.f32 %v2746_v30, %v2573_v24 }
 0x21b   : > { %v2737_v39 = vadd.f32 %v2736_v38, %v2564_v37 }
 0x21c   : > { %v2748_v36 = vadd.f32 %v2747_v32, %v2574_v16 }
 0x21d   : > { %2738 = vadd.xlane.f32.xlu0 %v2737_v39 }
 0x21e   : > { %2749 = vadd.xlane.f32.xlu1 %v2748_v36 }
 0x27a   : > { %v2607_v35 = vpop.xlane.xlu1 %2606  ;;  %v2585_v40 = vpop.xlane.xlu0 %2584 }
 0x27b   : > { %2754 = vst.msk [vmem:[%s3766_s23 + $0x10] sm:$0xff] %vm2751_vm0, %v2607_v35  ;;  %2752 = vst.msk [vmem:[%s3766_s23] sm:$0xff] %vm2751_vm0, %v2585_v40 }
 0x27e   : > { %v2618_v41 = vpop.xlane.xlu1 %2617 }
 0x27f   : > { %2755 = vst.msk [vmem:[%s3766_s23 + $0x18] sm:$0xff] %vm2751_vm0, %v2618_v41  ;;  %v2596_v42 = vpop.xlane.xlu0 %2595 }
 0x280   : > { %2753 = vst.msk [vmem:[%s3766_s23 + $0x8] sm:$0xff] %vm2751_vm0, %v2596_v42 }
 0x282   : > { %v2640_v43 = vpop.xlane.xlu1 %2639 }
 0x283   : > { %2757 = vst.msk [vmem:[%s3766_s23 + $0x28] sm:$0xff] %vm2751_vm0, %v2640_v43 }
 0x287   : > { %v2629_v7 = vpop.xlane.xlu0 %2628 }
 0x288   : > { %2756 = vst.msk [vmem:[%s3766_s23 + $0x20] sm:$0xff] %vm2751_vm0, %v2629_v7 }
 0x28a   : > { %v2662_v47 = vpop.xlane.xlu1 %2661 }
 0x28b   : > { %2759 = vst.msk [vmem:[%s3766_s23 + $0x38] sm:$0xff] %vm2751_vm0, %v2662_v47 }
 0x28e   : > { %v2651_v18 = vpop.xlane.xlu0 %2650 }
 0x28f   : > { %2758 = vst.msk [vmem:[%s3766_s23 + $0x30] sm:$0xff] %vm2751_vm0, %v2651_v18 }
 0x290   : > { %v2684_v44 = vpop.xlane.xlu1 %2683 }
 0x291   : > { %2761 = vst.msk [vmem:[%s3766_s23 + $0x48] sm:$0xff] %vm2751_vm0, %v2684_v44 }
 0x293   : > { %v2673_v45 = vpop.xlane.xlu0 %2672 }
 0x294   : > { %2760 = vst.msk [vmem:[%s3766_s23 + $0x40] sm:$0xff] %vm2751_vm0, %v2673_v45 }
 0x297   : > { %v2706_v46 = vpop.xlane.xlu1 %2705 }
 0x298   : > { %2763 = vst.msk [vmem:[%s3766_s23 + $0x58] sm:$0xff] %vm2751_vm0, %v2706_v46 }
 0x29c   : > { %v2695_v62 = vpop.xlane.xlu0 %2694 }
 0x29d   : > { %2762 = vst.msk [vmem:[%s3766_s23 + $0x50] sm:$0xff] %vm2751_vm0, %v2695_v62  ;;  %v2728_v48 = vpop.xlane.xlu1 %2727 }
 0x29e   : > { %2765 = vst.msk [vmem:[%s3766_s23 + $0x68] sm:$0xff] %vm2751_vm0, %v2728_v48 }
 0x2a2   : > { %v2717_v49 = vpop.xlane.xlu0 %2716 }
 0x2a3   : > { %2764 = vst.msk [vmem:[%s3766_s23 + $0x60] sm:$0xff] %vm2751_vm0, %v2717_v49 }
 0x2a6   : > { %v2739_v13 = vpop.xlane.xlu0 %2738 }
 0x2a7   : > { %v2750_v50 = vpop.xlane.xlu1 %2749  ;;  %2766 = vst.msk [vmem:[%s3766_s23 + $0x70] sm:$0xff] %vm2751_vm0, %v2739_v13 }
 0x2a8   : > { %2767 = vst.msk [vmem:[%s3766_s23 + $0x78] sm:$0xff] %vm2751_vm0, %v2750_v50 }
 0x2a9 PF: > { %s13_s18 = sadd.s32 1, %s3008_s18   ;;  %s4522_s12 = smov %s2988_s13 }
 0x2aa   : > { %p10_p0 = scmp.ge.s32.totalorder %s13_s18, 6   ;;  %s4523_s13 = smov %s3086_s26 }
 0x2ab   : > { %s4524_s14 = smov %s3000_s16  ;;  %s4525_s15 = smov %s3004_s17 }
 0x2ac   : > { %s4526_s16 = smov %s4529_s19  ;;  %s4527_s17 = smov %s4533_s20 }
 0x2ad   :  { %12 = sbr.rel (!%p10_p0) target bundleno = 4 (0x4), region = 132 }

</bundles_post_ra>
